<compile_context>
chip_gen: v7x
topology: tpu7x:2x2x1
jax: 0.10.0
libtpu: 0.0.40
codegen_flags: <defaults>
</compile_context>

<pallas_src>
import functools

import jax
import jax.numpy as jnp
from jax.experimental import pallas as pl
from jax.experimental.pallas import tpu as pltpu


# ----------------------------------------------------------------------------
# In-kernel helpers (pure tracing-time Python; everything stays in VMEM/vregs).
# ----------------------------------------------------------------------------
def _cell_update(gates, c_prev, H):
    """LSTM cell elementwise update.  gates: (B, 4H) pre-activation in PyTorch
    gate order (i, f, g, o)."""
    sg = jax.nn.sigmoid(gates)
    th = jnp.tanh(gates)
    i = sg[:, 0 * H:1 * H]
    f = sg[:, 1 * H:2 * H]
    g = th[:, 2 * H:3 * H]
    o = sg[:, 3 * H:4 * H]
    c = f * c_prev + i * g
    h = o * jnp.tanh(c)
    return h, c


def _bidir_layer(gx, whh_f, whh_b, T, B, H):
    """Run the fwd + reverse recurrences of one bidirectional layer.

    gx: (T*B, 8H) time-major precomputed input-projection gates
    ([fwd 4H | bwd 4H] per row).  Forward consumes time k while reverse consumes
    time T-1-k in the same (fully unrolled) step; the two chains are independent.
    Returns (per-step fwd hiddens, per-step bwd hiddens, final h_f, final h_b).
    """
    zeros = jnp.zeros((B, H), jnp.float32)
    h_f, c_f = zeros, zeros
    h_b, c_b = zeros, zeros
    hs_f = [None] * T
    hs_b = [None] * T
    for k in range(T):                           # fully unrolled: T is small & static
        # forward direction, time k
        gf = gx[k * B:(k + 1) * B, 0:4 * H] + jnp.dot(
            h_f, whh_f, preferred_element_type=jnp.float32)
        h_f, c_f = _cell_update(gf, c_f, H)
        hs_f[k] = h_f
        # reverse direction, time T-1-k
        kr = T - 1 - k
        gb = gx[kr * B:(kr + 1) * B, 4 * H:8 * H] + jnp.dot(
            h_b, whh_b, preferred_element_type=jnp.float32)
        h_b, c_b = _cell_update(gb, c_b, H)
        hs_b[kr] = h_b
    return hs_f, hs_b, h_f, h_b


# ----------------------------------------------------------------------------
# Fused kernel: all LSTM layers/directions + FC head in one pallas_call.
# ----------------------------------------------------------------------------
def _fused_bilstm_kernel(*refs, T, B, H, L):
    # refs = [x_tmajor, (wih_all, whh_f, whh_b, b_all) * L, fw1, fb1, fw2, fb2, out]
    x_ref = refs[0]                                          # (T*B, D) time-major
    layer_refs = [refs[1 + 4 * l: 1 + 4 * (l + 1)] for l in range(L)]
    fw1_ref, fb1_ref, fw2_ref, fb2_ref = refs[1 + 4 * L: 5 + 4 * L]
    out_ref = refs[5 + 4 * L]

    layer_in = x_ref[...]                                    # (T*B, D_l)
    h_f = h_b = None
    for l in range(L):
        wih_ref, whhf_ref, whhb_ref, b_ref = layer_refs[l]
        # Hoisted input projection: all T steps x both directions in one matmul.
        gx = jnp.dot(layer_in, wih_ref[...],
                     preferred_element_type=jnp.float32) + b_ref[...]   # (T*B, 8H)
        hs_f, hs_b, h_f, h_b = _bidir_layer(
            gx, whhf_ref[...], whhb_ref[...], T, B, H)
        if l < L - 1:
            # Next layer's input, time-major, kept as a vreg-resident value.
            layer_in = jnp.concatenate(
                [jnp.concatenate([hs_f[t], hs_b[t]], axis=1) for t in range(T)],
                axis=0)                                      # (T*B, 2H)

    # ------- hn.view(num_layers, -1, 2H)[-1] (PyTorch's row-major reshape, exactly) -----
    flat = [h_f[r:r + 1, :] for r in range(B)] + [h_b[r:r + 1, :] for r in range(B)]
    hn_last = jnp.concatenate(
        [jnp.concatenate([flat[2 * r], flat[2 * r + 1]], axis=1) for r in range(B)],
        axis=0)                                              # (B, 2H)

    # ------- FC head: relu -> fc1 -> relu -> fc2 -------
    h = jnp.maximum(hn_last, 0.0)
    z1 = jnp.maximum(
        jnp.dot(h, fw1_ref[...], preferred_element_type=jnp.float32) + fb1_ref[...],
        0.0)
    out_ref[...] = (jnp.dot(z1, fw2_ref[...], preferred_element_type=jnp.float32)
                    + fb2_ref[...])


# ----------------------------------------------------------------------------
# Public forward pass: weight re-layout in plain JAX, then ONE pallas_call.
# ----------------------------------------------------------------------------
@functools.partial(jax.jit, static_argnames=("hidden_size", "num_layers",
                                             "num_classes"))
def bilstm_forward(x, lstm_params, fc1_w, fc1_b, fc2_w, fc2_b,
                   *, hidden_size, num_layers, num_classes):
    """x: (B, T, input_size) float32 (batch_first, same as the PyTorch module)."""
    B, T, D = x.shape
    H = hidden_size
    L = num_layers

    # Tiny one-time re-layout to time-major so every layer's input projection is a
    # single contiguous matmul inside the kernel.
    x_tmajor = jnp.transpose(x, (1, 0, 2)).reshape(T * B, D)

    args = [x_tmajor]
    for l in range(L):
        wih_f, whh_f, bih_f, bhh_f = lstm_params[(l, 0)]
        wih_b, whh_b, bih_b, bhh_b = lstm_params[(l, 1)]
        # (D_l, 8H): forward gates in cols [0, 4H), reverse gates in [4H, 8H).
        wih_all = jnp.concatenate([wih_f.T, wih_b.T], axis=1)
        b_all = jnp.concatenate([bih_f + bhh_f, bih_b + bhh_b])[None, :]   # (1, 8H)
        args += [wih_all, whh_f.T, whh_b.T, b_all]
    args += [fc1_w.T, fc1_b[None, :], fc2_w.T, fc2_b[None, :]]

    kernel = functools.partial(_fused_bilstm_kernel, T=T, B=B, H=H, L=L)
    return pl.pallas_call(
        kernel,
        out_shape=jax.ShapeDtypeStruct((B, num_classes), jnp.float32),
        in_specs=[pl.BlockSpec(memory_space=pltpu.MemorySpace.VMEM)] * len(args),
        out_specs=pl.BlockSpec(memory_space=pltpu.MemorySpace.VMEM),
    )(*args)


# ----------------------------------------------------------------------------
# Pure-JAX reference (for verification only).
# ----------------------------------------------------------------------------
def _ref_lstm_layer_dir(x_tmajor, wih, whh, bih, bhh, H):
    T, B, _ = x_tmajor.shape

    def step(carry, x_t):
        h, c = carry
        gates = x_t @ wih.T + bih + h @ whh.T + bhh
        i = jax.nn.sigmoid(gates[:, :H])
        f = jax.nn.sigmoid(gates[:, H:2 * H])
        g = jnp.tanh(gates[:, 2 * H:3 * H])
        o = jax.nn.sigmoid(gates[:, 3 * H:])
        c = f * c + i * g
        h = o * jnp.tanh(c)
        return (h, c), h

    init = (jnp.zeros((B, H), jnp.float32), jnp.zeros((B, H), jnp.float32))
    (h, _), hs = jax.lax.scan(step, init, x_tmajor)
    return hs, h


def _ref_forward(x, lstm_params, fc1_w, fc1_b, fc2_w, fc2_b,
                 hidden_size, num_layers):
    H = hidden_size
    layer_in = jnp.transpose(x, (1, 0, 2))
    hn_list = []
    for l in range(num_layers):
        dir_outs = []
        for d in range(2):
            wih, whh, bih, bhh = lstm_params[(l, d)]
            inp = layer_in if d == 0 else jnp.flip(layer_in, axis=0)
            hseq, hfin = _ref_lstm_layer_dir(inp, wih, whh, bih, bhh, H)
            if d == 1:
                hseq = jnp.flip(hseq, axis=0)
            dir_outs.append(hseq)
            hn_list.append(hfin)
        layer_in = jnp.concatenate(dir_outs, axis=-1)
    hn = jnp.stack(hn_list, axis=0)
    hn_last = hn.reshape(num_layers, -1, 2 * H)[-1]
    out = jnp.maximum(hn_last, 0.0)
    out = jnp.maximum(out @ fc1_w.T + fc1_b, 0.0)
    return out @ fc2_w.T + fc2_b


# ----------------------------------------------------------------------------
# Main
# ----------------------------------------------------------------------------
if __name__ == "__main__":
    num_classes = 5
    input_size = 4
    hidden_size = 32
    num_layers = 2
    batch = 2
    seq = 8

    key = jax.random.PRNGKey(0)
    k = 1.0 / jnp.sqrt(hidden_size)

    # Deterministic parameter init (uniform in [-1/sqrt(H), 1/sqrt(H)]).
    lstm_params = {}
    for l in range(num_layers):
        d_in = input_size if l == 0 else 2 * hidden_size
        for d in range(2):
            key, k1, k2, k3, k4 = jax.random.split(key, 5)
            lstm_params[(l, d)] = (
                jax.random.uniform(k1, (4 * hidden_size, d_in), jnp.float32, -k, k),
                jax.random.uniform(k2, (4 * hidden_size, hidden_size), jnp.float32, -k, k),
                jax.random.uniform(k3, (4 * hidden_size,), jnp.float32, -k, k),
                jax.random.uniform(k4, (4 * hidden_size,), jnp.float32, -k, k),
            )

    key, k1, k2, k3, k4, kx = jax.random.split(key, 6)
    fc1_w = jax.random.uniform(k1, (128, 2 * hidden_size), jnp.float32, -k, k)
    fc1_b = jax.random.uniform(k2, (128,), jnp.float32, -k, k)
    fc2_w = jax.random.uniform(k3, (num_classes, 128), jnp.float32, -k, k)
    fc2_b = jax.random.uniform(k4, (num_classes,), jnp.float32, -k, k)

    x = jax.random.normal(kx, (batch, seq, input_size), jnp.float32)

    out = bilstm_forward(x, lstm_params, fc1_w, fc1_b, fc2_w, fc2_b,
                         hidden_size=hidden_size, num_layers=num_layers,
                         num_classes=num_classes)
    out = jax.block_until_ready(out)

    ref = _ref_forward(x, lstm_params, fc1_w, fc1_b, fc2_w, fc2_b,
                       hidden_size, num_layers)
    assert out.shape == (batch, num_classes)
    assert jnp.allclose(out, ref, atol=2e-5, rtol=2e-5), (
        f"max abs err {jnp.max(jnp.abs(out - ref))}")

    print("KERNEL_OK")
</pallas_src>

<mosaic_0001>
module attributes {stable_mosaic.version = 11 : i64} {
  func.func @_fused_bilstm_kernel(%arg0: memref<16x4xf32, #tpu.memory_space<vmem>>, %arg1: memref<4x256xf32, #tpu.memory_space<vmem>>, %arg2: memref<32x128xf32, #tpu.memory_space<vmem>>, %arg3: memref<32x128xf32, #tpu.memory_space<vmem>>, %arg4: memref<1x256xf32, #tpu.memory_space<vmem>>, %arg5: memref<64x256xf32, #tpu.memory_space<vmem>>, %arg6: memref<32x128xf32, #tpu.memory_space<vmem>>, %arg7: memref<32x128xf32, #tpu.memory_space<vmem>>, %arg8: memref<1x256xf32, #tpu.memory_space<vmem>>, %arg9: memref<64x128xf32, #tpu.memory_space<vmem>>, %arg10: memref<1x128xf32, #tpu.memory_space<vmem>>, %arg11: memref<128x5xf32, #tpu.memory_space<vmem>>, %arg12: memref<1x5xf32, #tpu.memory_space<vmem>>, %arg13: memref<2x5xf32, #tpu.memory_space<vmem>>) attributes {dimension_semantics = [], scalar_prefetch = 0 : i64, scratch_operands = 0 : i64, tpu.core_type = #tpu.core_type<tc>} {
    %c0 = arith.constant 0 : index
    %c0_0 = arith.constant 0 : index
    %0 = vector.load %arg0[%c0, %c0_0] : memref<16x4xf32, #tpu.memory_space<vmem>>, vector<16x4xf32>
    %c0_1 = arith.constant 0 : index
    %c0_2 = arith.constant 0 : index
    %1 = vector.load %arg1[%c0_1, %c0_2] : memref<4x256xf32, #tpu.memory_space<vmem>>, vector<4x256xf32>
    %cst = arith.constant dense<0.000000e+00> : vector<16x256xf32>
    %2 = tpu.matmul %0, %1, %cst {dimension_numbers = #tpu.dot_dimension_numbers<[1], [0], [0], [1], [0, 0, 1, 1], [], []>} : vector<16x4xf32>, vector<4x256xf32>, vector<16x256xf32> -> vector<16x256xf32>
    %c0_3 = arith.constant 0 : index
    %c0_4 = arith.constant 0 : index
    %3 = vector.load %arg4[%c0_3, %c0_4] : memref<1x256xf32, #tpu.memory_space<vmem>>, vector<1x256xf32>
    %4 = vector.broadcast %3 : vector<1x256xf32> to vector<16x256xf32>
    %5 = arith.addf %2, %4 : vector<16x256xf32>
    %c0_5 = arith.constant 0 : index
    %c0_6 = arith.constant 0 : index
    %6 = vector.load %arg2[%c0_5, %c0_6] : memref<32x128xf32, #tpu.memory_space<vmem>>, vector<32x128xf32>
    %c0_7 = arith.constant 0 : index
    %c0_8 = arith.constant 0 : index
    %7 = vector.load %arg3[%c0_7, %c0_8] : memref<32x128xf32, #tpu.memory_space<vmem>>, vector<32x128xf32>
    %cst_9 = arith.constant 0.000000e+00 : f32
    %8 = vector.broadcast %cst_9 : f32 to vector<2x32xf32>
    %9 = vector.extract_strided_slice %5 {offsets = [0, 0], sizes = [2, 128], strides = [1, 1]} : vector<16x256xf32> to vector<2x128xf32>
    %cst_10 = arith.constant dense<0.000000e+00> : vector<2x128xf32>
    %10 = tpu.matmul %8, %6, %cst_10 {dimension_numbers = #tpu.dot_dimension_numbers<[1], [0], [0], [1], [0, 0, 1, 1], [], []>} : vector<2x32xf32>, vector<32x128xf32>, vector<2x128xf32> -> vector<2x128xf32>
    %11 = arith.addf %9, %10 : vector<2x128xf32>
    %12 = arith.negf %11 : vector<2x128xf32>
    %13 = math.exp %12 : vector<2x128xf32>
    %cst_11 = arith.constant 1.000000e+00 : f32
    %14 = vector.broadcast %cst_11 : f32 to vector<2x128xf32>
    %15 = arith.addf %14, %13 : vector<2x128xf32>
    %16 = arith.divf %14, %15 : vector<2x128xf32>
    %17 = math.tanh %11 : vector<2x128xf32>
    %18 = vector.extract_strided_slice %16 {offsets = [0, 0], sizes = [2, 32], strides = [1, 1]} : vector<2x128xf32> to vector<2x32xf32>
    %19 = vector.extract_strided_slice %16 {offsets = [0, 32], sizes = [2, 32], strides = [1, 1]} : vector<2x128xf32> to vector<2x32xf32>
    %20 = vector.extract_strided_slice %17 {offsets = [0, 64], sizes = [2, 32], strides = [1, 1]} : vector<2x128xf32> to vector<2x32xf32>
    %21 = vector.extract_strided_slice %16 {offsets = [0, 96], sizes = [2, 32], strides = [1, 1]} : vector<2x128xf32> to vector<2x32xf32>
    %22 = arith.mulf %19, %8 : vector<2x32xf32>
    %23 = arith.mulf %18, %20 : vector<2x32xf32>
    %24 = arith.addf %22, %23 : vector<2x32xf32>
    %25 = math.tanh %24 : vector<2x32xf32>
    %26 = arith.mulf %21, %25 : vector<2x32xf32>
    %27 = vector.extract_strided_slice %5 {offsets = [14, 128], sizes = [2, 128], strides = [1, 1]} : vector<16x256xf32> to vector<2x128xf32>
    %cst_12 = arith.constant dense<0.000000e+00> : vector<2x128xf32>
    %28 = tpu.matmul %8, %7, %cst_12 {dimension_numbers = #tpu.dot_dimension_numbers<[1], [0], [0], [1], [0, 0, 1, 1], [], []>} : vector<2x32xf32>, vector<32x128xf32>, vector<2x128xf32> -> vector<2x128xf32>
    %29 = arith.addf %27, %28 : vector<2x128xf32>
    %30 = arith.negf %29 : vector<2x128xf32>
    %31 = math.exp %30 : vector<2x128xf32>
    %cst_13 = arith.constant 1.000000e+00 : f32
    %32 = vector.broadcast %cst_13 : f32 to vector<2x128xf32>
    %33 = arith.addf %32, %31 : vector<2x128xf32>
    %34 = arith.divf %32, %33 : vector<2x128xf32>
    %35 = math.tanh %29 : vector<2x128xf32>
    %36 = vector.extract_strided_slice %34 {offsets = [0, 0], sizes = [2, 32], strides = [1, 1]} : vector<2x128xf32> to vector<2x32xf32>
    %37 = vector.extract_strided_slice %34 {offsets = [0, 32], sizes = [2, 32], strides = [1, 1]} : vector<2x128xf32> to vector<2x32xf32>
    %38 = vector.extract_strided_slice %35 {offsets = [0, 64], sizes = [2, 32], strides = [1, 1]} : vector<2x128xf32> to vector<2x32xf32>
    %39 = vector.extract_strided_slice %34 {offsets = [0, 96], sizes = [2, 32], strides = [1, 1]} : vector<2x128xf32> to vector<2x32xf32>
    %40 = arith.mulf %37, %8 : vector<2x32xf32>
    %41 = arith.mulf %36, %38 : vector<2x32xf32>
    %42 = arith.addf %40, %41 : vector<2x32xf32>
    %43 = math.tanh %42 : vector<2x32xf32>
    %44 = arith.mulf %39, %43 : vector<2x32xf32>
    %45 = vector.extract_strided_slice %5 {offsets = [2, 0], sizes = [2, 128], strides = [1, 1]} : vector<16x256xf32> to vector<2x128xf32>
    %cst_14 = arith.constant dense<0.000000e+00> : vector<2x128xf32>
    %46 = tpu.matmul %26, %6, %cst_14 {dimension_numbers = #tpu.dot_dimension_numbers<[1], [0], [0], [1], [0, 0, 1, 1], [], []>} : vector<2x32xf32>, vector<32x128xf32>, vector<2x128xf32> -> vector<2x128xf32>
    %47 = arith.addf %45, %46 : vector<2x128xf32>
    %48 = arith.negf %47 : vector<2x128xf32>
    %49 = math.exp %48 : vector<2x128xf32>
    %cst_15 = arith.constant 1.000000e+00 : f32
    %50 = vector.broadcast %cst_15 : f32 to vector<2x128xf32>
    %51 = arith.addf %50, %49 : vector<2x128xf32>
    %52 = arith.divf %50, %51 : vector<2x128xf32>
    %53 = math.tanh %47 : vector<2x128xf32>
    %54 = vector.extract_strided_slice %52 {offsets = [0, 0], sizes = [2, 32], strides = [1, 1]} : vector<2x128xf32> to vector<2x32xf32>
    %55 = vector.extract_strided_slice %52 {offsets = [0, 32], sizes = [2, 32], strides = [1, 1]} : vector<2x128xf32> to vector<2x32xf32>
    %56 = vector.extract_strided_slice %53 {offsets = [0, 64], sizes = [2, 32], strides = [1, 1]} : vector<2x128xf32> to vector<2x32xf32>
    %57 = vector.extract_strided_slice %52 {offsets = [0, 96], sizes = [2, 32], strides = [1, 1]} : vector<2x128xf32> to vector<2x32xf32>
    %58 = arith.mulf %55, %24 : vector<2x32xf32>
    %59 = arith.mulf %54, %56 : vector<2x32xf32>
    %60 = arith.addf %58, %59 : vector<2x32xf32>
    %61 = math.tanh %60 : vector<2x32xf32>
    %62 = arith.mulf %57, %61 : vector<2x32xf32>
    %63 = vector.extract_strided_slice %5 {offsets = [12, 128], sizes = [2, 128], strides = [1, 1]} : vector<16x256xf32> to vector<2x128xf32>
    %cst_16 = arith.constant dense<0.000000e+00> : vector<2x128xf32>
    %64 = tpu.matmul %44, %7, %cst_16 {dimension_numbers = #tpu.dot_dimension_numbers<[1], [0], [0], [1], [0, 0, 1, 1], [], []>} : vector<2x32xf32>, vector<32x128xf32>, vector<2x128xf32> -> vector<2x128xf32>
    %65 = arith.addf %63, %64 : vector<2x128xf32>
    %66 = arith.negf %65 : vector<2x128xf32>
    %67 = math.exp %66 : vector<2x128xf32>
    %cst_17 = arith.constant 1.000000e+00 : f32
    %68 = vector.broadcast %cst_17 : f32 to vector<2x128xf32>
    %69 = arith.addf %68, %67 : vector<2x128xf32>
    %70 = arith.divf %68, %69 : vector<2x128xf32>
    %71 = math.tanh %65 : vector<2x128xf32>
    %72 = vector.extract_strided_slice %70 {offsets = [0, 0], sizes = [2, 32], strides = [1, 1]} : vector<2x128xf32> to vector<2x32xf32>
    %73 = vector.extract_strided_slice %70 {offsets = [0, 32], sizes = [2, 32], strides = [1, 1]} : vector<2x128xf32> to vector<2x32xf32>
    %74 = vector.extract_strided_slice %71 {offsets = [0, 64], sizes = [2, 32], strides = [1, 1]} : vector<2x128xf32> to vector<2x32xf32>
    %75 = vector.extract_strided_slice %70 {offsets = [0, 96], sizes = [2, 32], strides = [1, 1]} : vector<2x128xf32> to vector<2x32xf32>
    %76 = arith.mulf %73, %42 : vector<2x32xf32>
    %77 = arith.mulf %72, %74 : vector<2x32xf32>
    %78 = arith.addf %76, %77 : vector<2x32xf32>
    %79 = math.tanh %78 : vector<2x32xf32>
    %80 = arith.mulf %75, %79 : vector<2x32xf32>
    %81 = vector.extract_strided_slice %5 {offsets = [4, 0], sizes = [2, 128], strides = [1, 1]} : vector<16x256xf32> to vector<2x128xf32>
    %cst_18 = arith.constant dense<0.000000e+00> : vector<2x128xf32>
    %82 = tpu.matmul %62, %6, %cst_18 {dimension_numbers = #tpu.dot_dimension_numbers<[1], [0], [0], [1], [0, 0, 1, 1], [], []>} : vector<2x32xf32>, vector<32x128xf32>, vector<2x128xf32> -> vector<2x128xf32>
    %83 = arith.addf %81, %82 : vector<2x128xf32>
    %84 = arith.negf %83 : vector<2x128xf32>
    %85 = math.exp %84 : vector<2x128xf32>
    %cst_19 = arith.constant 1.000000e+00 : f32
    %86 = vector.broadcast %cst_19 : f32 to vector<2x128xf32>
    %87 = arith.addf %86, %85 : vector<2x128xf32>
    %88 = arith.divf %86, %87 : vector<2x128xf32>
    %89 = math.tanh %83 : vector<2x128xf32>
    %90 = vector.extract_strided_slice %88 {offsets = [0, 0], sizes = [2, 32], strides = [1, 1]} : vector<2x128xf32> to vector<2x32xf32>
    %91 = vector.extract_strided_slice %88 {offsets = [0, 32], sizes = [2, 32], strides = [1, 1]} : vector<2x128xf32> to vector<2x32xf32>
    %92 = vector.extract_strided_slice %89 {offsets = [0, 64], sizes = [2, 32], strides = [1, 1]} : vector<2x128xf32> to vector<2x32xf32>
    %93 = vector.extract_strided_slice %88 {offsets = [0, 96], sizes = [2, 32], strides = [1, 1]} : vector<2x128xf32> to vector<2x32xf32>
    %94 = arith.mulf %91, %60 : vector<2x32xf32>
    %95 = arith.mulf %90, %92 : vector<2x32xf32>
    %96 = arith.addf %94, %95 : vector<2x32xf32>
    %97 = math.tanh %96 : vector<2x32xf32>
    %98 = arith.mulf %93, %97 : vector<2x32xf32>
    %99 = vector.extract_strided_slice %5 {offsets = [10, 128], sizes = [2, 128], strides = [1, 1]} : vector<16x256xf32> to vector<2x128xf32>
    %cst_20 = arith.constant dense<0.000000e+00> : vector<2x128xf32>
    %100 = tpu.matmul %80, %7, %cst_20 {dimension_numbers = #tpu.dot_dimension_numbers<[1], [0], [0], [1], [0, 0, 1, 1], [], []>} : vector<2x32xf32>, vector<32x128xf32>, vector<2x128xf32> -> vector<2x128xf32>
    %101 = arith.addf %99, %100 : vector<2x128xf32>
    %102 = arith.negf %101 : vector<2x128xf32>
    %103 = math.exp %102 : vector<2x128xf32>
    %cst_21 = arith.constant 1.000000e+00 : f32
    %104 = vector.broadcast %cst_21 : f32 to vector<2x128xf32>
    %105 = arith.addf %104, %103 : vector<2x128xf32>
    %106 = arith.divf %104, %105 : vector<2x128xf32>
    %107 = math.tanh %101 : vector<2x128xf32>
    %108 = vector.extract_strided_slice %106 {offsets = [0, 0], sizes = [2, 32], strides = [1, 1]} : vector<2x128xf32> to vector<2x32xf32>
    %109 = vector.extract_strided_slice %106 {offsets = [0, 32], sizes = [2, 32], strides = [1, 1]} : vector<2x128xf32> to vector<2x32xf32>
    %110 = vector.extract_strided_slice %107 {offsets = [0, 64], sizes = [2, 32], strides = [1, 1]} : vector<2x128xf32> to vector<2x32xf32>
    %111 = vector.extract_strided_slice %106 {offsets = [0, 96], sizes = [2, 32], strides = [1, 1]} : vector<2x128xf32> to vector<2x32xf32>
    %112 = arith.mulf %109, %78 : vector<2x32xf32>
    %113 = arith.mulf %108, %110 : vector<2x32xf32>
    %114 = arith.addf %112, %113 : vector<2x32xf32>
    %115 = math.tanh %114 : vector<2x32xf32>
    %116 = arith.mulf %111, %115 : vector<2x32xf32>
    %117 = vector.extract_strided_slice %5 {offsets = [6, 0], sizes = [2, 128], strides = [1, 1]} : vector<16x256xf32> to vector<2x128xf32>
    %cst_22 = arith.constant dense<0.000000e+00> : vector<2x128xf32>
    %118 = tpu.matmul %98, %6, %cst_22 {dimension_numbers = #tpu.dot_dimension_numbers<[1], [0], [0], [1], [0, 0, 1, 1], [], []>} : vector<2x32xf32>, vector<32x128xf32>, vector<2x128xf32> -> vector<2x128xf32>
    %119 = arith.addf %117, %118 : vector<2x128xf32>
    %120 = arith.negf %119 : vector<2x128xf32>
    %121 = math.exp %120 : vector<2x128xf32>
    %cst_23 = arith.constant 1.000000e+00 : f32
    %122 = vector.broadcast %cst_23 : f32 to vector<2x128xf32>
    %123 = arith.addf %122, %121 : vector<2x128xf32>
    %124 = arith.divf %122, %123 : vector<2x128xf32>
    %125 = math.tanh %119 : vector<2x128xf32>
    %126 = vector.extract_strided_slice %124 {offsets = [0, 0], sizes = [2, 32], strides = [1, 1]} : vector<2x128xf32> to vector<2x32xf32>
    %127 = vector.extract_strided_slice %124 {offsets = [0, 32], sizes = [2, 32], strides = [1, 1]} : vector<2x128xf32> to vector<2x32xf32>
    %128 = vector.extract_strided_slice %125 {offsets = [0, 64], sizes = [2, 32], strides = [1, 1]} : vector<2x128xf32> to vector<2x32xf32>
    %129 = vector.extract_strided_slice %124 {offsets = [0, 96], sizes = [2, 32], strides = [1, 1]} : vector<2x128xf32> to vector<2x32xf32>
    %130 = arith.mulf %127, %96 : vector<2x32xf32>
    %131 = arith.mulf %126, %128 : vector<2x32xf32>
    %132 = arith.addf %130, %131 : vector<2x32xf32>
    %133 = math.tanh %132 : vector<2x32xf32>
    %134 = arith.mulf %129, %133 : vector<2x32xf32>
    %135 = vector.extract_strided_slice %5 {offsets = [8, 128], sizes = [2, 128], strides = [1, 1]} : vector<16x256xf32> to vector<2x128xf32>
    %cst_24 = arith.constant dense<0.000000e+00> : vector<2x128xf32>
    %136 = tpu.matmul %116, %7, %cst_24 {dimension_numbers = #tpu.dot_dimension_numbers<[1], [0], [0], [1], [0, 0, 1, 1], [], []>} : vector<2x32xf32>, vector<32x128xf32>, vector<2x128xf32> -> vector<2x128xf32>
    %137 = arith.addf %135, %136 : vector<2x128xf32>
    %138 = arith.negf %137 : vector<2x128xf32>
    %139 = math.exp %138 : vector<2x128xf32>
    %cst_25 = arith.constant 1.000000e+00 : f32
    %140 = vector.broadcast %cst_25 : f32 to vector<2x128xf32>
    %141 = arith.addf %140, %139 : vector<2x128xf32>
    %142 = arith.divf %140, %141 : vector<2x128xf32>
    %143 = math.tanh %137 : vector<2x128xf32>
    %144 = vector.extract_strided_slice %142 {offsets = [0, 0], sizes = [2, 32], strides = [1, 1]} : vector<2x128xf32> to vector<2x32xf32>
    %145 = vector.extract_strided_slice %142 {offsets = [0, 32], sizes = [2, 32], strides = [1, 1]} : vector<2x128xf32> to vector<2x32xf32>
    %146 = vector.extract_strided_slice %143 {offsets = [0, 64], sizes = [2, 32], strides = [1, 1]} : vector<2x128xf32> to vector<2x32xf32>
    %147 = vector.extract_strided_slice %142 {offsets = [0, 96], sizes = [2, 32], strides = [1, 1]} : vector<2x128xf32> to vector<2x32xf32>
    %148 = arith.mulf %145, %114 : vector<2x32xf32>
    %149 = arith.mulf %144, %146 : vector<2x32xf32>
    %150 = arith.addf %148, %149 : vector<2x32xf32>
    %151 = math.tanh %150 : vector<2x32xf32>
    %152 = arith.mulf %147, %151 : vector<2x32xf32>
    %153 = vector.extract_strided_slice %5 {offsets = [8, 0], sizes = [2, 128], strides = [1, 1]} : vector<16x256xf32> to vector<2x128xf32>
    %cst_26 = arith.constant dense<0.000000e+00> : vector<2x128xf32>
    %154 = tpu.matmul %134, %6, %cst_26 {dimension_numbers = #tpu.dot_dimension_numbers<[1], [0], [0], [1], [0, 0, 1, 1], [], []>} : vector<2x32xf32>, vector<32x128xf32>, vector<2x128xf32> -> vector<2x128xf32>
    %155 = arith.addf %153, %154 : vector<2x128xf32>
    %156 = arith.negf %155 : vector<2x128xf32>
    %157 = math.exp %156 : vector<2x128xf32>
    %cst_27 = arith.constant 1.000000e+00 : f32
    %158 = vector.broadcast %cst_27 : f32 to vector<2x128xf32>
    %159 = arith.addf %158, %157 : vector<2x128xf32>
    %160 = arith.divf %158, %159 : vector<2x128xf32>
    %161 = math.tanh %155 : vector<2x128xf32>
    %162 = vector.extract_strided_slice %160 {offsets = [0, 0], sizes = [2, 32], strides = [1, 1]} : vector<2x128xf32> to vector<2x32xf32>
    %163 = vector.extract_strided_slice %160 {offsets = [0, 32], sizes = [2, 32], strides = [1, 1]} : vector<2x128xf32> to vector<2x32xf32>
    %164 = vector.extract_strided_slice %161 {offsets = [0, 64], sizes = [2, 32], strides = [1, 1]} : vector<2x128xf32> to vector<2x32xf32>
    %165 = vector.extract_strided_slice %160 {offsets = [0, 96], sizes = [2, 32], strides = [1, 1]} : vector<2x128xf32> to vector<2x32xf32>
    %166 = arith.mulf %163, %132 : vector<2x32xf32>
    %167 = arith.mulf %162, %164 : vector<2x32xf32>
    %168 = arith.addf %166, %167 : vector<2x32xf32>
    %169 = math.tanh %168 : vector<2x32xf32>
    %170 = arith.mulf %165, %169 : vector<2x32xf32>
    %171 = vector.extract_strided_slice %5 {offsets = [6, 128], sizes = [2, 128], strides = [1, 1]} : vector<16x256xf32> to vector<2x128xf32>
    %cst_28 = arith.constant dense<0.000000e+00> : vector<2x128xf32>
    %172 = tpu.matmul %152, %7, %cst_28 {dimension_numbers = #tpu.dot_dimension_numbers<[1], [0], [0], [1], [0, 0, 1, 1], [], []>} : vector<2x32xf32>, vector<32x128xf32>, vector<2x128xf32> -> vector<2x128xf32>
    %173 = arith.addf %171, %172 : vector<2x128xf32>
    %174 = arith.negf %173 : vector<2x128xf32>
    %175 = math.exp %174 : vector<2x128xf32>
    %cst_29 = arith.constant 1.000000e+00 : f32
    %176 = vector.broadcast %cst_29 : f32 to vector<2x128xf32>
    %177 = arith.addf %176, %175 : vector<2x128xf32>
    %178 = arith.divf %176, %177 : vector<2x128xf32>
    %179 = math.tanh %173 : vector<2x128xf32>
    %180 = vector.extract_strided_slice %178 {offsets = [0, 0], sizes = [2, 32], strides = [1, 1]} : vector<2x128xf32> to vector<2x32xf32>
    %181 = vector.extract_strided_slice %178 {offsets = [0, 32], sizes = [2, 32], strides = [1, 1]} : vector<2x128xf32> to vector<2x32xf32>
    %182 = vector.extract_strided_slice %179 {offsets = [0, 64], sizes = [2, 32], strides = [1, 1]} : vector<2x128xf32> to vector<2x32xf32>
    %183 = vector.extract_strided_slice %178 {offsets = [0, 96], sizes = [2, 32], strides = [1, 1]} : vector<2x128xf32> to vector<2x32xf32>
    %184 = arith.mulf %181, %150 : vector<2x32xf32>
    %185 = arith.mulf %180, %182 : vector<2x32xf32>
    %186 = arith.addf %184, %185 : vector<2x32xf32>
    %187 = math.tanh %186 : vector<2x32xf32>
    %188 = arith.mulf %183, %187 : vector<2x32xf32>
    %189 = vector.extract_strided_slice %5 {offsets = [10, 0], sizes = [2, 128], strides = [1, 1]} : vector<16x256xf32> to vector<2x128xf32>
    %cst_30 = arith.constant dense<0.000000e+00> : vector<2x128xf32>
    %190 = tpu.matmul %170, %6, %cst_30 {dimension_numbers = #tpu.dot_dimension_numbers<[1], [0], [0], [1], [0, 0, 1, 1], [], []>} : vector<2x32xf32>, vector<32x128xf32>, vector<2x128xf32> -> vector<2x128xf32>
    %191 = arith.addf %189, %190 : vector<2x128xf32>
    %192 = arith.negf %191 : vector<2x128xf32>
    %193 = math.exp %192 : vector<2x128xf32>
    %cst_31 = arith.constant 1.000000e+00 : f32
    %194 = vector.broadcast %cst_31 : f32 to vector<2x128xf32>
    %195 = arith.addf %194, %193 : vector<2x128xf32>
    %196 = arith.divf %194, %195 : vector<2x128xf32>
    %197 = math.tanh %191 : vector<2x128xf32>
    %198 = vector.extract_strided_slice %196 {offsets = [0, 0], sizes = [2, 32], strides = [1, 1]} : vector<2x128xf32> to vector<2x32xf32>
    %199 = vector.extract_strided_slice %196 {offsets = [0, 32], sizes = [2, 32], strides = [1, 1]} : vector<2x128xf32> to vector<2x32xf32>
    %200 = vector.extract_strided_slice %197 {offsets = [0, 64], sizes = [2, 32], strides = [1, 1]} : vector<2x128xf32> to vector<2x32xf32>
    %201 = vector.extract_strided_slice %196 {offsets = [0, 96], sizes = [2, 32], strides = [1, 1]} : vector<2x128xf32> to vector<2x32xf32>
    %202 = arith.mulf %199, %168 : vector<2x32xf32>
    %203 = arith.mulf %198, %200 : vector<2x32xf32>
    %204 = arith.addf %202, %203 : vector<2x32xf32>
    %205 = math.tanh %204 : vector<2x32xf32>
    %206 = arith.mulf %201, %205 : vector<2x32xf32>
    %207 = vector.extract_strided_slice %5 {offsets = [4, 128], sizes = [2, 128], strides = [1, 1]} : vector<16x256xf32> to vector<2x128xf32>
    %cst_32 = arith.constant dense<0.000000e+00> : vector<2x128xf32>
    %208 = tpu.matmul %188, %7, %cst_32 {dimension_numbers = #tpu.dot_dimension_numbers<[1], [0], [0], [1], [0, 0, 1, 1], [], []>} : vector<2x32xf32>, vector<32x128xf32>, vector<2x128xf32> -> vector<2x128xf32>
    %209 = arith.addf %207, %208 : vector<2x128xf32>
    %210 = arith.negf %209 : vector<2x128xf32>
    %211 = math.exp %210 : vector<2x128xf32>
    %cst_33 = arith.constant 1.000000e+00 : f32
    %212 = vector.broadcast %cst_33 : f32 to vector<2x128xf32>
    %213 = arith.addf %212, %211 : vector<2x128xf32>
    %214 = arith.divf %212, %213 : vector<2x128xf32>
    %215 = math.tanh %209 : vector<2x128xf32>
    %216 = vector.extract_strided_slice %214 {offsets = [0, 0], sizes = [2, 32], strides = [1, 1]} : vector<2x128xf32> to vector<2x32xf32>
    %217 = vector.extract_strided_slice %214 {offsets = [0, 32], sizes = [2, 32], strides = [1, 1]} : vector<2x128xf32> to vector<2x32xf32>
    %218 = vector.extract_strided_slice %215 {offsets = [0, 64], sizes = [2, 32], strides = [1, 1]} : vector<2x128xf32> to vector<2x32xf32>
    %219 = vector.extract_strided_slice %214 {offsets = [0, 96], sizes = [2, 32], strides = [1, 1]} : vector<2x128xf32> to vector<2x32xf32>
    %220 = arith.mulf %217, %186 : vector<2x32xf32>
    %221 = arith.mulf %216, %218 : vector<2x32xf32>
    %222 = arith.addf %220, %221 : vector<2x32xf32>
    %223 = math.tanh %222 : vector<2x32xf32>
    %224 = arith.mulf %219, %223 : vector<2x32xf32>
    %225 = vector.extract_strided_slice %5 {offsets = [12, 0], sizes = [2, 128], strides = [1, 1]} : vector<16x256xf32> to vector<2x128xf32>
    %cst_34 = arith.constant dense<0.000000e+00> : vector<2x128xf32>
    %226 = tpu.matmul %206, %6, %cst_34 {dimension_numbers = #tpu.dot_dimension_numbers<[1], [0], [0], [1], [0, 0, 1, 1], [], []>} : vector<2x32xf32>, vector<32x128xf32>, vector<2x128xf32> -> vector<2x128xf32>
    %227 = arith.addf %225, %226 : vector<2x128xf32>
    %228 = arith.negf %227 : vector<2x128xf32>
    %229 = math.exp %228 : vector<2x128xf32>
    %cst_35 = arith.constant 1.000000e+00 : f32
    %230 = vector.broadcast %cst_35 : f32 to vector<2x128xf32>
    %231 = arith.addf %230, %229 : vector<2x128xf32>
    %232 = arith.divf %230, %231 : vector<2x128xf32>
    %233 = math.tanh %227 : vector<2x128xf32>
    %234 = vector.extract_strided_slice %232 {offsets = [0, 0], sizes = [2, 32], strides = [1, 1]} : vector<2x128xf32> to vector<2x32xf32>
    %235 = vector.extract_strided_slice %232 {offsets = [0, 32], sizes = [2, 32], strides = [1, 1]} : vector<2x128xf32> to vector<2x32xf32>
    %236 = vector.extract_strided_slice %233 {offsets = [0, 64], sizes = [2, 32], strides = [1, 1]} : vector<2x128xf32> to vector<2x32xf32>
    %237 = vector.extract_strided_slice %232 {offsets = [0, 96], sizes = [2, 32], strides = [1, 1]} : vector<2x128xf32> to vector<2x32xf32>
    %238 = arith.mulf %235, %204 : vector<2x32xf32>
    %239 = arith.mulf %234, %236 : vector<2x32xf32>
    %240 = arith.addf %238, %239 : vector<2x32xf32>
    %241 = math.tanh %240 : vector<2x32xf32>
    %242 = arith.mulf %237, %241 : vector<2x32xf32>
    %243 = vector.extract_strided_slice %5 {offsets = [2, 128], sizes = [2, 128], strides = [1, 1]} : vector<16x256xf32> to vector<2x128xf32>
    %cst_36 = arith.constant dense<0.000000e+00> : vector<2x128xf32>
    %244 = tpu.matmul %224, %7, %cst_36 {dimension_numbers = #tpu.dot_dimension_numbers<[1], [0], [0], [1], [0, 0, 1, 1], [], []>} : vector<2x32xf32>, vector<32x128xf32>, vector<2x128xf32> -> vector<2x128xf32>
    %245 = arith.addf %243, %244 : vector<2x128xf32>
    %246 = arith.negf %245 : vector<2x128xf32>
    %247 = math.exp %246 : vector<2x128xf32>
    %cst_37 = arith.constant 1.000000e+00 : f32
    %248 = vector.broadcast %cst_37 : f32 to vector<2x128xf32>
    %249 = arith.addf %248, %247 : vector<2x128xf32>
    %250 = arith.divf %248, %249 : vector<2x128xf32>
    %251 = math.tanh %245 : vector<2x128xf32>
    %252 = vector.extract_strided_slice %250 {offsets = [0, 0], sizes = [2, 32], strides = [1, 1]} : vector<2x128xf32> to vector<2x32xf32>
    %253 = vector.extract_strided_slice %250 {offsets = [0, 32], sizes = [2, 32], strides = [1, 1]} : vector<2x128xf32> to vector<2x32xf32>
    %254 = vector.extract_strided_slice %251 {offsets = [0, 64], sizes = [2, 32], strides = [1, 1]} : vector<2x128xf32> to vector<2x32xf32>
    %255 = vector.extract_strided_slice %250 {offsets = [0, 96], sizes = [2, 32], strides = [1, 1]} : vector<2x128xf32> to vector<2x32xf32>
    %256 = arith.mulf %253, %222 : vector<2x32xf32>
    %257 = arith.mulf %252, %254 : vector<2x32xf32>
    %258 = arith.addf %256, %257 : vector<2x32xf32>
    %259 = math.tanh %258 : vector<2x32xf32>
    %260 = arith.mulf %255, %259 : vector<2x32xf32>
    %261 = vector.extract_strided_slice %5 {offsets = [14, 0], sizes = [2, 128], strides = [1, 1]} : vector<16x256xf32> to vector<2x128xf32>
    %cst_38 = arith.constant dense<0.000000e+00> : vector<2x128xf32>
    %262 = tpu.matmul %242, %6, %cst_38 {dimension_numbers = #tpu.dot_dimension_numbers<[1], [0], [0], [1], [0, 0, 1, 1], [], []>} : vector<2x32xf32>, vector<32x128xf32>, vector<2x128xf32> -> vector<2x128xf32>
    %263 = arith.addf %261, %262 : vector<2x128xf32>
    %264 = arith.negf %263 : vector<2x128xf32>
    %265 = math.exp %264 : vector<2x128xf32>
    %cst_39 = arith.constant 1.000000e+00 : f32
    %266 = vector.broadcast %cst_39 : f32 to vector<2x128xf32>
    %267 = arith.addf %266, %265 : vector<2x128xf32>
    %268 = arith.divf %266, %267 : vector<2x128xf32>
    %269 = math.tanh %263 : vector<2x128xf32>
    %270 = vector.extract_strided_slice %268 {offsets = [0, 0], sizes = [2, 32], strides = [1, 1]} : vector<2x128xf32> to vector<2x32xf32>
    %271 = vector.extract_strided_slice %268 {offsets = [0, 32], sizes = [2, 32], strides = [1, 1]} : vector<2x128xf32> to vector<2x32xf32>
    %272 = vector.extract_strided_slice %269 {offsets = [0, 64], sizes = [2, 32], strides = [1, 1]} : vector<2x128xf32> to vector<2x32xf32>
    %273 = vector.extract_strided_slice %268 {offsets = [0, 96], sizes = [2, 32], strides = [1, 1]} : vector<2x128xf32> to vector<2x32xf32>
    %274 = arith.mulf %271, %240 : vector<2x32xf32>
    %275 = arith.mulf %270, %272 : vector<2x32xf32>
    %276 = arith.addf %274, %275 : vector<2x32xf32>
    %277 = math.tanh %276 : vector<2x32xf32>
    %278 = arith.mulf %273, %277 : vector<2x32xf32>
    %279 = vector.extract_strided_slice %5 {offsets = [0, 128], sizes = [2, 128], strides = [1, 1]} : vector<16x256xf32> to vector<2x128xf32>
    %cst_40 = arith.constant dense<0.000000e+00> : vector<2x128xf32>
    %280 = tpu.matmul %260, %7, %cst_40 {dimension_numbers = #tpu.dot_dimension_numbers<[1], [0], [0], [1], [0, 0, 1, 1], [], []>} : vector<2x32xf32>, vector<32x128xf32>, vector<2x128xf32> -> vector<2x128xf32>
    %281 = arith.addf %279, %280 : vector<2x128xf32>
    %282 = arith.negf %281 : vector<2x128xf32>
    %283 = math.exp %282 : vector<2x128xf32>
    %cst_41 = arith.constant 1.000000e+00 : f32
    %284 = vector.broadcast %cst_41 : f32 to vector<2x128xf32>
    %285 = arith.addf %284, %283 : vector<2x128xf32>
    %286 = arith.divf %284, %285 : vector<2x128xf32>
    %287 = math.tanh %281 : vector<2x128xf32>
    %288 = vector.extract_strided_slice %286 {offsets = [0, 0], sizes = [2, 32], strides = [1, 1]} : vector<2x128xf32> to vector<2x32xf32>
    %289 = vector.extract_strided_slice %286 {offsets = [0, 32], sizes = [2, 32], strides = [1, 1]} : vector<2x128xf32> to vector<2x32xf32>
    %290 = vector.extract_strided_slice %287 {offsets = [0, 64], sizes = [2, 32], strides = [1, 1]} : vector<2x128xf32> to vector<2x32xf32>
    %291 = vector.extract_strided_slice %286 {offsets = [0, 96], sizes = [2, 32], strides = [1, 1]} : vector<2x128xf32> to vector<2x32xf32>
    %292 = arith.mulf %289, %258 : vector<2x32xf32>
    %293 = arith.mulf %288, %290 : vector<2x32xf32>
    %294 = arith.addf %292, %293 : vector<2x32xf32>
    %295 = math.tanh %294 : vector<2x32xf32>
    %296 = arith.mulf %291, %295 : vector<2x32xf32>
    %297 = tpu.concatenate %26, %296 in 1 : vector<2x32xf32>, vector<2x32xf32> -> vector<2x64xf32>
    %298 = tpu.concatenate %62, %260 in 1 : vector<2x32xf32>, vector<2x32xf32> -> vector<2x64xf32>
    %299 = tpu.concatenate %98, %224 in 1 : vector<2x32xf32>, vector<2x32xf32> -> vector<2x64xf32>
    %300 = tpu.concatenate %134, %188 in 1 : vector<2x32xf32>, vector<2x32xf32> -> vector<2x64xf32>
    %301 = tpu.concatenate %170, %152 in 1 : vector<2x32xf32>, vector<2x32xf32> -> vector<2x64xf32>
    %302 = tpu.concatenate %206, %116 in 1 : vector<2x32xf32>, vector<2x32xf32> -> vector<2x64xf32>
    %303 = tpu.concatenate %242, %80 in 1 : vector<2x32xf32>, vector<2x32xf32> -> vector<2x64xf32>
    %304 = tpu.concatenate %278, %44 in 1 : vector<2x32xf32>, vector<2x32xf32> -> vector<2x64xf32>
    %305 = tpu.concatenate %297, %298, %299, %300, %301, %302, %303, %304 in 0 : vector<2x64xf32>, vector<2x64xf32>, vector<2x64xf32>, vector<2x64xf32>, vector<2x64xf32>, vector<2x64xf32>, vector<2x64xf32>, vector<2x64xf32> -> vector<16x64xf32>
    %c0_42 = arith.constant 0 : index
    %c0_43 = arith.constant 0 : index
    %306 = vector.load %arg5[%c0_42, %c0_43] : memref<64x256xf32, #tpu.memory_space<vmem>>, vector<64x256xf32>
    %cst_44 = arith.constant dense<0.000000e+00> : vector<16x256xf32>
    %307 = tpu.matmul %305, %306, %cst_44 {dimension_numbers = #tpu.dot_dimension_numbers<[1], [0], [0], [1], [0, 0, 1, 1], [], []>} : vector<16x64xf32>, vector<64x256xf32>, vector<16x256xf32> -> vector<16x256xf32>
    %c0_45 = arith.constant 0 : index
    %c0_46 = arith.constant 0 : index
    %308 = vector.load %arg8[%c0_45, %c0_46] : memref<1x256xf32, #tpu.memory_space<vmem>>, vector<1x256xf32>
    %309 = vector.broadcast %308 : vector<1x256xf32> to vector<16x256xf32>
    %310 = arith.addf %307, %309 : vector<16x256xf32>
    %c0_47 = arith.constant 0 : index
    %c0_48 = arith.constant 0 : index
    %311 = vector.load %arg6[%c0_47, %c0_48] : memref<32x128xf32, #tpu.memory_space<vmem>>, vector<32x128xf32>
    %c0_49 = arith.constant 0 : index
    %c0_50 = arith.constant 0 : index
    %312 = vector.load %arg7[%c0_49, %c0_50] : memref<32x128xf32, #tpu.memory_space<vmem>>, vector<32x128xf32>
    %cst_51 = arith.constant 0.000000e+00 : f32
    %313 = vector.broadcast %cst_51 : f32 to vector<2x32xf32>
    %314 = vector.extract_strided_slice %310 {offsets = [0, 0], sizes = [2, 128], strides = [1, 1]} : vector<16x256xf32> to vector<2x128xf32>
    %cst_52 = arith.constant dense<0.000000e+00> : vector<2x128xf32>
    %315 = tpu.matmul %313, %311, %cst_52 {dimension_numbers = #tpu.dot_dimension_numbers<[1], [0], [0], [1], [0, 0, 1, 1], [], []>} : vector<2x32xf32>, vector<32x128xf32>, vector<2x128xf32> -> vector<2x128xf32>
    %316 = arith.addf %314, %315 : vector<2x128xf32>
    %317 = arith.negf %316 : vector<2x128xf32>
    %318 = math.exp %317 : vector<2x128xf32>
    %cst_53 = arith.constant 1.000000e+00 : f32
    %319 = vector.broadcast %cst_53 : f32 to vector<2x128xf32>
    %320 = arith.addf %319, %318 : vector<2x128xf32>
    %321 = arith.divf %319, %320 : vector<2x128xf32>
    %322 = math.tanh %316 : vector<2x128xf32>
    %323 = vector.extract_strided_slice %321 {offsets = [0, 0], sizes = [2, 32], strides = [1, 1]} : vector<2x128xf32> to vector<2x32xf32>
    %324 = vector.extract_strided_slice %321 {offsets = [0, 32], sizes = [2, 32], strides = [1, 1]} : vector<2x128xf32> to vector<2x32xf32>
    %325 = vector.extract_strided_slice %322 {offsets = [0, 64], sizes = [2, 32], strides = [1, 1]} : vector<2x128xf32> to vector<2x32xf32>
    %326 = vector.extract_strided_slice %321 {offsets = [0, 96], sizes = [2, 32], strides = [1, 1]} : vector<2x128xf32> to vector<2x32xf32>
    %327 = arith.mulf %324, %313 : vector<2x32xf32>
    %328 = arith.mulf %323, %325 : vector<2x32xf32>
    %329 = arith.addf %327, %328 : vector<2x32xf32>
    %330 = math.tanh %329 : vector<2x32xf32>
    %331 = arith.mulf %326, %330 : vector<2x32xf32>
    %332 = vector.extract_strided_slice %310 {offsets = [14, 128], sizes = [2, 128], strides = [1, 1]} : vector<16x256xf32> to vector<2x128xf32>
    %cst_54 = arith.constant dense<0.000000e+00> : vector<2x128xf32>
    %333 = tpu.matmul %313, %312, %cst_54 {dimension_numbers = #tpu.dot_dimension_numbers<[1], [0], [0], [1], [0, 0, 1, 1], [], []>} : vector<2x32xf32>, vector<32x128xf32>, vector<2x128xf32> -> vector<2x128xf32>
    %334 = arith.addf %332, %333 : vector<2x128xf32>
    %335 = arith.negf %334 : vector<2x128xf32>
    %336 = math.exp %335 : vector<2x128xf32>
    %cst_55 = arith.constant 1.000000e+00 : f32
    %337 = vector.broadcast %cst_55 : f32 to vector<2x128xf32>
    %338 = arith.addf %337, %336 : vector<2x128xf32>
    %339 = arith.divf %337, %338 : vector<2x128xf32>
    %340 = math.tanh %334 : vector<2x128xf32>
    %341 = vector.extract_strided_slice %339 {offsets = [0, 0], sizes = [2, 32], strides = [1, 1]} : vector<2x128xf32> to vector<2x32xf32>
    %342 = vector.extract_strided_slice %339 {offsets = [0, 32], sizes = [2, 32], strides = [1, 1]} : vector<2x128xf32> to vector<2x32xf32>
    %343 = vector.extract_strided_slice %340 {offsets = [0, 64], sizes = [2, 32], strides = [1, 1]} : vector<2x128xf32> to vector<2x32xf32>
    %344 = vector.extract_strided_slice %339 {offsets = [0, 96], sizes = [2, 32], strides = [1, 1]} : vector<2x128xf32> to vector<2x32xf32>
    %345 = arith.mulf %342, %313 : vector<2x32xf32>
    %346 = arith.mulf %341, %343 : vector<2x32xf32>
    %347 = arith.addf %345, %346 : vector<2x32xf32>
    %348 = math.tanh %347 : vector<2x32xf32>
    %349 = arith.mulf %344, %348 : vector<2x32xf32>
    %350 = vector.extract_strided_slice %310 {offsets = [2, 0], sizes = [2, 128], strides = [1, 1]} : vector<16x256xf32> to vector<2x128xf32>
    %cst_56 = arith.constant dense<0.000000e+00> : vector<2x128xf32>
    %351 = tpu.matmul %331, %311, %cst_56 {dimension_numbers = #tpu.dot_dimension_numbers<[1], [0], [0], [1], [0, 0, 1, 1], [], []>} : vector<2x32xf32>, vector<32x128xf32>, vector<2x128xf32> -> vector<2x128xf32>
    %352 = arith.addf %350, %351 : vector<2x128xf32>
    %353 = arith.negf %352 : vector<2x128xf32>
    %354 = math.exp %353 : vector<2x128xf32>
    %cst_57 = arith.constant 1.000000e+00 : f32
    %355 = vector.broadcast %cst_57 : f32 to vector<2x128xf32>
    %356 = arith.addf %355, %354 : vector<2x128xf32>
    %357 = arith.divf %355, %356 : vector<2x128xf32>
    %358 = math.tanh %352 : vector<2x128xf32>
    %359 = vector.extract_strided_slice %357 {offsets = [0, 0], sizes = [2, 32], strides = [1, 1]} : vector<2x128xf32> to vector<2x32xf32>
    %360 = vector.extract_strided_slice %357 {offsets = [0, 32], sizes = [2, 32], strides = [1, 1]} : vector<2x128xf32> to vector<2x32xf32>
    %361 = vector.extract_strided_slice %358 {offsets = [0, 64], sizes = [2, 32], strides = [1, 1]} : vector<2x128xf32> to vector<2x32xf32>
    %362 = vector.extract_strided_slice %357 {offsets = [0, 96], sizes = [2, 32], strides = [1, 1]} : vector<2x128xf32> to vector<2x32xf32>
    %363 = arith.mulf %360, %329 : vector<2x32xf32>
    %364 = arith.mulf %359, %361 : vector<2x32xf32>
    %365 = arith.addf %363, %364 : vector<2x32xf32>
    %366 = math.tanh %365 : vector<2x32xf32>
    %367 = arith.mulf %362, %366 : vector<2x32xf32>
    %368 = vector.extract_strided_slice %310 {offsets = [12, 128], sizes = [2, 128], strides = [1, 1]} : vector<16x256xf32> to vector<2x128xf32>
    %cst_58 = arith.constant dense<0.000000e+00> : vector<2x128xf32>
    %369 = tpu.matmul %349, %312, %cst_58 {dimension_numbers = #tpu.dot_dimension_numbers<[1], [0], [0], [1], [0, 0, 1, 1], [], []>} : vector<2x32xf32>, vector<32x128xf32>, vector<2x128xf32> -> vector<2x128xf32>
    %370 = arith.addf %368, %369 : vector<2x128xf32>
    %371 = arith.negf %370 : vector<2x128xf32>
    %372 = math.exp %371 : vector<2x128xf32>
    %cst_59 = arith.constant 1.000000e+00 : f32
    %373 = vector.broadcast %cst_59 : f32 to vector<2x128xf32>
    %374 = arith.addf %373, %372 : vector<2x128xf32>
    %375 = arith.divf %373, %374 : vector<2x128xf32>
    %376 = math.tanh %370 : vector<2x128xf32>
    %377 = vector.extract_strided_slice %375 {offsets = [0, 0], sizes = [2, 32], strides = [1, 1]} : vector<2x128xf32> to vector<2x32xf32>
    %378 = vector.extract_strided_slice %375 {offsets = [0, 32], sizes = [2, 32], strides = [1, 1]} : vector<2x128xf32> to vector<2x32xf32>
    %379 = vector.extract_strided_slice %376 {offsets = [0, 64], sizes = [2, 32], strides = [1, 1]} : vector<2x128xf32> to vector<2x32xf32>
    %380 = vector.extract_strided_slice %375 {offsets = [0, 96], sizes = [2, 32], strides = [1, 1]} : vector<2x128xf32> to vector<2x32xf32>
    %381 = arith.mulf %378, %347 : vector<2x32xf32>
    %382 = arith.mulf %377, %379 : vector<2x32xf32>
    %383 = arith.addf %381, %382 : vector<2x32xf32>
    %384 = math.tanh %383 : vector<2x32xf32>
    %385 = arith.mulf %380, %384 : vector<2x32xf32>
    %386 = vector.extract_strided_slice %310 {offsets = [4, 0], sizes = [2, 128], strides = [1, 1]} : vector<16x256xf32> to vector<2x128xf32>
    %cst_60 = arith.constant dense<0.000000e+00> : vector<2x128xf32>
    %387 = tpu.matmul %367, %311, %cst_60 {dimension_numbers = #tpu.dot_dimension_numbers<[1], [0], [0], [1], [0, 0, 1, 1], [], []>} : vector<2x32xf32>, vector<32x128xf32>, vector<2x128xf32> -> vector<2x128xf32>
    %388 = arith.addf %386, %387 : vector<2x128xf32>
    %389 = arith.negf %388 : vector<2x128xf32>
    %390 = math.exp %389 : vector<2x128xf32>
    %cst_61 = arith.constant 1.000000e+00 : f32
    %391 = vector.broadcast %cst_61 : f32 to vector<2x128xf32>
    %392 = arith.addf %391, %390 : vector<2x128xf32>
    %393 = arith.divf %391, %392 : vector<2x128xf32>
    %394 = math.tanh %388 : vector<2x128xf32>
    %395 = vector.extract_strided_slice %393 {offsets = [0, 0], sizes = [2, 32], strides = [1, 1]} : vector<2x128xf32> to vector<2x32xf32>
    %396 = vector.extract_strided_slice %393 {offsets = [0, 32], sizes = [2, 32], strides = [1, 1]} : vector<2x128xf32> to vector<2x32xf32>
    %397 = vector.extract_strided_slice %394 {offsets = [0, 64], sizes = [2, 32], strides = [1, 1]} : vector<2x128xf32> to vector<2x32xf32>
    %398 = vector.extract_strided_slice %393 {offsets = [0, 96], sizes = [2, 32], strides = [1, 1]} : vector<2x128xf32> to vector<2x32xf32>
    %399 = arith.mulf %396, %365 : vector<2x32xf32>
    %400 = arith.mulf %395, %397 : vector<2x32xf32>
    %401 = arith.addf %399, %400 : vector<2x32xf32>
    %402 = math.tanh %401 : vector<2x32xf32>
    %403 = arith.mulf %398, %402 : vector<2x32xf32>
    %404 = vector.extract_strided_slice %310 {offsets = [10, 128], sizes = [2, 128], strides = [1, 1]} : vector<16x256xf32> to vector<2x128xf32>
    %cst_62 = arith.constant dense<0.000000e+00> : vector<2x128xf32>
    %405 = tpu.matmul %385, %312, %cst_62 {dimension_numbers = #tpu.dot_dimension_numbers<[1], [0], [0], [1], [0, 0, 1, 1], [], []>} : vector<2x32xf32>, vector<32x128xf32>, vector<2x128xf32> -> vector<2x128xf32>
    %406 = arith.addf %404, %405 : vector<2x128xf32>
    %407 = arith.negf %406 : vector<2x128xf32>
    %408 = math.exp %407 : vector<2x128xf32>
    %cst_63 = arith.constant 1.000000e+00 : f32
    %409 = vector.broadcast %cst_63 : f32 to vector<2x128xf32>
    %410 = arith.addf %409, %408 : vector<2x128xf32>
    %411 = arith.divf %409, %410 : vector<2x128xf32>
    %412 = math.tanh %406 : vector<2x128xf32>
    %413 = vector.extract_strided_slice %411 {offsets = [0, 0], sizes = [2, 32], strides = [1, 1]} : vector<2x128xf32> to vector<2x32xf32>
    %414 = vector.extract_strided_slice %411 {offsets = [0, 32], sizes = [2, 32], strides = [1, 1]} : vector<2x128xf32> to vector<2x32xf32>
    %415 = vector.extract_strided_slice %412 {offsets = [0, 64], sizes = [2, 32], strides = [1, 1]} : vector<2x128xf32> to vector<2x32xf32>
    %416 = vector.extract_strided_slice %411 {offsets = [0, 96], sizes = [2, 32], strides = [1, 1]} : vector<2x128xf32> to vector<2x32xf32>
    %417 = arith.mulf %414, %383 : vector<2x32xf32>
    %418 = arith.mulf %413, %415 : vector<2x32xf32>
    %419 = arith.addf %417, %418 : vector<2x32xf32>
    %420 = math.tanh %419 : vector<2x32xf32>
    %421 = arith.mulf %416, %420 : vector<2x32xf32>
    %422 = vector.extract_strided_slice %310 {offsets = [6, 0], sizes = [2, 128], strides = [1, 1]} : vector<16x256xf32> to vector<2x128xf32>
    %cst_64 = arith.constant dense<0.000000e+00> : vector<2x128xf32>
    %423 = tpu.matmul %403, %311, %cst_64 {dimension_numbers = #tpu.dot_dimension_numbers<[1], [0], [0], [1], [0, 0, 1, 1], [], []>} : vector<2x32xf32>, vector<32x128xf32>, vector<2x128xf32> -> vector<2x128xf32>
    %424 = arith.addf %422, %423 : vector<2x128xf32>
    %425 = arith.negf %424 : vector<2x128xf32>
    %426 = math.exp %425 : vector<2x128xf32>
    %cst_65 = arith.constant 1.000000e+00 : f32
    %427 = vector.broadcast %cst_65 : f32 to vector<2x128xf32>
    %428 = arith.addf %427, %426 : vector<2x128xf32>
    %429 = arith.divf %427, %428 : vector<2x128xf32>
    %430 = math.tanh %424 : vector<2x128xf32>
    %431 = vector.extract_strided_slice %429 {offsets = [0, 0], sizes = [2, 32], strides = [1, 1]} : vector<2x128xf32> to vector<2x32xf32>
    %432 = vector.extract_strided_slice %429 {offsets = [0, 32], sizes = [2, 32], strides = [1, 1]} : vector<2x128xf32> to vector<2x32xf32>
    %433 = vector.extract_strided_slice %430 {offsets = [0, 64], sizes = [2, 32], strides = [1, 1]} : vector<2x128xf32> to vector<2x32xf32>
    %434 = vector.extract_strided_slice %429 {offsets = [0, 96], sizes = [2, 32], strides = [1, 1]} : vector<2x128xf32> to vector<2x32xf32>
    %435 = arith.mulf %432, %401 : vector<2x32xf32>
    %436 = arith.mulf %431, %433 : vector<2x32xf32>
    %437 = arith.addf %435, %436 : vector<2x32xf32>
    %438 = math.tanh %437 : vector<2x32xf32>
    %439 = arith.mulf %434, %438 : vector<2x32xf32>
    %440 = vector.extract_strided_slice %310 {offsets = [8, 128], sizes = [2, 128], strides = [1, 1]} : vector<16x256xf32> to vector<2x128xf32>
    %cst_66 = arith.constant dense<0.000000e+00> : vector<2x128xf32>
    %441 = tpu.matmul %421, %312, %cst_66 {dimension_numbers = #tpu.dot_dimension_numbers<[1], [0], [0], [1], [0, 0, 1, 1], [], []>} : vector<2x32xf32>, vector<32x128xf32>, vector<2x128xf32> -> vector<2x128xf32>
    %442 = arith.addf %440, %441 : vector<2x128xf32>
    %443 = arith.negf %442 : vector<2x128xf32>
    %444 = math.exp %443 : vector<2x128xf32>
    %cst_67 = arith.constant 1.000000e+00 : f32
    %445 = vector.broadcast %cst_67 : f32 to vector<2x128xf32>
    %446 = arith.addf %445, %444 : vector<2x128xf32>
    %447 = arith.divf %445, %446 : vector<2x128xf32>
    %448 = math.tanh %442 : vector<2x128xf32>
    %449 = vector.extract_strided_slice %447 {offsets = [0, 0], sizes = [2, 32], strides = [1, 1]} : vector<2x128xf32> to vector<2x32xf32>
    %450 = vector.extract_strided_slice %447 {offsets = [0, 32], sizes = [2, 32], strides = [1, 1]} : vector<2x128xf32> to vector<2x32xf32>
    %451 = vector.extract_strided_slice %448 {offsets = [0, 64], sizes = [2, 32], strides = [1, 1]} : vector<2x128xf32> to vector<2x32xf32>
    %452 = vector.extract_strided_slice %447 {offsets = [0, 96], sizes = [2, 32], strides = [1, 1]} : vector<2x128xf32> to vector<2x32xf32>
    %453 = arith.mulf %450, %419 : vector<2x32xf32>
    %454 = arith.mulf %449, %451 : vector<2x32xf32>
    %455 = arith.addf %453, %454 : vector<2x32xf32>
    %456 = math.tanh %455 : vector<2x32xf32>
    %457 = arith.mulf %452, %456 : vector<2x32xf32>
    %458 = vector.extract_strided_slice %310 {offsets = [8, 0], sizes = [2, 128], strides = [1, 1]} : vector<16x256xf32> to vector<2x128xf32>
    %cst_68 = arith.constant dense<0.000000e+00> : vector<2x128xf32>
    %459 = tpu.matmul %439, %311, %cst_68 {dimension_numbers = #tpu.dot_dimension_numbers<[1], [0], [0], [1], [0, 0, 1, 1], [], []>} : vector<2x32xf32>, vector<32x128xf32>, vector<2x128xf32> -> vector<2x128xf32>
    %460 = arith.addf %458, %459 : vector<2x128xf32>
    %461 = arith.negf %460 : vector<2x128xf32>
    %462 = math.exp %461 : vector<2x128xf32>
    %cst_69 = arith.constant 1.000000e+00 : f32
    %463 = vector.broadcast %cst_69 : f32 to vector<2x128xf32>
    %464 = arith.addf %463, %462 : vector<2x128xf32>
    %465 = arith.divf %463, %464 : vector<2x128xf32>
    %466 = math.tanh %460 : vector<2x128xf32>
    %467 = vector.extract_strided_slice %465 {offsets = [0, 0], sizes = [2, 32], strides = [1, 1]} : vector<2x128xf32> to vector<2x32xf32>
    %468 = vector.extract_strided_slice %465 {offsets = [0, 32], sizes = [2, 32], strides = [1, 1]} : vector<2x128xf32> to vector<2x32xf32>
    %469 = vector.extract_strided_slice %466 {offsets = [0, 64], sizes = [2, 32], strides = [1, 1]} : vector<2x128xf32> to vector<2x32xf32>
    %470 = vector.extract_strided_slice %465 {offsets = [0, 96], sizes = [2, 32], strides = [1, 1]} : vector<2x128xf32> to vector<2x32xf32>
    %471 = arith.mulf %468, %437 : vector<2x32xf32>
    %472 = arith.mulf %467, %469 : vector<2x32xf32>
    %473 = arith.addf %471, %472 : vector<2x32xf32>
    %474 = math.tanh %473 : vector<2x32xf32>
    %475 = arith.mulf %470, %474 : vector<2x32xf32>
    %476 = vector.extract_strided_slice %310 {offsets = [6, 128], sizes = [2, 128], strides = [1, 1]} : vector<16x256xf32> to vector<2x128xf32>
    %cst_70 = arith.constant dense<0.000000e+00> : vector<2x128xf32>
    %477 = tpu.matmul %457, %312, %cst_70 {dimension_numbers = #tpu.dot_dimension_numbers<[1], [0], [0], [1], [0, 0, 1, 1], [], []>} : vector<2x32xf32>, vector<32x128xf32>, vector<2x128xf32> -> vector<2x128xf32>
    %478 = arith.addf %476, %477 : vector<2x128xf32>
    %479 = arith.negf %478 : vector<2x128xf32>
    %480 = math.exp %479 : vector<2x128xf32>
    %cst_71 = arith.constant 1.000000e+00 : f32
    %481 = vector.broadcast %cst_71 : f32 to vector<2x128xf32>
    %482 = arith.addf %481, %480 : vector<2x128xf32>
    %483 = arith.divf %481, %482 : vector<2x128xf32>
    %484 = math.tanh %478 : vector<2x128xf32>
    %485 = vector.extract_strided_slice %483 {offsets = [0, 0], sizes = [2, 32], strides = [1, 1]} : vector<2x128xf32> to vector<2x32xf32>
    %486 = vector.extract_strided_slice %483 {offsets = [0, 32], sizes = [2, 32], strides = [1, 1]} : vector<2x128xf32> to vector<2x32xf32>
    %487 = vector.extract_strided_slice %484 {offsets = [0, 64], sizes = [2, 32], strides = [1, 1]} : vector<2x128xf32> to vector<2x32xf32>
    %488 = vector.extract_strided_slice %483 {offsets = [0, 96], sizes = [2, 32], strides = [1, 1]} : vector<2x128xf32> to vector<2x32xf32>
    %489 = arith.mulf %486, %455 : vector<2x32xf32>
    %490 = arith.mulf %485, %487 : vector<2x32xf32>
    %491 = arith.addf %489, %490 : vector<2x32xf32>
    %492 = math.tanh %491 : vector<2x32xf32>
    %493 = arith.mulf %488, %492 : vector<2x32xf32>
    %494 = vector.extract_strided_slice %310 {offsets = [10, 0], sizes = [2, 128], strides = [1, 1]} : vector<16x256xf32> to vector<2x128xf32>
    %cst_72 = arith.constant dense<0.000000e+00> : vector<2x128xf32>
    %495 = tpu.matmul %475, %311, %cst_72 {dimension_numbers = #tpu.dot_dimension_numbers<[1], [0], [0], [1], [0, 0, 1, 1], [], []>} : vector<2x32xf32>, vector<32x128xf32>, vector<2x128xf32> -> vector<2x128xf32>
    %496 = arith.addf %494, %495 : vector<2x128xf32>
    %497 = arith.negf %496 : vector<2x128xf32>
    %498 = math.exp %497 : vector<2x128xf32>
    %cst_73 = arith.constant 1.000000e+00 : f32
    %499 = vector.broadcast %cst_73 : f32 to vector<2x128xf32>
    %500 = arith.addf %499, %498 : vector<2x128xf32>
    %501 = arith.divf %499, %500 : vector<2x128xf32>
    %502 = math.tanh %496 : vector<2x128xf32>
    %503 = vector.extract_strided_slice %501 {offsets = [0, 0], sizes = [2, 32], strides = [1, 1]} : vector<2x128xf32> to vector<2x32xf32>
    %504 = vector.extract_strided_slice %501 {offsets = [0, 32], sizes = [2, 32], strides = [1, 1]} : vector<2x128xf32> to vector<2x32xf32>
    %505 = vector.extract_strided_slice %502 {offsets = [0, 64], sizes = [2, 32], strides = [1, 1]} : vector<2x128xf32> to vector<2x32xf32>
    %506 = vector.extract_strided_slice %501 {offsets = [0, 96], sizes = [2, 32], strides = [1, 1]} : vector<2x128xf32> to vector<2x32xf32>
    %507 = arith.mulf %504, %473 : vector<2x32xf32>
    %508 = arith.mulf %503, %505 : vector<2x32xf32>
    %509 = arith.addf %507, %508 : vector<2x32xf32>
    %510 = math.tanh %509 : vector<2x32xf32>
    %511 = arith.mulf %506, %510 : vector<2x32xf32>
    %512 = vector.extract_strided_slice %310 {offsets = [4, 128], sizes = [2, 128], strides = [1, 1]} : vector<16x256xf32> to vector<2x128xf32>
    %cst_74 = arith.constant dense<0.000000e+00> : vector<2x128xf32>
    %513 = tpu.matmul %493, %312, %cst_74 {dimension_numbers = #tpu.dot_dimension_numbers<[1], [0], [0], [1], [0, 0, 1, 1], [], []>} : vector<2x32xf32>, vector<32x128xf32>, vector<2x128xf32> -> vector<2x128xf32>
    %514 = arith.addf %512, %513 : vector<2x128xf32>
    %515 = arith.negf %514 : vector<2x128xf32>
    %516 = math.exp %515 : vector<2x128xf32>
    %cst_75 = arith.constant 1.000000e+00 : f32
    %517 = vector.broadcast %cst_75 : f32 to vector<2x128xf32>
    %518 = arith.addf %517, %516 : vector<2x128xf32>
    %519 = arith.divf %517, %518 : vector<2x128xf32>
    %520 = math.tanh %514 : vector<2x128xf32>
    %521 = vector.extract_strided_slice %519 {offsets = [0, 0], sizes = [2, 32], strides = [1, 1]} : vector<2x128xf32> to vector<2x32xf32>
    %522 = vector.extract_strided_slice %519 {offsets = [0, 32], sizes = [2, 32], strides = [1, 1]} : vector<2x128xf32> to vector<2x32xf32>
    %523 = vector.extract_strided_slice %520 {offsets = [0, 64], sizes = [2, 32], strides = [1, 1]} : vector<2x128xf32> to vector<2x32xf32>
    %524 = vector.extract_strided_slice %519 {offsets = [0, 96], sizes = [2, 32], strides = [1, 1]} : vector<2x128xf32> to vector<2x32xf32>
    %525 = arith.mulf %522, %491 : vector<2x32xf32>
    %526 = arith.mulf %521, %523 : vector<2x32xf32>
    %527 = arith.addf %525, %526 : vector<2x32xf32>
    %528 = math.tanh %527 : vector<2x32xf32>
    %529 = arith.mulf %524, %528 : vector<2x32xf32>
    %530 = vector.extract_strided_slice %310 {offsets = [12, 0], sizes = [2, 128], strides = [1, 1]} : vector<16x256xf32> to vector<2x128xf32>
    %cst_76 = arith.constant dense<0.000000e+00> : vector<2x128xf32>
    %531 = tpu.matmul %511, %311, %cst_76 {dimension_numbers = #tpu.dot_dimension_numbers<[1], [0], [0], [1], [0, 0, 1, 1], [], []>} : vector<2x32xf32>, vector<32x128xf32>, vector<2x128xf32> -> vector<2x128xf32>
    %532 = arith.addf %530, %531 : vector<2x128xf32>
    %533 = arith.negf %532 : vector<2x128xf32>
    %534 = math.exp %533 : vector<2x128xf32>
    %cst_77 = arith.constant 1.000000e+00 : f32
    %535 = vector.broadcast %cst_77 : f32 to vector<2x128xf32>
    %536 = arith.addf %535, %534 : vector<2x128xf32>
    %537 = arith.divf %535, %536 : vector<2x128xf32>
    %538 = math.tanh %532 : vector<2x128xf32>
    %539 = vector.extract_strided_slice %537 {offsets = [0, 0], sizes = [2, 32], strides = [1, 1]} : vector<2x128xf32> to vector<2x32xf32>
    %540 = vector.extract_strided_slice %537 {offsets = [0, 32], sizes = [2, 32], strides = [1, 1]} : vector<2x128xf32> to vector<2x32xf32>
    %541 = vector.extract_strided_slice %538 {offsets = [0, 64], sizes = [2, 32], strides = [1, 1]} : vector<2x128xf32> to vector<2x32xf32>
    %542 = vector.extract_strided_slice %537 {offsets = [0, 96], sizes = [2, 32], strides = [1, 1]} : vector<2x128xf32> to vector<2x32xf32>
    %543 = arith.mulf %540, %509 : vector<2x32xf32>
    %544 = arith.mulf %539, %541 : vector<2x32xf32>
    %545 = arith.addf %543, %544 : vector<2x32xf32>
    %546 = math.tanh %545 : vector<2x32xf32>
    %547 = arith.mulf %542, %546 : vector<2x32xf32>
    %548 = vector.extract_strided_slice %310 {offsets = [2, 128], sizes = [2, 128], strides = [1, 1]} : vector<16x256xf32> to vector<2x128xf32>
    %cst_78 = arith.constant dense<0.000000e+00> : vector<2x128xf32>
    %549 = tpu.matmul %529, %312, %cst_78 {dimension_numbers = #tpu.dot_dimension_numbers<[1], [0], [0], [1], [0, 0, 1, 1], [], []>} : vector<2x32xf32>, vector<32x128xf32>, vector<2x128xf32> -> vector<2x128xf32>
    %550 = arith.addf %548, %549 : vector<2x128xf32>
    %551 = arith.negf %550 : vector<2x128xf32>
    %552 = math.exp %551 : vector<2x128xf32>
    %cst_79 = arith.constant 1.000000e+00 : f32
    %553 = vector.broadcast %cst_79 : f32 to vector<2x128xf32>
    %554 = arith.addf %553, %552 : vector<2x128xf32>
    %555 = arith.divf %553, %554 : vector<2x128xf32>
    %556 = math.tanh %550 : vector<2x128xf32>
    %557 = vector.extract_strided_slice %555 {offsets = [0, 0], sizes = [2, 32], strides = [1, 1]} : vector<2x128xf32> to vector<2x32xf32>
    %558 = vector.extract_strided_slice %555 {offsets = [0, 32], sizes = [2, 32], strides = [1, 1]} : vector<2x128xf32> to vector<2x32xf32>
    %559 = vector.extract_strided_slice %556 {offsets = [0, 64], sizes = [2, 32], strides = [1, 1]} : vector<2x128xf32> to vector<2x32xf32>
    %560 = vector.extract_strided_slice %555 {offsets = [0, 96], sizes = [2, 32], strides = [1, 1]} : vector<2x128xf32> to vector<2x32xf32>
    %561 = arith.mulf %558, %527 : vector<2x32xf32>
    %562 = arith.mulf %557, %559 : vector<2x32xf32>
    %563 = arith.addf %561, %562 : vector<2x32xf32>
    %564 = math.tanh %563 : vector<2x32xf32>
    %565 = arith.mulf %560, %564 : vector<2x32xf32>
    %566 = vector.extract_strided_slice %310 {offsets = [14, 0], sizes = [2, 128], strides = [1, 1]} : vector<16x256xf32> to vector<2x128xf32>
    %cst_80 = arith.constant dense<0.000000e+00> : vector<2x128xf32>
    %567 = tpu.matmul %547, %311, %cst_80 {dimension_numbers = #tpu.dot_dimension_numbers<[1], [0], [0], [1], [0, 0, 1, 1], [], []>} : vector<2x32xf32>, vector<32x128xf32>, vector<2x128xf32> -> vector<2x128xf32>
    %568 = arith.addf %566, %567 : vector<2x128xf32>
    %569 = arith.negf %568 : vector<2x128xf32>
    %570 = math.exp %569 : vector<2x128xf32>
    %cst_81 = arith.constant 1.000000e+00 : f32
    %571 = vector.broadcast %cst_81 : f32 to vector<2x128xf32>
    %572 = arith.addf %571, %570 : vector<2x128xf32>
    %573 = arith.divf %571, %572 : vector<2x128xf32>
    %574 = math.tanh %568 : vector<2x128xf32>
    %575 = vector.extract_strided_slice %573 {offsets = [0, 0], sizes = [2, 32], strides = [1, 1]} : vector<2x128xf32> to vector<2x32xf32>
    %576 = vector.extract_strided_slice %573 {offsets = [0, 32], sizes = [2, 32], strides = [1, 1]} : vector<2x128xf32> to vector<2x32xf32>
    %577 = vector.extract_strided_slice %574 {offsets = [0, 64], sizes = [2, 32], strides = [1, 1]} : vector<2x128xf32> to vector<2x32xf32>
    %578 = vector.extract_strided_slice %573 {offsets = [0, 96], sizes = [2, 32], strides = [1, 1]} : vector<2x128xf32> to vector<2x32xf32>
    %579 = arith.mulf %576, %545 : vector<2x32xf32>
    %580 = arith.mulf %575, %577 : vector<2x32xf32>
    %581 = arith.addf %579, %580 : vector<2x32xf32>
    %582 = math.tanh %581 : vector<2x32xf32>
    %583 = arith.mulf %578, %582 : vector<2x32xf32>
    %584 = vector.extract_strided_slice %310 {offsets = [0, 128], sizes = [2, 128], strides = [1, 1]} : vector<16x256xf32> to vector<2x128xf32>
    %cst_82 = arith.constant dense<0.000000e+00> : vector<2x128xf32>
    %585 = tpu.matmul %565, %312, %cst_82 {dimension_numbers = #tpu.dot_dimension_numbers<[1], [0], [0], [1], [0, 0, 1, 1], [], []>} : vector<2x32xf32>, vector<32x128xf32>, vector<2x128xf32> -> vector<2x128xf32>
    %586 = arith.addf %584, %585 : vector<2x128xf32>
    %587 = arith.negf %586 : vector<2x128xf32>
    %588 = math.exp %587 : vector<2x128xf32>
    %cst_83 = arith.constant 1.000000e+00 : f32
    %589 = vector.broadcast %cst_83 : f32 to vector<2x128xf32>
    %590 = arith.addf %589, %588 : vector<2x128xf32>
    %591 = arith.divf %589, %590 : vector<2x128xf32>
    %592 = math.tanh %586 : vector<2x128xf32>
    %593 = vector.extract_strided_slice %591 {offsets = [0, 0], sizes = [2, 32], strides = [1, 1]} : vector<2x128xf32> to vector<2x32xf32>
    %594 = vector.extract_strided_slice %591 {offsets = [0, 32], sizes = [2, 32], strides = [1, 1]} : vector<2x128xf32> to vector<2x32xf32>
    %595 = vector.extract_strided_slice %592 {offsets = [0, 64], sizes = [2, 32], strides = [1, 1]} : vector<2x128xf32> to vector<2x32xf32>
    %596 = vector.extract_strided_slice %591 {offsets = [0, 96], sizes = [2, 32], strides = [1, 1]} : vector<2x128xf32> to vector<2x32xf32>
    %597 = arith.mulf %594, %563 : vector<2x32xf32>
    %598 = arith.mulf %593, %595 : vector<2x32xf32>
    %599 = arith.addf %597, %598 : vector<2x32xf32>
    %600 = math.tanh %599 : vector<2x32xf32>
    %601 = arith.mulf %596, %600 : vector<2x32xf32>
    %602 = vector.extract_strided_slice %583 {offsets = [0, 0], sizes = [1, 32], strides = [1, 1]} : vector<2x32xf32> to vector<1x32xf32>
    %603 = vector.extract_strided_slice %583 {offsets = [1, 0], sizes = [1, 32], strides = [1, 1]} : vector<2x32xf32> to vector<1x32xf32>
    %604 = vector.extract_strided_slice %601 {offsets = [0, 0], sizes = [1, 32], strides = [1, 1]} : vector<2x32xf32> to vector<1x32xf32>
    %605 = vector.extract_strided_slice %601 {offsets = [1, 0], sizes = [1, 32], strides = [1, 1]} : vector<2x32xf32> to vector<1x32xf32>
    %606 = tpu.concatenate %602, %603 in 1 : vector<1x32xf32>, vector<1x32xf32> -> vector<1x64xf32>
    %607 = tpu.concatenate %604, %605 in 1 : vector<1x32xf32>, vector<1x32xf32> -> vector<1x64xf32>
    %608 = tpu.concatenate %606, %607 in 0 : vector<1x64xf32>, vector<1x64xf32> -> vector<2x64xf32>
    %cst_84 = arith.constant 0.000000e+00 : f32
    %609 = vector.broadcast %cst_84 : f32 to vector<2x64xf32>
    %610 = arith.maximumf %608, %609 : vector<2x64xf32>
    %c0_85 = arith.constant 0 : index
    %c0_86 = arith.constant 0 : index
    %611 = vector.load %arg9[%c0_85, %c0_86] : memref<64x128xf32, #tpu.memory_space<vmem>>, vector<64x128xf32>
    %cst_87 = arith.constant dense<0.000000e+00> : vector<2x128xf32>
    %612 = tpu.matmul %610, %611, %cst_87 {dimension_numbers = #tpu.dot_dimension_numbers<[1], [0], [0], [1], [0, 0, 1, 1], [], []>} : vector<2x64xf32>, vector<64x128xf32>, vector<2x128xf32> -> vector<2x128xf32>
    %c0_88 = arith.constant 0 : index
    %c0_89 = arith.constant 0 : index
    %613 = vector.load %arg10[%c0_88, %c0_89] : memref<1x128xf32, #tpu.memory_space<vmem>>, vector<1x128xf32>
    %614 = vector.broadcast %613 : vector<1x128xf32> to vector<2x128xf32>
    %615 = arith.addf %612, %614 : vector<2x128xf32>
    %cst_90 = arith.constant 0.000000e+00 : f32
    %616 = vector.broadcast %cst_90 : f32 to vector<2x128xf32>
    %617 = arith.maximumf %615, %616 : vector<2x128xf32>
    %c0_91 = arith.constant 0 : index
    %c0_92 = arith.constant 0 : index
    %618 = vector.load %arg11[%c0_91, %c0_92] : memref<128x5xf32, #tpu.memory_space<vmem>>, vector<128x5xf32>
    %cst_93 = arith.constant dense<0.000000e+00> : vector<2x5xf32>
    %619 = tpu.matmul %617, %618, %cst_93 {dimension_numbers = #tpu.dot_dimension_numbers<[1], [0], [0], [1], [0, 0, 1, 1], [], []>} : vector<2x128xf32>, vector<128x5xf32>, vector<2x5xf32> -> vector<2x5xf32>
    %c0_94 = arith.constant 0 : index
    %c0_95 = arith.constant 0 : index
    %620 = vector.load %arg12[%c0_94, %c0_95] : memref<1x5xf32, #tpu.memory_space<vmem>>, vector<1x5xf32>
    %621 = vector.broadcast %620 : vector<1x5xf32> to vector<2x5xf32>
    %622 = arith.addf %619, %621 : vector<2x5xf32>
    %c0_96 = arith.constant 0 : index
    %c0_97 = arith.constant 0 : index
    %623 = vector.load %arg13[%c0_96, %c0_97] : memref<2x5xf32, #tpu.memory_space<vmem>>, vector<2x5xf32>
    tpu.vector_store %arg13[%c0_96, %c0_97], %622 {strides = array<i32>} : memref<2x5xf32, #tpu.memory_space<vmem>>, vector<2x5xf32>,
    return
  }
}

</mosaic_0001>

<bundles_post_ra>
// kernel: bilstm_forward.1
= control target key start
LH: loop header
LB: loop body
LE: loop exit
PB: predicated region body
PF: predicated region fallthrough
CT: control target
= control target key end

     0   :  { %vm69_vm0 = vcmask 1043456   ;;  %v5120_v3 = vmov 0.0|0.0   ;;  %v5121_v8 = vmov 0.0   ;;  %vm62_vm1 = vcmask 31744   ;;  %s6040_s0 = inlined_call_operand.vmem [shape: f32[16,4], index: 0, kind: input, shape index: {}]   ;;  %s6041_s1 = inlined_call_operand.vmem [shape: f32[4,256], index: 1, kind: input, shape index: {}]   ;;  %s6042_s2 = inlined_call_operand.vmem [shape: f32[32,128], index: 2, kind: input, shape index: {}]   ;;  %s6043_s3 = inlined_call_operand.vmem [shape: f32[32,128], index: 3, kind: input, shape index: {}]   ;;  %s6044_s4 = inlined_call_operand.vmem [shape: f32[1,256], index: 4, kind: input, shape index: {}]   ;;  %s6045_s5 = inlined_call_operand.vmem [shape: f32[64,256], index: 5, kind: input, shape index: {}]   ;;  %s6046_s6 = inlined_call_operand.vmem [shape: f32[32,128], index: 6, kind: input, shape index: {}]   ;;  %s6047_s7 = inlined_call_operand.vmem [shape: f32[32,128], index: 7, kind: input, shape index: {}]   ;;  %s6048_s8 = inlined_call_operand.vmem [shape: f32[1,256], index: 8, kind: input, shape index: {}]   ;;  %s6049_s9 = inlined_call_operand.vmem [shape: f32[64,128], index: 9, kind: input, shape index: {}]   ;;  %s6050_s10 = inlined_call_operand.vmem [shape: f32[1,128], index: 10, kind: input, shape index: {}]   ;;  %s6051_s11 = inlined_call_operand.vmem [shape: f32[128,5], index: 11, kind: input, shape index: {}]   ;;  %s6052_s12 = inlined_call_operand.vmem [shape: f32[1,5], index: 12, kind: input, shape index: {}]   ;;  %s6053_s13 = inlined_call_operand.hbm [shape: f32[2,5], index: 13, kind: output, shape index: {}]  }
   0x1   :  { %v151_v0 = vld [vmem:[%s6042_s2] sm:$0xff]  ;;  %v152_v1 = vld [vmem:[%s6042_s2 + $0x8] sm:$0xff]  ;;  %4589 = vmatprep.subr.bf16.mxu1 %v5120_v3  ;;  %v153_v6 = vld [vmem:[%s6042_s2 + $0x10] sm:$0xff]  ;;  %138 = vmatprep.mubr.f32.mxu0 %v5121_v8  ;;  %vm5122_vm2 = vmmov 0  }
   0x2   :  { %v47_v2 = vld [vmem:[%s6041_s1] sm:$0xff]  ;;  %v5206_v4 = vpack.c.bf16 %v152_v1, %v151_v0  ;;  %v154_v7 = vld [vmem:[%s6042_s2 + $0x18] sm:$0xff]  ;;  %4191 = vmatprep.mubr.msk.f32.mxu1 %vm5122_vm2, %v5121_v8  ;;  %v156_v11 = vld [vmem:[%s6043_s3 + $0x8] sm:$0xff] }
   0x3   :  { %v61_v5 = vcombine.high %v47_v2, %v47_v2  ;;  %v45_v9 = vld [vmem:[%s6040_s0] sm:$0xff]  ;;  %v5228_v12 = vpack.c.bf16 %v154_v7, %v153_v6 }
   0x4   :  { %v155_v10 = vld [vmem:[%s6043_s3] sm:$0xff]  ;;  %4591 = vmatpush3.bf16.msra.mxu1 %v5206_v4 }
   0x5   :  { %3928 = vmatprep.subr.msk.mxu0 %vm69_vm0, %v61_v5  ;;  %4592 = vmatprep.subr.bf16.mxu1 %v5120_v3  ;;  %v5232_v13 = vpack.c.bf16 %v156_v11, %v155_v10 }
   0x6   :  { %3929 = vmatpush1.msk.msra.mxu0 %vm69_vm0, %v47_v2 }
   0x7   :  { %18 = vsyncpa [#allocation3], 0  ;;  %3930 = vmatmul.mubr.msk.f32.vlgmr.msra.gmra.mrb[0].mxu0 %vm62_vm1, %v45_v9  ;;  %v157_v14 = vld [vmem:[%s6043_s3 + $0x10] sm:$0xff]  ;;  %v158_v15 = vld [vmem:[%s6043_s3 + $0x18] sm:$0xff]  ;;  %4607 = vmatprep.subr.bf16.mxu0 %v5120_v3  ;;  %v50_v18 = vlaneseq  ;;  %s5124_s28 = smov 32   ;;  %vm159_vm3 = vcmask 261120  }
   0x8   :  { %144 = vmatprep.mubr.f32.mxu0 %v5121_v8  ;;  %v46_v16 = vld [vmem:[%s6040_s0 + $0x8] sm:$0xff]  ;;  %4609 = vmatpush3.bf16.msra.mxu0 %v5232_v13  ;;  %v5250_v17 = vpack.c.bf16 %v158_v15, %v157_v14  ;;  %v48_v21 = vld [vmem:[%s6044_s4] sm:$0x3]  ;;  %s5123_s4 = smov 64   ;;  %vm1896_vm4 = vcmask 1041408   ;;  %vm1899_vm5 = vcmask 1045504  }
   0x9   :  { %4594 = vmatpush3.bf16.msra.mxu1 %v5228_v12  ;;  %4610 = vmatprep.subr.bf16.mxu0 %v5120_v3  ;;  %v5271_v19 = vshrl.u32 %v50_v18, 7  ;;  %vm1932_vm6 = vcmask 523264   ;;  %vm3727_vm7 = vcmask 1040384   ;;  %vm3912_vm8 = vcmask 33792  }
   0xa   :  { %4595 = vmatprep.subr.bf16.mxu1 %v5120_v3 }
   0xb   :  { %3931 = vmatmul.mubr.msk.f32.gmra.mrb[2].mxu0 %vm62_vm1, %v46_v16  ;;  %v56_v20 = vsub.s32 1, %v5271_v19  ;;  %v52_v23 = vsub.s32 0, %v5271_v19 }
   0xc   :  { %4192 = vmatmul.mubr.f32.vlgmr.msra.gmra.mrb[0].mxu1 %v5121_v8  ;;  %4612 = vmatpush3.bf16.msra.mxu0 %v5250_v17 }
   0xd   :  { %4597 = vmatpush3.bf16.msra.mxu1 %v5232_v13  ;;  %4202 = vmatprep.mubr.msk.f32.mxu1 %vm5122_vm2, %v5121_v8  ;;  %v57_v22 = vrot.slane %v48_v21, %v56_v20  ;;  %v53_v27 = vrot.slane %v48_v21, %v52_v23 }
   0xe   :  { %4598 = vmatprep.subr.bf16.mxu1 %v5120_v3  ;;  %4224 = vmatprep.mubr.msk.f32.mxu0 %vm5122_vm2, %v5121_v8 }
   0xf   :  { %4619 = vmatprep.subr.bf16.mxu0 %v5120_v3 }
  0x11   :  { %4600 = vmatpush3.bf16.msra.mxu1 %v5250_v17 }
  0x12   :  { %4601 = vmatprep.subr.bf16.mxu1 %v5120_v3 }
  0x14   :  { %4203 = vmatmul.mubr.f32.vlgmr.msra.gmra.mrb[2].mxu1 %v5121_v8 }
  0x15   :  { %4603 = vmatpush3.bf16.msra.mxu1 %v5206_v4  ;;  %4213 = vmatprep.mubr.msk.f32.mxu1 %vm5122_vm2, %v5121_v8 }
  0x16   :  { %4604 = vmatprep.subr.bf16.mxu1 %v5120_v3 }
  0x19   :  { %4606 = vmatpush3.bf16.msra.mxu1 %v5228_v12 }
  0x1a   :  { %4613 = vmatprep.subr.bf16.mxu1 %v5120_v3 }
  0xda   :  { %v140_v24 = vpop.f32.mrb[0].mxu0 }
  0xdb   :  { %v142_v25 = vpop.f32.mrb[1].mxu0  ;;  %v5288_v35 = vadd.f32 %v140_v24, %v53_v27 }
  0xdc   :  { %v5280_v26 = vadd.f32 %v142_v25, %v57_v22 }
  0xde   :  { %v146_v28 = vpop.f32.mrb[2].mxu0 }
  0xdf   :  { %v229_v29 = vpop.f32.mrb[0].mxu1  ;;  %v5284_v30 = vadd.f32 %v146_v28, %v53_v27  ;;  %v148_v31 = vpop.f32.mrb[3].mxu0 }
  0xe0   :  { %v4193_v32 = vpop.f32.mrb[1].mxu1  ;;  %v5286_v33 = vadd.f32 %v148_v31, %v57_v22  ;;  %v233_v39 = vadd.f32 %v229_v29, %v5288_v35 }
  0xe2   :  { %v3932_v43 = vmul.f32 -1.442695, %v233_v39 }
  0xe7   :  { %v324_v34 = vpop.f32.mrb[2].mxu1 }
  0xe8   :  { %v329_v36 = vrot.slane %v324_v34, 2  ;;  %v4204_v37 = vpop.f32.mrb[3].mxu1 }
  0xea   :  { %v331_v38 = vadd.f32 %v329_v36, %v5286_v33 }
  0xec   :  { %4840 = vtanh.f32 %v331_v38  ;;  %v3933_v42 = vmul.f32 -1.442695, %v331_v38 }
  0xed   :  { %4842 = vtanh.f32 %v233_v39 }
  0xee   :  { %4844 = vpow2.f32 %v3933_v42 }
  0xef   :  { %4846 = vpow2.f32 %v3932_v43 }
  0xf6   :  { %v4841_v40 = vpop.eup %4840 }
  0xf7   :  { %341 = vrot.lane.b32.xlu0 %v4841_v40, %s5123_s4  ;;  %v4843_v41 = vpop.eup %4842 }
  0xf8   :  { %v4845_v44 = vpop.eup %4844 }
  0xf9   :  { %v335_v45 = vadd.f32 1.0, %v4845_v44  ;;  %v4847_v46 = vpop.eup %4846 }
  0xfa   :  { %v237_v47 = vadd.f32 1.0, %v4847_v46 }
  0xfb   :  { %243 = vrot.lane.b32.xlu0 %v4843_v41, %s5123_s4  ;;  %4848 = vrcp.f32 %v335_v45 }
  0xfc   :  { %4850 = vrcp.f32 %v237_v47 }
 0x105   :  { %v4849_v48 = vpop.eup %4848 }
 0x106   :  { %v4851_v51 = vpop.eup %4850  ;;  %v339_v54 = vmul.f32 0.0, %v4849_v48 }
 0x107   :  { %v241_v57 = vmul.f32 0.0, %v4851_v51 }
 0x169   :  { %v342_v49 = vpop.permute.xlu0 %341 }
 0x16a   :  { %v344_v50 = vmul.f32 %v4849_v48, %v342_v49 }
 0x16c   :  { %346 = vrot.lane.b32.xlu1 %v344_v50, %s5124_s28 }
 0x16d   :  { %v244_v52 = vpop.permute.xlu0 %243 }
 0x16e   :  { %v246_v53 = vmul.f32 %v4851_v51, %v244_v52 }
 0x170   :  { %248 = vrot.lane.b32.xlu1 %v246_v53, %s5124_s28 }
 0x1de   :  { %v347_v55 = vpop.permute.xlu1 %346 }
 0x1df   :  { %v5296_v56 = vadd.f32 %v347_v55, %v339_v54 }
 0x1e1   :  { %4852 = vtanh.f32 %v5296_v56  ;;  %v550_v40 = vrot.slane %v5296_v56, 2 }
 0x1e2   :  { %v249_v58 = vpop.permute.xlu1 %248 }
 0x1e3   :  { %v5299_v59 = vadd.f32 %v249_v58, %v241_v57 }
 0x1e5   :  { %4854 = vtanh.f32 %v5299_v59  ;;  %v443_v42 = vrot.slane %v5299_v59, 6 }
 0x1eb   :  { %v4853_v60 = vpop.eup %4852 }
 0x1ec   :  { %352 = vrot.lane.b32.xlu0 %v4853_v60, %s5123_s4 }
 0x1ef   :  { %v4855_v61 = vpop.eup %4854 }
 0x1f0   :  { %254 = vrot.lane.b32.xlu1 %v4855_v61, %s5123_s4 }
 0x25e   :  { %v353_v62 = vpop.permute.xlu0 %352 }
 0x25f   :  { %v5304_v63 = vmul.f32 %v4849_v48, %v353_v62 }
 0x261   :  { %v463_v0 = vrot.slane %v5304_v63, 6 }
 0x262   :  { %v255_v1 = vpop.permute.xlu1 %254 }
 0x263   :  { %v257_v2 = vmul.f32 %v4851_v51, %v255_v1  ;;  %464 = vrot.lane.b32.xlu0 %v463_v0, %s5124_s28 }
 0x265   :  { %357 = vrot.lane.b32.xlu1 %v257_v2, %s5124_s28 }
 0x2d5   :  { %v465_v5 = vpop.permute.xlu0 %464 }
 0x2d6   :  { %4225 = vmatmul.mubr.msk.f32.vlgmr.msra.gmra.mrb[4].mxu0 %vm159_vm3, %v465_v5 }
 0x2d7   :  { %v5310_v6 = vpop.permute.xlu1 %357  ;;  %4621 = vmatpush3.bf16.msra.mxu0 %v5232_v13  ;;  %4246 = vmatprep.mubr.msk.f32.mxu0 %vm5122_vm2, %v5121_v8 }
 0x2d8   :  { %4214 = vmatmul.mubr.msk.f32.vlgmr.msra.gmra.mrb[4].mxu1 %vm159_vm3, %v5310_v6  ;;  %4622 = vmatprep.subr.bf16.mxu0 %v5120_v3 }
 0x2d9   :  { %4615 = vmatpush3.bf16.msra.mxu1 %v5206_v4  ;;  %4235 = vmatprep.mubr.msk.f32.mxu1 %vm5122_vm2, %v5121_v8 }
 0x2da   :  { %4616 = vmatprep.subr.bf16.mxu1 %v5120_v3 }
 0x2db   :  { %4624 = vmatpush3.bf16.msra.mxu0 %v5250_v17 }
 0x2dc   :  { %4631 = vmatprep.subr.bf16.mxu0 %v5120_v3 }
 0x2dd   :  { %4618 = vmatpush3.bf16.msra.mxu1 %v5228_v12 }
 0x2de   :  { %4625 = vmatprep.subr.bf16.mxu1 %v5120_v3 }
 0x3a9   :  { %v534_v7 = vpop.f32.mrb[4].mxu0 }
 0x3aa   :  { %v539_v9 = vrot.slane %v534_v7, 4  ;;  %v4226_v10 = vpop.f32.mrb[5].mxu0 }
 0x3ab   :  { %v427_v11 = vpop.f32.mrb[4].mxu1 }
 0x3ac   :  { %v541_v14 = vadd.f32 %v539_v9, %v5286_v33  ;;  %v432_v15 = vrot.slane %v427_v11, 6  ;;  %v4215_v16 = vpop.f32.mrb[5].mxu1 }
 0x3ae   :  { %4856 = vtanh.f32 %v541_v14  ;;  %v434_v18 = vadd.f32 %v432_v15, %v5288_v35  ;;  %v3937_v24 = vmul.f32 -1.442695, %v541_v14 }
 0x3b0   :  { %4858 = vtanh.f32 %v434_v18  ;;  %v3935_v25 = vmul.f32 -1.442695, %v434_v18 }
 0x3b1   :  { %4860 = vpow2.f32 %v3937_v24 }
 0x3b2   :  { %4862 = vpow2.f32 %v3935_v25 }
 0x3b8   :  { %v4857_v21 = vpop.eup %4856 }
 0x3b9   :  { %554 = vrot.lane.b32.xlu0 %v4857_v21, %s5123_s4 }
 0x3ba   :  { %v4859_v22 = vpop.eup %4858 }
 0x3bb   :  { %447 = vrot.lane.b32.xlu1 %v4859_v22, %s5123_s4  ;;  %v4861_v27 = vpop.eup %4860 }
 0x3bc   :  { %v4863_v28 = vpop.eup %4862  ;;  %v545_v29 = vadd.f32 1.0, %v4861_v27 }
 0x3bd   :  { %v438_v31 = vadd.f32 1.0, %v4863_v28 }
 0x3be   :  { %4864 = vrcp.f32 %v545_v29 }
 0x3bf   :  { %4866 = vrcp.f32 %v438_v31 }
 0x3c8   :  { %v4865_v32 = vpop.eup %4864 }
 0x3c9   :  { %v4867_v37 = vpop.eup %4866  ;;  %v552_v41 = vmul.f32 %v4865_v32, %v550_v40 }
 0x3ca   :  { %v445_v45 = vmul.f32 %v4867_v37, %v443_v42 }
 0x42b   :  { %v555_v34 = vpop.permute.xlu0 %554 }
 0x42c   :  { %v557_v36 = vmul.f32 %v4865_v32, %v555_v34 }
 0x42d   :  { %v448_v38 = vpop.permute.xlu1 %447 }
 0x42e   :  { %559 = vrot.lane.b32.xlu0 %v557_v36, %s5124_s28  ;;  %v450_v39 = vmul.f32 %v4867_v37, %v448_v38 }
 0x430   :  { %452 = vrot.lane.b32.xlu1 %v450_v39, %s5124_s28 }
 0x4a0   :  { %v560_v43 = vpop.permute.xlu0 %559 }
 0x4a1   :  { %v5334_v44 = vadd.f32 %v560_v43, %v552_v41 }
 0x4a2   :  { %v453_v46 = vpop.permute.xlu1 %452 }
 0x4a3   :  { %4868 = vtanh.f32 %v5334_v44  ;;  %v5337_v47 = vadd.f32 %v453_v46, %v445_v45  ;;  %v764_v28 = vrot.slane %v5334_v44, 2 }
 0x4a5   :  { %4870 = vtanh.f32 %v5337_v47  ;;  %v657_v31 = vrot.slane %v5337_v47, 6 }
 0x4ad   :  { %v4869_v48 = vpop.eup %4868 }
 0x4ae   :  { %565 = vrot.lane.b32.xlu0 %v4869_v48, %s5123_s4 }
 0x4af   :  { %v4871_v49 = vpop.eup %4870 }
 0x4b0   :  { %458 = vrot.lane.b32.xlu1 %v4871_v49, %s5123_s4 }
 0x520   :  { %v566_v50 = vpop.permute.xlu0 %565 }
 0x521   :  { %v5342_v51 = vmul.f32 %v4865_v32, %v566_v50 }
 0x522   :  { %v459_v53 = vpop.permute.xlu1 %458 }
 0x523   :  { %v677_v52 = vrot.slane %v5342_v51, 4  ;;  %v5345_v54 = vmul.f32 %v4867_v37, %v459_v53 }
 0x525   :  { %678 = vrot.lane.b32.xlu0 %v677_v52, %s5124_s28  ;;  %v570_v55 = vrot.slane %v5345_v54, 2 }
 0x527   :  { %571 = vrot.lane.b32.xlu1 %v570_v55, %s5124_s28 }
 0x597   :  { %v679_v56 = vpop.permute.xlu0 %678 }
 0x598   :  { %4247 = vmatmul.mubr.msk.f32.vlgmr.msra.gmra.mrb[6].mxu0 %vm159_vm3, %v679_v56 }
 0x599   :  { %4633 = vmatpush3.bf16.msra.mxu0 %v5232_v13  ;;  %4268 = vmatprep.mubr.msk.f32.mxu0 %vm5122_vm2, %v5121_v8  ;;  %v572_v57 = vpop.permute.xlu1 %571 }
 0x59a   :  { %4634 = vmatprep.subr.bf16.mxu0 %v5120_v3  ;;  %4236 = vmatmul.mubr.msk.f32.vlgmr.msra.gmra.mrb[6].mxu1 %vm159_vm3, %v572_v57 }
 0x59b   :  { %4627 = vmatpush3.bf16.msra.mxu1 %v5206_v4  ;;  %4257 = vmatprep.mubr.msk.f32.mxu1 %vm5122_vm2, %v5121_v8 }
 0x59c   :  { %4628 = vmatprep.subr.bf16.mxu1 %v5120_v3 }
 0x59d   :  { %4636 = vmatpush3.bf16.msra.mxu0 %v5250_v17 }
 0x59e   :  { %4643 = vmatprep.subr.bf16.mxu0 %v5120_v3 }
 0x59f   :  { %4630 = vmatpush3.bf16.msra.mxu1 %v5228_v12 }
 0x5a0   :  { %4637 = vmatprep.subr.bf16.mxu1 %v5120_v3 }
 0x66b   :  { %v748_v58 = vpop.f32.mrb[6].mxu0 }
 0x66c   :  { %v753_v59 = vrot.slane %v748_v58, 6  ;;  %v4248_v60 = vpop.f32.mrb[7].mxu0 }
 0x66d   :  { %v641_v62 = vpop.f32.mrb[6].mxu1 }
 0x66e   :  { %v755_v61 = vadd.f32 %v753_v59, %v5286_v33  ;;  %v646_v0 = vrot.slane %v641_v62, 4  ;;  %v4237_v1 = vpop.f32.mrb[7].mxu1 }
 0x670   :  { %4872 = vtanh.f32 %v755_v61  ;;  %v648_v2 = vadd.f32 %v646_v0, %v5288_v35  ;;  %v3941_v9 = vmul.f32 -1.442695, %v755_v61 }
 0x672   :  { %4874 = vtanh.f32 %v648_v2  ;;  %v3939_v10 = vmul.f32 -1.442695, %v648_v2 }
 0x673   :  { %4876 = vpow2.f32 %v3941_v9 }
 0x674   :  { %4878 = vpow2.f32 %v3939_v10 }
 0x67a   :  { %v4873_v5 = vpop.eup %4872 }
 0x67b   :  { %768 = vrot.lane.b32.xlu0 %v4873_v5, %s5123_s4 }
 0x67c   :  { %v4875_v7 = vpop.eup %4874 }
 0x67d   :  { %661 = vrot.lane.b32.xlu1 %v4875_v7, %s5123_s4  ;;  %v4877_v11 = vpop.eup %4876 }
 0x67e   :  { %v4879_v14 = vpop.eup %4878  ;;  %v759_v15 = vadd.f32 1.0, %v4877_v11 }
 0x67f   :  { %v652_v16 = vadd.f32 1.0, %v4879_v14 }
 0x680   :  { %4880 = vrcp.f32 %v759_v15 }
 0x681   :  { %4882 = vrcp.f32 %v652_v16 }
 0x68a   :  { %v4881_v18 = vpop.eup %4880 }
 0x68b   :  { %v4883_v24 = vpop.eup %4882  ;;  %v766_v29 = vmul.f32 %v4881_v18, %v764_v28 }
 0x68c   :  { %v659_v36 = vmul.f32 %v4883_v24, %v657_v31 }
 0x6ed   :  { %v769_v21 = vpop.permute.xlu0 %768 }
 0x6ee   :  { %v771_v22 = vmul.f32 %v4881_v18, %v769_v21 }
 0x6ef   :  { %v662_v25 = vpop.permute.xlu1 %661 }
 0x6f0   :  { %773 = vrot.lane.b32.xlu0 %v771_v22, %s5124_s28  ;;  %v664_v27 = vmul.f32 %v4883_v24, %v662_v25 }
 0x6f2   :  { %666 = vrot.lane.b32.xlu1 %v664_v27, %s5124_s28 }
 0x762   :  { %v774_v32 = vpop.permute.xlu0 %773 }
 0x763   :  { %v5372_v34 = vadd.f32 %v774_v32, %v766_v29 }
 0x764   :  { %v667_v37 = vpop.permute.xlu1 %666 }
 0x765   :  { %4884 = vtanh.f32 %v5372_v34  ;;  %v5375_v38 = vadd.f32 %v667_v37, %v659_v36  ;;  %v975_v11 = vrot.slane %v5372_v34, 2 }
 0x767   :  { %4886 = vtanh.f32 %v5375_v38 }
 0x76f   :  { %v4885_v39 = vpop.eup %4884 }
 0x770   :  { %779 = vrot.lane.b32.xlu0 %v4885_v39, %s5123_s4 }
 0x771   :  { %v4887_v40 = vpop.eup %4886 }
 0x772   :  { %672 = vrot.lane.b32.xlu1 %v4887_v40, %s5123_s4 }
 0x7e2   :  { %v780_v41 = vpop.permute.xlu0 %779 }
 0x7e3   :  { %v5380_v42 = vmul.f32 %v4881_v18, %v780_v41  ;;  %v871_v18 = vrot.slane %v5375_v38, 6 }
 0x7e4   :  { %v673_v44 = vpop.permute.xlu1 %672 }
 0x7e5   :  { %v891_v43 = vrot.slane %v5380_v42, 2  ;;  %v5383_v45 = vmul.f32 %v4883_v24, %v673_v44 }
 0x7e7   :  { %892 = vrot.lane.b32.xlu0 %v891_v43, %s5124_s28  ;;  %v784_v46 = vrot.slane %v5383_v45, 4 }
 0x7e9   :  { %785 = vrot.lane.b32.xlu1 %v784_v46, %s5124_s28 }
 0x859   :  { %v893_v47 = vpop.permute.xlu0 %892 }
 0x85a   :  { %4269 = vmatmul.mubr.msk.f32.vlgmr.msra.gmra.mrb[8].mxu0 %vm159_vm3, %v893_v47 }
 0x85b   :  { %4645 = vmatpush3.bf16.msra.mxu0 %v5232_v13  ;;  %4290 = vmatprep.mubr.msk.f32.mxu0 %vm5122_vm2, %v5121_v8  ;;  %v786_v48 = vpop.permute.xlu1 %785 }
 0x85c   :  { %4646 = vmatprep.subr.bf16.mxu0 %v5120_v3  ;;  %4258 = vmatmul.mubr.msk.f32.vlgmr.msra.gmra.mrb[8].mxu1 %vm159_vm3, %v786_v48 }
 0x85d   :  { %4639 = vmatpush3.bf16.msra.mxu1 %v5206_v4  ;;  %4279 = vmatprep.mubr.msk.f32.mxu1 %vm5122_vm2, %v5121_v8 }
 0x85e   :  { %4640 = vmatprep.subr.bf16.mxu1 %v5120_v3 }
 0x85f   :  { %4648 = vmatpush3.bf16.msra.mxu0 %v5250_v17 }
 0x860   :  { %4655 = vmatprep.subr.bf16.mxu0 %v5120_v3 }
 0x861   :  { %4642 = vmatpush3.bf16.msra.mxu1 %v5228_v12 }
 0x862   :  { %4649 = vmatprep.subr.bf16.mxu1 %v5120_v3 }
 0x92d   :  { %v962_v49 = vpop.f32.mrb[8].mxu0 }
 0x92e   :  { %v966_v50 = vadd.f32 %v962_v49, %v5286_v33  ;;  %v4270_v52 = vpop.f32.mrb[9].mxu0 }
 0x92f   :  { %v855_v53 = vpop.f32.mrb[8].mxu1 }
 0x930   :  { %4888 = vtanh.f32 %v966_v50  ;;  %v860_v55 = vrot.slane %v855_v53, 2  ;;  %v4259_v56 = vpop.f32.mrb[9].mxu1  ;;  %v3945_v60 = vmul.f32 -1.442695, %v966_v50 }
 0x932   :  { %v862_v57 = vadd.f32 %v860_v55, %v5288_v35 }
 0x934   :  { %4890 = vtanh.f32 %v862_v57  ;;  %v3943_v61 = vmul.f32 -1.442695, %v862_v57 }
 0x935   :  { %4892 = vpow2.f32 %v3945_v60 }
 0x936   :  { %4894 = vpow2.f32 %v3943_v61 }
 0x93a   :  { %v4889_v58 = vpop.eup %4888 }
 0x93b   :  { %979 = vrot.lane.b32.xlu0 %v4889_v58, %s5123_s4 }
 0x93e   :  { %v4891_v59 = vpop.eup %4890 }
 0x93f   :  { %875 = vrot.lane.b32.xlu1 %v4891_v59, %s5123_s4  ;;  %v4893_v62 = vpop.eup %4892 }
 0x940   :  { %v970_v33 = vadd.f32 1.0, %v4893_v62  ;;  %v4895_v0 = vpop.eup %4894 }
 0x941   :  { %v866_v1 = vadd.f32 1.0, %v4895_v0 }
 0x942   :  { %4896 = vrcp.f32 %v970_v33 }
 0x943   :  { %4898 = vrcp.f32 %v866_v1 }
 0x94c   :  { %v4897_v2 = vpop.eup %4896 }
 0x94d   :  { %v4899_v7 = vpop.eup %4898  ;;  %v977_v14 = vmul.f32 %v4897_v2, %v975_v11 }
 0x94e   :  { %v873_v21 = vmul.f32 %v4899_v7, %v871_v18 }
 0x9ad   :  { %v980_v5 = vpop.permute.xlu0 %979 }
 0x9ae   :  { %v982_v35 = vmul.f32 %v4897_v2, %v980_v5 }
 0x9b0   :  { %984 = vrot.lane.b32.xlu0 %v982_v35, %s5124_s28 }
 0x9b1   :  { %v876_v9 = vpop.permute.xlu1 %875 }
 0x9b2   :  { %v878_v10 = vmul.f32 %v4899_v7, %v876_v9 }
 0x9b4   :  { %880 = vrot.lane.b32.xlu1 %v878_v10, %s5124_s28 }
 0xa22   :  { %v985_v15 = vpop.permute.xlu0 %984 }
 0xa23   :  { %v5409_v16 = vadd.f32 %v985_v15, %v977_v14 }
 0xa25   :  { %4900 = vtanh.f32 %v5409_v16  ;;  %v1185_v33 = vrot.slane %v5409_v16, 2 }
 0xa26   :  { %v881_v22 = vpop.permute.xlu1 %880 }
 0xa27   :  { %v5413_v24 = vadd.f32 %v881_v22, %v873_v21 }
 0xa29   :  { %4902 = vtanh.f32 %v5413_v24  ;;  %v1079_v5 = vrot.slane %v5413_v24, 6 }
 0xa2f   :  { %v4901_v25 = vpop.eup %4900 }
 0xa30   :  { %990 = vrot.lane.b32.xlu0 %v4901_v25, %s5123_s4 }
 0xa33   :  { %v4903_v27 = vpop.eup %4902 }
 0xa34   :  { %886 = vrot.lane.b32.xlu1 %v4903_v27, %s5123_s4 }
 0xaa2   :  { %v991_v28 = vpop.permute.xlu0 %990 }
 0xaa3   :  { %v5418_v29 = vmul.f32 %v4897_v2, %v991_v28 }
 0xaa5   :  { %1099 = vrot.lane.b32.xlu0 %v5418_v29, %s5124_s28 }
 0xaa6   :  { %v887_v31 = vpop.permute.xlu1 %886 }
 0xaa7   :  { %v5422_v32 = vmul.f32 %v4899_v7, %v887_v31 }
 0xaa9   :  { %v995_v34 = vrot.slane %v5422_v32, 6 }
 0xaab   :  { %996 = vrot.lane.b32.xlu1 %v995_v34, %s5124_s28 }
 0xb17   :  { %v1100_v36 = vpop.permute.xlu0 %1099 }
 0xb18   :  { %4291 = vmatmul.mubr.msk.f32.vlgmr.msra.gmra.mrb[10].mxu0 %vm159_vm3, %v1100_v36 }
 0xb19   :  { %4657 = vmatpush3.bf16.msra.mxu0 %v5232_v13  ;;  %4312 = vmatprep.mubr.msk.f32.mxu0 %vm5122_vm2, %v5121_v8 }
 0xb1a   :  { %4658 = vmatprep.subr.bf16.mxu0 %v5120_v3 }
 0xb1d   :  { %4660 = vmatpush3.bf16.msra.mxu0 %v5250_v17  ;;  %v997_v37 = vpop.permute.xlu1 %996 }
 0xb1e   :  { %4667 = vmatprep.subr.bf16.mxu0 %v5120_v3  ;;  %4280 = vmatmul.mubr.msk.f32.vlgmr.msra.gmra.mrb[10].mxu1 %vm159_vm3, %v997_v37 }
 0xb1f   :  { %4651 = vmatpush3.bf16.msra.mxu1 %v5206_v4  ;;  %4301 = vmatprep.mubr.msk.f32.mxu1 %vm5122_vm2, %v5121_v8 }
 0xb20   :  { %4652 = vmatprep.subr.bf16.mxu1 %v5120_v3 }
 0xb23   :  { %4654 = vmatpush3.bf16.msra.mxu1 %v5228_v12 }
 0xb24   :  { %4661 = vmatprep.subr.bf16.mxu1 %v5120_v3 }
 0xbeb   :  { %v1169_v38 = vpop.f32.mrb[10].mxu0 }
 0xbec   :  { %v1174_v39 = vrot.slane %v1169_v38, 2  ;;  %v4292_v40 = vpop.f32.mrb[11].mxu0 }
 0xbee   :  { %v1176_v41 = vadd.f32 %v1174_v39, %v5280_v26 }
 0xbf0   :  { %4904 = vtanh.f32 %v1176_v41  ;;  %v3949_v49 = vmul.f32 -1.442695, %v1176_v41 }
 0xbf1   :  { %v1066_v43 = vpop.f32.mrb[10].mxu1 }
 0xbf2   :  { %v1070_v44 = vadd.f32 %v1066_v43, %v5284_v30  ;;  %v4281_v46 = vpop.f32.mrb[11].mxu1 }
 0xbf4   :  { %4906 = vtanh.f32 %v1070_v44  ;;  %v3947_v50 = vmul.f32 -1.442695, %v1070_v44 }
 0xbf5   :  { %4908 = vpow2.f32 %v3949_v49 }
 0xbf6   :  { %4910 = vpow2.f32 %v3947_v50 }
 0xbfa   :  { %v4905_v47 = vpop.eup %4904 }
 0xbfb   :  { %1189 = vrot.lane.b32.xlu0 %v4905_v47, %s5123_s4 }
 0xbfe   :  { %v4907_v48 = vpop.eup %4906 }
 0xbff   :  { %1083 = vrot.lane.b32.xlu1 %v4907_v48, %s5123_s4  ;;  %v4909_v52 = vpop.eup %4908 }
 0xc00   :  { %v1180_v53 = vadd.f32 1.0, %v4909_v52  ;;  %v4911_v55 = vpop.eup %4910 }
 0xc01   :  { %v1074_v56 = vadd.f32 1.0, %v4911_v55 }
 0xc02   :  { %4912 = vrcp.f32 %v1180_v53 }
 0xc03   :  { %4914 = vrcp.f32 %v1074_v56 }
 0xc0c   :  { %v4913_v57 = vpop.eup %4912 }
 0xc0d   :  { %v4915_v60 = vpop.eup %4914  ;;  %v1187_v0 = vmul.f32 %v4913_v57, %v1185_v33 }
 0xc0e   :  { %v1081_v35 = vmul.f32 %v4915_v60, %v1079_v5 }
 0xc6d   :  { %v1190_v58 = vpop.permute.xlu0 %1189 }
 0xc6e   :  { %v1192_v59 = vmul.f32 %v4913_v57, %v1190_v58 }
 0xc70   :  { %1194 = vrot.lane.b32.xlu0 %v1192_v59, %s5124_s28 }
 0xc71   :  { %v1084_v61 = vpop.permute.xlu1 %1083 }
 0xc72   :  { %v1086_v62 = vmul.f32 %v4915_v60, %v1084_v61 }
 0xc74   :  { %1088 = vrot.lane.b32.xlu1 %v1086_v62, %s5124_s28 }
 0xce2   :  { %v1195_v1 = vpop.permute.xlu0 %1194 }
 0xce3   :  { %v5447_v2 = vadd.f32 %v1195_v1, %v1187_v0 }
 0xce5   :  { %4916 = vtanh.f32 %v5447_v2 }
 0xce6   :  { %v1089_v7 = vpop.permute.xlu1 %1088 }
 0xce7   :  { %v5451_v9 = vadd.f32 %v1089_v7, %v1081_v35 }
 0xce9   :  { %4918 = vtanh.f32 %v5451_v9  ;;  %v1291_v59 = vrot.slane %v5451_v9, 6 }
 0xcef   :  { %v4917_v10 = vpop.eup %4916 }
 0xcf0   :  { %1200 = vrot.lane.b32.xlu0 %v4917_v10, %s5123_s4 }
 0xcf3   :  { %v4919_v11 = vpop.eup %4918 }
 0xcf4   :  { %1094 = vrot.lane.b32.xlu1 %v4919_v11, %s5123_s4 }
 0xd62   :  { %v1201_v14 = vpop.permute.xlu0 %1200 }
 0xd63   :  { %v5456_v15 = vmul.f32 %v4913_v57, %v1201_v14  ;;  %v1398_v57 = vrot.slane %v5447_v2, 2 }
 0xd65   :  { %v1311_v16 = vrot.slane %v5456_v15, 6 }
 0xd66   :  { %v1095_v18 = vpop.permute.xlu1 %1094 }
 0xd67   :  { %1312 = vrot.lane.b32.xlu0 %v1311_v16, %s5124_s28  ;;  %v1097_v21 = vmul.f32 %v4915_v60, %v1095_v18 }
 0xd69   :  { %1205 = vrot.lane.b32.xlu1 %v1097_v21, %s5124_s28 }
 0xdd9   :  { %v1313_v22 = vpop.permute.xlu0 %1312 }
 0xdda   :  { %4313 = vmatmul.mubr.msk.f32.vlgmr.msra.gmra.mrb[12].mxu0 %vm159_vm3, %v1313_v22 }
 0xddb   :  { %4669 = vmatpush3.bf16.msra.mxu0 %v5232_v13  ;;  %4334 = vmatprep.mubr.msk.f32.mxu0 %vm5122_vm2, %v5121_v8  ;;  %v5465_v24 = vpop.permute.xlu1 %1205 }
 0xddc   :  { %4670 = vmatprep.subr.bf16.mxu0 %v5120_v3  ;;  %4302 = vmatmul.mubr.msk.f32.vlgmr.msra.gmra.mrb[12].mxu1 %vm159_vm3, %v5465_v24 }
 0xddd   :  { %4663 = vmatpush3.bf16.msra.mxu1 %v5206_v4  ;;  %4323 = vmatprep.mubr.msk.f32.mxu1 %vm5122_vm2, %v5121_v8 }
 0xdde   :  { %4664 = vmatprep.subr.bf16.mxu1 %v5120_v3 }
 0xddf   :  { %4672 = vmatpush3.bf16.msra.mxu0 %v5250_v17 }
 0xde0   :  { %4679 = vmatprep.subr.bf16.mxu0 %v5120_v3 }
 0xde1   :  { %4666 = vmatpush3.bf16.msra.mxu1 %v5228_v12 }
 0xde2   :  { %4673 = vmatprep.subr.bf16.mxu1 %v5120_v3 }
 0xead   :  { %v1382_v25 = vpop.f32.mrb[12].mxu0 }
 0xeae   :  { %v1387_v27 = vrot.slane %v1382_v25, 4  ;;  %v4314_v28 = vpop.f32.mrb[13].mxu0 }
 0xeaf   :  { %v1275_v34 = vpop.f32.mrb[12].mxu1 }
 0xeb0   :  { %v1389_v31 = vadd.f32 %v1387_v27, %v5280_v26  ;;  %v1280_v36 = vrot.slane %v1275_v34, 6  ;;  %v4303_v37 = vpop.f32.mrb[13].mxu1 }
 0xeb2   :  { %4920 = vtanh.f32 %v1389_v31  ;;  %v1282_v38 = vadd.f32 %v1280_v36, %v5284_v30  ;;  %v3953_v41 = vmul.f32 -1.442695, %v1389_v31 }
 0xeb4   :  { %4922 = vtanh.f32 %v1282_v38  ;;  %v3951_v43 = vmul.f32 -1.442695, %v1282_v38 }
 0xeb5   :  { %4924 = vpow2.f32 %v3953_v41 }
 0xeb6   :  { %4926 = vpow2.f32 %v3951_v43 }
 0xebc   :  { %v4921_v39 = vpop.eup %4920 }
 0xebd   :  { %1402 = vrot.lane.b32.xlu0 %v4921_v39, %s5123_s4 }
 0xebe   :  { %v4923_v40 = vpop.eup %4922 }
 0xebf   :  { %1295 = vrot.lane.b32.xlu1 %v4923_v40, %s5123_s4  ;;  %v4925_v44 = vpop.eup %4924 }
 0xec0   :  { %v4927_v46 = vpop.eup %4926  ;;  %v1393_v47 = vadd.f32 1.0, %v4925_v44 }
 0xec1   :  { %v1286_v48 = vadd.f32 1.0, %v4927_v46 }
 0xec2   :  { %4928 = vrcp.f32 %v1393_v47 }
 0xec3   :  { %4930 = vrcp.f32 %v1286_v48 }
 0xecc   :  { %v4929_v49 = vpop.eup %4928 }
 0xecd   :  { %v4931_v53 = vpop.eup %4930  ;;  %v1400_v58 = vmul.f32 %v4929_v49, %v1398_v57 }
 0xece   :  { %v1293_v62 = vmul.f32 %v4931_v53, %v1291_v59 }
 0xf2f   :  { %v1403_v50 = vpop.permute.xlu0 %1402 }
 0xf30   :  { %v1405_v52 = vmul.f32 %v4929_v49, %v1403_v50 }
 0xf31   :  { %v1296_v55 = vpop.permute.xlu1 %1295 }
 0xf32   :  { %1407 = vrot.lane.b32.xlu0 %v1405_v52, %s5124_s28  ;;  %v1298_v56 = vmul.f32 %v4931_v53, %v1296_v55 }
 0xf34   :  { %1300 = vrot.lane.b32.xlu1 %v1298_v56, %s5124_s28 }
 0xfa4   :  { %v1408_v60 = vpop.permute.xlu0 %1407 }
 0xfa5   :  { %v5486_v61 = vadd.f32 %v1408_v60, %v1400_v58 }
 0xfa6   :  { %v1301_v33 = vpop.permute.xlu1 %1300 }
 0xfa7   :  { %4932 = vtanh.f32 %v5486_v61  ;;  %v5489_v0 = vadd.f32 %v1301_v33, %v1293_v62  ;;  %v1612_v48 = vrot.slane %v5486_v61, 2 }
 0xfa9   :  { %4934 = vtanh.f32 %v5489_v0  ;;  %v1505_v50 = vrot.slane %v5489_v0, 6 }
 0xfb1   :  { %v4933_v1 = vpop.eup %4932 }
 0xfb2   :  { %1413 = vrot.lane.b32.xlu0 %v4933_v1, %s5123_s4 }
 0xfb3   :  { %v4935_v5 = vpop.eup %4934 }
 0xfb4   :  { %1306 = vrot.lane.b32.xlu1 %v4935_v5, %s5123_s4 }
0x1024   :  { %v1414_v2 = vpop.permute.xlu0 %1413 }
0x1025   :  { %v5494_v35 = vmul.f32 %v4929_v49, %v1414_v2 }
0x1026   :  { %v1307_v9 = vpop.permute.xlu1 %1306 }
0x1027   :  { %v1525_v7 = vrot.slane %v5494_v35, 4  ;;  %v5497_v10 = vmul.f32 %v4931_v53, %v1307_v9 }
0x1029   :  { %1526 = vrot.lane.b32.xlu0 %v1525_v7, %s5124_s28  ;;  %v1418_v11 = vrot.slane %v5497_v10, 2 }
0x102b   :  { %1419 = vrot.lane.b32.xlu1 %v1418_v11, %s5124_s28 }
0x109b   :  { %v1527_v14 = vpop.permute.xlu0 %1526 }
0x109c   :  { %4335 = vmatmul.mubr.msk.f32.vlgmr.msra.gmra.mrb[14].mxu0 %vm159_vm3, %v1527_v14 }
0x109d   :  { %4681 = vmatpush3.bf16.msra.mxu0 %v5232_v13  ;;  %4356 = vmatprep.mubr.msk.f32.mxu0 %vm5122_vm2, %v5121_v8  ;;  %v1420_v16 = vpop.permute.xlu1 %1419 }
0x109e   :  { %4682 = vmatprep.subr.bf16.mxu0 %v5120_v3  ;;  %4324 = vmatmul.mubr.msk.f32.vlgmr.msra.gmra.mrb[14].mxu1 %vm159_vm3, %v1420_v16 }
0x109f   :  { %4675 = vmatpush3.bf16.msra.mxu1 %v5206_v4  ;;  %4345 = vmatprep.mubr.msk.f32.mxu1 %vm5122_vm2, %v5121_v8 }
0x10a0   :  { %4676 = vmatprep.subr.bf16.mxu1 %v5120_v3 }
0x10a1   :  { %4684 = vmatpush3.bf16.msra.mxu0 %v5250_v17 }
0x10a2   :  { %4701 = vmatprep.subr.bf16.mxu0 %v5120_v3 }
0x10a3   :  { %4678 = vmatpush3.bf16.msra.mxu1 %v5228_v12 }
0x116f   :  { %v1596_v13 = vpop.f32.mrb[14].mxu0 }
0x1170   :  { %v1601_v18 = vrot.slane %v1596_v13, 6  ;;  %v4336_v21 = vpop.f32.mrb[15].mxu0 }
0x1171   :  { %v1489_v25 = vpop.f32.mrb[14].mxu1 }
0x1172   :  { %v1603_v22 = vadd.f32 %v1601_v18, %v5280_v26  ;;  %v1494_v27 = vrot.slane %v1489_v25, 4  ;;  %v4325_v28 = vpop.f32.mrb[15].mxu1 }
0x1174   :  { %4936 = vtanh.f32 %v1603_v22  ;;  %v1496_v4 = vadd.f32 %v1494_v27, %v5284_v30  ;;  %v3957_v34 = vmul.f32 -1.442695, %v1603_v22 }
0x1176   :  { %4938 = vtanh.f32 %v1496_v4  ;;  %v3955_v12 = vmul.f32 -1.442695, %v1496_v4 }
0x1177   :  { %4940 = vpow2.f32 %v3957_v34 }
0x1178   :  { %4942 = vpow2.f32 %v3955_v12 }
0x117e   :  { %v4937_v31 = vpop.eup %4936 }
0x117f   :  { %1616 = vrot.lane.b32.xlu0 %v4937_v31, %s5123_s4 }
0x1180   :  { %v4939_v17 = vpop.eup %4938 }
0x1181   :  { %1509 = vrot.lane.b32.xlu1 %v4939_v17, %s5123_s4  ;;  %v4941_v36 = vpop.eup %4940 }
0x1182   :  { %v4943_v37 = vpop.eup %4942  ;;  %v1607_v38 = vadd.f32 1.0, %v4941_v36 }
0x1183   :  { %v1500_v39 = vadd.f32 1.0, %v4943_v37 }
0x1184   :  { %4944 = vrcp.f32 %v1607_v38 }
0x1185   :  { %4946 = vrcp.f32 %v1500_v39 }
0x118e   :  { %v4945_v40 = vpop.eup %4944 }
0x118f   :  { %v4947_v44 = vpop.eup %4946  ;;  %v1614_v49 = vmul.f32 %v4945_v40, %v1612_v48 }
0x1190   :  { %v1507_v55 = vmul.f32 %v4947_v44, %v1505_v50  ;;  %v1905_v50 = vld [vmem:[%s6045_s5 + $0x8] sm:$0xff] }
0x11f1   :  { %v1617_v41 = vpop.permute.xlu0 %1616 }
0x11f2   :  { %v1619_v43 = vmul.f32 %v4945_v40, %v1617_v41 }
0x11f3   :  { %v1510_v46 = vpop.permute.xlu1 %1509 }
0x11f4   :  { %1621 = vrot.lane.b32.xlu0 %v1619_v43, %s5124_s28  ;;  %v1512_v47 = vmul.f32 %v4947_v44, %v1510_v46 }
0x11f6   :  { %1514 = vrot.lane.b32.xlu1 %v1512_v47, %s5124_s28 }
0x1266   :  { %v1622_v52 = vpop.permute.xlu0 %1621 }
0x1267   :  { %v1624_v53 = vadd.f32 %v1622_v52, %v1614_v49 }
0x1268   :  { %v1515_v56 = vpop.permute.xlu1 %1514 }
0x1269   :  { %4948 = vtanh.f32 %v1624_v53  ;;  %v1517_v57 = vadd.f32 %v1515_v56, %v1507_v55  ;;  %v1823_v38 = vrot.slane %v1624_v53, 2  ;;  %v1908_v55 = vld [vmem:[%s6045_s5 + $0x20] sm:$0xff]  ;;  %v1910_v56 = vld [vmem:[%s6045_s5 + $0x30] sm:$0xff] }
0x126b   :  { %4950 = vtanh.f32 %v1517_v57  ;;  %v1719_v43 = vrot.slane %v1517_v57, 6  ;;  %v2016_v57 = vld [vmem:[%s6046_s6] sm:$0xff] }
0x1273   :  { %v4949_v58 = vpop.eup %4948 }
0x1274   :  { %1627 = vrot.lane.b32.xlu0 %v4949_v58, %s5123_s4  ;;  %v2017_v58 = vld [vmem:[%s6046_s6 + $0x8] sm:$0xff] }
0x1275   :  { %v4951_v59 = vpop.eup %4950 }
0x1276   :  { %1520 = vrot.lane.b32.xlu1 %v4951_v59, %s5123_s4  ;;  %v1915_v59 = vld [vmem:[%s6045_s5 + $0x58] sm:$0xff] }
0x12e6   :  { %v1628_v60 = vpop.permute.xlu0 %1627 }
0x12e7   :  { %v1630_v62 = vmul.f32 %v4945_v40, %v1628_v60  ;;  %v4691_v60 = vpack.c.bf16 %v1910_v56, %v1908_v55 }
0x12e8   :  { %v1521_v61 = vpop.permute.xlu1 %1520 }
0x12e9   :  { %v1739_v33 = vrot.slane %v1630_v62, 2  ;;  %v5525_v1 = vmul.f32 %v4947_v44, %v1521_v61 }
0x12eb   :  { %1740 = vrot.lane.b32.xlu0 %v1739_v33, %s5124_s28  ;;  %v1632_v0 = vrot.slane %v5525_v1, 4  ;;  %v2018_v33 = vld [vmem:[%s6046_s6 + $0x10] sm:$0xff] }
0x12ed   :  { %1633 = vrot.lane.b32.xlu1 %v1632_v0, %s5124_s28  ;;  %v1912_v0 = vld [vmem:[%s6045_s5 + $0x40] sm:$0xff] }
0x135d   :  { %v1741_v5 = vpop.permute.xlu0 %1740 }
0x135e   :  { %4357 = vmatmul.mubr.msk.f32.vlgmr.msra.gmra.mrb[16].mxu0 %vm159_vm3, %v1741_v5  ;;  %v1914_v5 = vld [vmem:[%s6045_s5 + $0x50] sm:$0xff] }
0x135f   :  { %4367 = vmatprep.mubr.msk.f32.mxu0 %vm5122_vm2, %v5121_v8  ;;  %v1634_v2 = vpop.permute.xlu1 %1633 }
0x1360   :  { %4346 = vmatmul.mubr.msk.f32.vlgmr.msra.gmra.mrb[16].mxu1 %vm159_vm3, %v1634_v2  ;;  %v2019_v2 = vld [vmem:[%s6046_s6 + $0x18] sm:$0xff] }
0x1361   :  { %2003 = vmatprep.mubr.f32.mxu1 %v5121_v8 }
0x1431   :  { %v1810_v7 = vpop.f32.mrb[16].mxu0 }
0x1432   :  { %v1814_v9 = vadd.f32 %v1810_v7, %v5280_v26  ;;  %v4358_v11 = vpop.f32.mrb[17].mxu0  ;;  %v5619_v7 = vpack.c.bf16 %v2019_v2, %v2018_v33 }
0x1433   :  { %v1703_v14 = vpop.f32.mrb[16].mxu1 }
0x1434   :  { %4952 = vtanh.f32 %v1814_v9  ;;  %v1708_v16 = vrot.slane %v1703_v14, 2  ;;  %v4347_v13 = vpop.f32.mrb[17].mxu1  ;;  %v3961_v25 = vmul.f32 -1.442695, %v1814_v9  ;;  %v4695_v9 = vpack.c.bf16 %v1914_v5, %v1912_v0  ;;  %v1916_v14 = vld [vmem:[%s6045_s5 + $0x60] sm:$0xff] }
0x1435   :  { %v2020_v13 = vld [vmem:[%s6047_s7] sm:$0xff] }
0x1436   :  { %v1710_v18 = vadd.f32 %v1708_v16, %v5284_v30 }
0x1438   :  { %4954 = vtanh.f32 %v1710_v18  ;;  %v3959_v27 = vmul.f32 -1.442695, %v1710_v18  ;;  %v2021_v18 = vld [vmem:[%s6047_s7 + $0x8] sm:$0xff] }
0x1439   :  { %4956 = vpow2.f32 %v3961_v25  ;;  %v2023_v25 = vld [vmem:[%s6047_s7 + $0x18] sm:$0xff] }
0x143a   :  { %4958 = vpow2.f32 %v3959_v27 }
0x143e   :  { %v4953_v21 = vpop.eup %4952 }
0x143f   :  { %1827 = vrot.lane.b32.xlu0 %v4953_v21, %s5123_s4  ;;  %v5649_v21 = vpack.c.bf16 %v2021_v18, %v2020_v13 }
0x1442   :  { %v4955_v22 = vpop.eup %4954 }
0x1443   :  { %1723 = vrot.lane.b32.xlu1 %v4955_v22, %s5123_s4  ;;  %v4957_v28 = vpop.eup %4956  ;;  %v2022_v22 = vld [vmem:[%s6047_s7 + $0x10] sm:$0xff] }
0x1444   :  { %v1818_v26 = vadd.f32 1.0, %v4957_v28  ;;  %v4959_v4 = vpop.eup %4958  ;;  %v5660_v27 = vpack.c.bf16 %v2023_v25, %v2022_v22 }
0x1445   :  { %v1714_v31 = vadd.f32 1.0, %v4959_v4 }
0x1446   :  { %4960 = vrcp.f32 %v1818_v26 }
0x1447   :  { %4962 = vrcp.f32 %v1714_v31 }
0x1450   :  { %v5539_v17 = vpop.eup %4960 }
0x1451   :  { %v5543_v12 = vpop.eup %4962  ;;  %v1825_v39 = vmul.f32 %v5539_v17, %v1823_v38 }
0x1452   :  { %v1721_v44 = vmul.f32 %v5543_v12, %v1719_v43 }
0x14b1   :  { %v1828_v30 = vpop.permute.xlu0 %1827 }
0x14b2   :  { %v1830_v34 = vmul.f32 %v5539_v17, %v1828_v30 }
0x14b4   :  { %1832 = vrot.lane.b32.xlu0 %v1830_v34, %s5124_s28 }
0x14b5   :  { %v1724_v36 = vpop.permute.xlu1 %1723 }
0x14b6   :  { %v1726_v37 = vmul.f32 %v5543_v12, %v1724_v36 }
0x14b8   :  { %1728 = vrot.lane.b32.xlu1 %v1726_v37, %s5124_s28 }
0x1526   :  { %v1833_v40 = vpop.permute.xlu0 %1832 }
0x1527   :  { %v1835_v41 = vadd.f32 %v1833_v40, %v1825_v39 }
0x1529   :  { %4964 = vtanh.f32 %v1835_v41 }
0x152a   :  { %v1729_v46 = vpop.permute.xlu1 %1728 }
0x152b   :  { %v1731_v47 = vadd.f32 %v1729_v46, %v1721_v44 }
0x152d   :  { %4966 = vtanh.f32 %v1731_v47 }
0x1533   :  { %v4965_v48 = vpop.eup %4964 }
0x1534   :  { %1838 = vrot.lane.b32.xlu0 %v4965_v48, %s5123_s4 }
0x1537   :  { %v4967_v49 = vpop.eup %4966 }
0x1538   :  { %1851 = vrot.lane.b32.xlu0 %v1630_v62, %s5123_s4  ;;  %1734 = vrot.lane.b32.xlu1 %v4967_v49, %s5123_s4  ;;  %v5602_v62 = vpack.c.bf16 %v2017_v58, %v2016_v57 }
0x153a   :  { %4703 = vmatpush3.bf16.msra.mxu0 %v5602_v62 }
0x153b   :  { %4704 = vmatprep.subr.bf16.mxu0 %v5120_v3 }
0x153c   :  { %1858 = vrot.lane.b32.xlu0 %v5494_v35, %s5123_s4  ;;  %1848 = vrot.lane.b32.xlu1 %v5345_v54, %s5124_s28  ;;  %v1907_v54 = vld [vmem:[%s6045_s5 + $0x18] sm:$0xff] }
0x153d   :  { %v4685_v35 = vpack.c.bf16 %v1907_v54, %v1905_v50 }
0x153e   :  { %4706 = vmatpush3.bf16.msra.mxu0 %v5619_v7 }
0x153f   :  { %4686 = vmatprep.subr.bf16.mxu1 %v4685_v35  ;;  %4707 = vmatprep.subr.bf16.mxu0 %v5120_v3 }
0x1540   :  { %1865 = vrot.lane.b32.xlu0 %v5456_v15, %s5123_s4  ;;  %1855 = vrot.lane.b32.xlu1 %v5383_v45, %s5124_s28  ;;  %v1904_v15 = vld [vmem:[%s6045_s5] sm:$0xff]  ;;  %v1906_v45 = vld [vmem:[%s6045_s5 + $0x10] sm:$0xff] }
0x1541   :  { %v4687_v52 = vpack.c.bf16 %v1906_v45, %v1904_v15  ;;  %4368 = vmatmul.mubr.f32.vlgmr.msra.gmra.mrb[18].mxu0 %v5121_v8 }
0x1542   :  { %4378 = vmatprep.mubr.msk.f32.mxu0 %vm5122_vm2, %v5121_v8  ;;  %4709 = vmatpush3.bf16.msra.mxu0 %v5649_v21 }
0x1543   :  { %4688 = vmatpush1.bf16.msra.mxu1 %v4687_v52  ;;  %4710 = vmatprep.subr.bf16.mxu0 %v5120_v3 }
0x1544   :  { %1874 = vrot.lane.b32.xlu0 %v5497_v10, %s5124_s28  ;;  %1862 = vrot.lane.b32.xlu1 %v5422_v32, %s5124_s28  ;;  %v1909_v32 = vld [vmem:[%s6045_s5 + $0x28] sm:$0xff]  ;;  %v1911_v10 = vld [vmem:[%s6045_s5 + $0x38] sm:$0xff] }
0x1545   :  { %v4689_v53 = vpack.c.bf16 %v1911_v10, %v1909_v32 }
0x1546   :  { %4712 = vmatpush3.bf16.msra.mxu0 %v5660_v27 }
0x1547   :  { %4690 = vmatprep.subr.bf16.mxu1 %v4689_v53  ;;  %4719 = vmatprep.subr.bf16.mxu0 %v5120_v3 }
0x1548   :  { %1870 = vrot.lane.b32.xlu1 %v5418_v29, %s5123_s4  ;;  %v1913_v29 = vld [vmem:[%s6045_s5 + $0x48] sm:$0xff]  ;;  %4692 = vmatpush1.bf16.msra.mxu1 %v4691_v60 }
0x1549   :  { %v4693_v61 = vpack.c.bf16 %v1915_v59, %v1913_v29  ;;  %4379 = vmatmul.mubr.f32.vlgmr.msra.gmra.mrb[20].mxu0 %v5121_v8  ;;  %v1920_v29 = vld [vmem:[%s6048_s8] sm:$0x3]  ;;  %s5125_s8 = smov [#allocation2]  }
0x154a   :  { %4721 = vmatpush3.bf16.msra.mxu0 %v5649_v21  ;;  %4400 = vmatprep.mubr.msk.f32.mxu0 %vm5122_vm2, %v5121_v8  ;;  %v1925_v59 = vrot.slane %v1920_v29, %v52_v23  ;;  %v1929_v60 = vrot.slane %v1920_v29, %v56_v20  ;;  %s3920_s1 = sshll.u32 %s5125_s8, 4  ;;  %s3921_s1 = int_to_ptr.vmem [resolvable:$true] %s3920_s1 }
0x154b   :  { %4694 = vmatprep.subr.bf16.mxu1 %v4693_v61  ;;  %4722 = vmatprep.subr.bf16.mxu0 %v5120_v3  ;;  %p5101_p1 = scmp.lt.s32.totalorder %s3921_s1, %s3921_s1 }
0x154c   :  { %1877 = vrot.lane.b32.xlu1 %v5380_v42, %s5123_s4  ;;  %4696 = vmatpush1.bf16.msra.mxu1 %v4695_v9  ;;  %v1917_v42 = vld [vmem:[%s6045_s5 + $0x68] sm:$0xff] }
0x154e   :  { %4724 = vmatpush3.bf16.msra.mxu0 %v5660_v27 }
0x154f   :  { %4731 = vmatprep.subr.bf16.mxu0 %v5120_v3 }
0x1550   :  { %1884 = vrot.lane.b32.xlu1 %v5342_v51, %s5123_s4  ;;  %v1919_v51 = vld [vmem:[%s6045_s5 + $0x78] sm:$0xff] }
0x1551   :  { %v4697_v11 = vpack.c.bf16 %v1919_v51, %v1917_v42 }
0x1553   :  { %4698 = vmatprep.subr.bf16.mxu1 %v4697_v11 }
0x1554   :  { %1892 = vrot.lane.b32.xlu1 %v5304_v63, %s5123_s4  ;;  %v1918_v63 = vld [vmem:[%s6045_s5 + $0x70] sm:$0xff] }
0x1555   :  { %v4699_v16 = vpack.c.bf16 %v1918_v63, %v1916_v14 }
0x1557   :  { %4700 = vmatpush1.bf16.msra.mxu1 %v4699_v16 }
0x1558   :  { %4713 = vmatprep.subr.bf16.mxu1 %v5120_v3 }
0x15a6   :  { %v1839_v28 = vpop.permute.xlu0 %1838 }
0x15a7   :  { %v1841_v26 = vmul.f32 %v5539_v17, %v1839_v28 }
0x15a9   :  { %1844 = vrot.lane.b32.xlu0 %v1841_v26, %s5123_s4 }
0x15aa   :  { %v1735_v4 = vpop.permute.xlu1 %1734  ;;  %v1852_v30 = vpop.permute.xlu0 %1851 }
0x15ab   :  { %v1737_v31 = vmul.f32 %v5543_v12, %v1735_v4 }
0x15ad   :  { %1881 = vrot.lane.b32.xlu0 %v5525_v1, %s5124_s28 }
0x15ae   :  { %v1849_v17 = vpop.permute.xlu1 %1848  ;;  %v1859_v36 = vpop.permute.xlu0 %1858 }
0x15af   :  { %v1854_v44 = vsel %vm159_vm3, %v1849_v17, %v1852_v30 }
0x15b1   :  { %1889 = vrot.lane.b32.xlu0 %v1737_v31, %s5124_s28 }
0x15b2   :  { %v1856_v34 = vpop.permute.xlu1 %1855  ;;  %v1866_v38 = vpop.permute.xlu0 %1865 }
0x15b3   :  { %v1861_v12 = vsel %vm159_vm3, %v1856_v34, %v1859_v36 }
0x15b6   :  { %v1863_v37 = vpop.permute.xlu1 %1862  ;;  %v1875_v40 = vpop.permute.xlu0 %1874 }
0x15b7   :  { %v1868_v48 = vsel %vm159_vm3, %v1863_v37, %v1866_v38 }
0x15ba   :  { %v1871_v39 = vpop.permute.xlu1 %1870 }
0x15bb   :  { %v1873_v35 = vsel %vm159_vm3, %v5465_v24, %v1871_v39 }
0x15be   :  { %v1878_v41 = vpop.permute.xlu1 %1877 }
0x15bf   :  { %v1880_v15 = vsel %vm159_vm3, %v1875_v40, %v1878_v41 }
0x15c0   :  { %v1901_v45 = vsel %vm1896_vm4, %v1873_v35, %v1880_v15 }
0x15c2   :  { %v1885_v46 = vpop.permute.xlu1 %1884 }
0x15c6   :  { %v1893_v32 = vpop.permute.xlu1 %1892 }
0x1614   :  { %v2090_v56 = vpop.f32.mrb[18].mxu0 }
0x1615   :  { %v4369_v24 = vpop.f32.mrb[19].mxu0 }
0x161b   :  { %v1845_v43 = vpop.permute.xlu0 %1844 }
0x161c   :  { %v1847_v1 = vsel %vm159_vm3, %v5310_v6, %v1845_v43  ;;  %v2185_v57 = vpop.f32.mrb[20].mxu0 }
0x161d   :  { %v1897_v47 = vsel %vm1896_vm4, %v1847_v1, %v1854_v44  ;;  %v4380_v58 = vpop.f32.mrb[21].mxu0  ;;  %v2190_v42 = vrot.slane %v2185_v57, 2 }
0x161e   :  { %v1898_v49 = vsel %vm69_vm0, %v1897_v47, %v1861_v12 }
0x161f   :  { %v1882_v50 = vpop.permute.xlu0 %1881  ;;  %v1900_v54 = vsel %vm1899_vm5, %v1898_v49, %v1868_v48 }
0x1620   :  { %3962 = vmatmul.mubr.msk.f32.vlgmr.msra.gmra.mrb[18].mxu1 %vm1932_vm6, %v1900_v54  ;;  %v1887_v6 = vsel %vm159_vm3, %v1882_v50, %v1885_v46 }
0x1621   :  { %2009 = vmatprep.mubr.f32.mxu1 %v5121_v8  ;;  %4715 = vmatpush3.bf16.msra.mxu1 %v5602_v62  ;;  %v1902_v52 = vsel %vm69_vm0, %v1901_v45, %v1887_v6 }
0x1622   :  { %4716 = vmatprep.subr.bf16.mxu1 %v5120_v3 }
0x1623   :  { %v1890_v10 = vpop.permute.xlu0 %1889 }
0x1624   :  { %v1895_v53 = vsel %vm159_vm3, %v1890_v10, %v1893_v32 }
0x1625   :  { %v1903_v55 = vsel %vm1899_vm5, %v1902_v52, %v1895_v53  ;;  %4718 = vmatpush3.bf16.msra.mxu1 %v5619_v7 }
0x1626   :  { %3963 = vmatmul.mubr.msk.f32.gmra.mrb[20].mxu1 %vm1932_vm6, %v1903_v55  ;;  %4725 = vmatprep.subr.bf16.mxu1 %v5120_v3 }
0x1627   :  { %4389 = vmatprep.mubr.msk.f32.mxu1 %vm5122_vm2, %v5121_v8 }
0x16f3   :  { %v2005_v33 = vpop.f32.mrb[18].mxu1 }
0x16f4   :  { %v5709_v61 = vadd.f32 %v2005_v33, %v1925_v59  ;;  %v2007_v0 = vpop.f32.mrb[19].mxu1 }
0x16f5   :  { %v5711_v5 = vadd.f32 %v2007_v0, %v1929_v60 }
0x16f6   :  { %v2094_v2 = vadd.f32 %v2090_v56, %v5709_v61 }
0x16f8   :  { %4968 = vtanh.f32 %v2094_v2  ;;  %v3964_v63 = vmul.f32 -1.442695, %v2094_v2 }
0x16f9   :  { %v2011_v9 = vpop.f32.mrb[20].mxu1 }
0x16fa   :  { %v5714_v51 = vadd.f32 %v2011_v9, %v1925_v59  ;;  %v2013_v11 = vpop.f32.mrb[21].mxu1 }
0x16fb   :  { %v5716_v14 = vadd.f32 %v2013_v11, %v1929_v60 }
0x16fd   :  { %v2192_v23 = vadd.f32 %v2190_v42, %v5716_v14 }
0x16ff   :  { %4970 = vtanh.f32 %v2192_v23  ;;  %v3965_v16 = vmul.f32 -1.442695, %v2192_v23 }
0x1700   :  { %4972 = vpow2.f32 %v3964_v63 }
0x1701   :  { %4974 = vpow2.f32 %v3965_v16 }
0x1702   :  { %v4969_v19 = vpop.eup %4968 }
0x1703   :  { %2104 = vrot.lane.b32.xlu0 %v4969_v19, %s5123_s4 }
0x1709   :  { %v4971_v20 = vpop.eup %4970 }
0x170a   :  { %2202 = vrot.lane.b32.xlu1 %v4971_v20, %s5123_s4  ;;  %v4973_v13 = vpop.eup %4972 }
0x170b   :  { %v2098_v18 = vadd.f32 1.0, %v4973_v13  ;;  %v4975_v22 = vpop.eup %4974 }
0x170c   :  { %v2196_v25 = vadd.f32 1.0, %v4975_v22 }
0x170d   :  { %4976 = vrcp.f32 %v2098_v18 }
0x170e   :  { %4978 = vrcp.f32 %v2196_v25 }
0x1717   :  { %v4977_v28 = vpop.eup %4976 }
0x1718   :  { %v4979_v31 = vpop.eup %4978  ;;  %v2102_v34 = vmul.f32 0.0, %v4977_v28 }
0x1719   :  { %v2200_v38 = vmul.f32 0.0, %v4979_v31 }
0x1775   :  { %v2105_v26 = vpop.permute.xlu0 %2104 }
0x1776   :  { %v2107_v4 = vmul.f32 %v4977_v28, %v2105_v26 }
0x1778   :  { %2109 = vrot.lane.b32.xlu0 %v2107_v4, %s5124_s28 }
0x177c   :  { %v2203_v17 = vpop.permute.xlu1 %2202 }
0x177d   :  { %v2205_v30 = vmul.f32 %v4979_v31, %v2203_v17 }
0x177f   :  { %2207 = vrot.lane.b32.xlu1 %v2205_v30, %s5124_s28 }
0x17ea   :  { %v2110_v36 = vpop.permute.xlu0 %2109 }
0x17eb   :  { %v5723_v37 = vadd.f32 %v2110_v36, %v2102_v34 }
0x17ed   :  { %4980 = vtanh.f32 %v5723_v37  ;;  %v2304_v42 = vrot.slane %v5723_v37, 6 }
0x17f1   :  { %v2208_v39 = vpop.permute.xlu1 %2207 }
0x17f2   :  { %v5726_v40 = vadd.f32 %v2208_v39, %v2200_v38 }
0x17f4   :  { %4982 = vtanh.f32 %v5726_v40  ;;  %v2411_v20 = vrot.slane %v5726_v40, 2 }
0x17f7   :  { %v4981_v41 = vpop.eup %4980 }
0x17f8   :  { %2115 = vrot.lane.b32.xlu0 %v4981_v41, %s5123_s4 }
0x17fe   :  { %v4983_v43 = vpop.eup %4982 }
0x17ff   :  { %2213 = vrot.lane.b32.xlu1 %v4983_v43, %s5123_s4 }
0x186a   :  { %v2116_v44 = vpop.permute.xlu0 %2115 }
0x186b   :  { %v2118_v1 = vmul.f32 %v4977_v28, %v2116_v44 }
0x186d   :  { %2218 = vrot.lane.b32.xlu0 %v2118_v1, %s5124_s28 }
0x1871   :  { %v2214_v12 = vpop.permute.xlu1 %2213 }
0x1872   :  { %v2216_v46 = vmul.f32 %v4979_v31, %v2214_v12 }
0x1874   :  { %v2324_v47 = vrot.slane %v2216_v46, 6 }
0x1876   :  { %2325 = vrot.lane.b32.xlu1 %v2324_v47, %s5124_s28 }
0x18df   :  { %v2219_v48 = vpop.permute.xlu0 %2218 }
0x18e0   :  { %4390 = vmatmul.mubr.msk.f32.vlgmr.msra.gmra.mrb[22].mxu1 %vm159_vm3, %v2219_v48 }
0x18e1   :  { %4727 = vmatpush3.bf16.msra.mxu1 %v5602_v62  ;;  %4411 = vmatprep.mubr.msk.f32.mxu1 %vm5122_vm2, %v5121_v8 }
0x18e2   :  { %4728 = vmatprep.subr.bf16.mxu1 %v5120_v3 }
0x18e5   :  { %4730 = vmatpush3.bf16.msra.mxu1 %v5619_v7 }
0x18e6   :  { %4737 = vmatprep.subr.bf16.mxu1 %v5120_v3 }
0x18e8   :  { %v2326_v49 = vpop.permute.xlu1 %2325 }
0x18e9   :  { %4401 = vmatmul.mubr.msk.f32.vlgmr.msra.gmra.mrb[22].mxu0 %vm159_vm3, %v2326_v49 }
0x18ea   :  { %4733 = vmatpush3.bf16.msra.mxu0 %v5649_v21  ;;  %4422 = vmatprep.mubr.msk.f32.mxu0 %vm5122_vm2, %v5121_v8 }
0x18eb   :  { %4734 = vmatprep.subr.bf16.mxu0 %v5120_v3 }
0x18ee   :  { %4736 = vmatpush3.bf16.msra.mxu0 %v5660_v27 }
0x18ef   :  { %4743 = vmatprep.subr.bf16.mxu0 %v5120_v3 }
0x19b3   :  { %v2288_v50 = vpop.f32.mrb[22].mxu1 }
0x19b4   :  { %v2293_v54 = vrot.slane %v2288_v50, 6  ;;  %v4391_v15 = vpop.f32.mrb[23].mxu1 }
0x19b6   :  { %v2295_v6 = vadd.f32 %v2293_v54, %v5709_v61 }
0x19b8   :  { %4984 = vtanh.f32 %v2295_v6  ;;  %v3967_v55 = vmul.f32 -1.442695, %v2295_v6 }
0x19bc   :  { %v2395_v35 = vpop.f32.mrb[22].mxu0 }
0x19bd   :  { %v2400_v45 = vrot.slane %v2395_v35, 4  ;;  %v4402_v32 = vpop.f32.mrb[23].mxu0 }
0x19bf   :  { %v2402_v10 = vadd.f32 %v2400_v45, %v5716_v14 }
0x19c1   :  { %4986 = vtanh.f32 %v2402_v10  ;;  %v3969_v56 = vmul.f32 -1.442695, %v2402_v10 }
0x19c2   :  { %v4985_v52 = vpop.eup %4984  ;;  %4988 = vpow2.f32 %v3967_v55 }
0x19c3   :  { %2308 = vrot.lane.b32.xlu0 %v4985_v52, %s5123_s4  ;;  %4990 = vpow2.f32 %v3969_v56 }
0x19cb   :  { %v4987_v53 = vpop.eup %4986 }
0x19cc   :  { %2415 = vrot.lane.b32.xlu1 %v4987_v53, %s5123_s4  ;;  %v4989_v24 = vpop.eup %4988 }
0x19cd   :  { %v2299_v57 = vadd.f32 1.0, %v4989_v24  ;;  %v4991_v58 = vpop.eup %4990 }
0x19ce   :  { %v2406_v29 = vadd.f32 1.0, %v4991_v58 }
0x19cf   :  { %4992 = vrcp.f32 %v2299_v57 }
0x19d0   :  { %4994 = vrcp.f32 %v2406_v29 }
0x19d9   :  { %v4993_v59 = vpop.eup %4992 }
0x19da   :  { %v4995_v0 = vpop.eup %4994  ;;  %v2306_v11 = vmul.f32 %v4993_v59, %v2304_v42 }
0x19db   :  { %v2413_v63 = vmul.f32 %v4995_v0, %v2411_v20 }
0x1a35   :  { %v2309_v60 = vpop.permute.xlu0 %2308 }
0x1a36   :  { %v2311_v33 = vmul.f32 %v4993_v59, %v2309_v60 }
0x1a38   :  { %2313 = vrot.lane.b32.xlu0 %v2311_v33, %s5124_s28 }
0x1a3e   :  { %v2416_v2 = vpop.permute.xlu1 %2415 }
0x1a3f   :  { %v2418_v9 = vmul.f32 %v4995_v0, %v2416_v2 }
0x1a41   :  { %2420 = vrot.lane.b32.xlu1 %v2418_v9, %s5124_s28 }
0x1aaa   :  { %v2314_v23 = vpop.permute.xlu0 %2313 }
0x1aab   :  { %v5754_v19 = vadd.f32 %v2314_v23, %v2306_v11 }
0x1aad   :  { %4996 = vtanh.f32 %v5754_v19  ;;  %v2518_v52 = vrot.slane %v5754_v19, 6 }
0x1ab3   :  { %v2421_v16 = vpop.permute.xlu1 %2420 }
0x1ab4   :  { %v5758_v13 = vadd.f32 %v2421_v16, %v2413_v63 }
0x1ab6   :  { %4998 = vtanh.f32 %v5758_v13  ;;  %v2625_v24 = vrot.slane %v5758_v13, 2 }
0x1ab7   :  { %v4997_v18 = vpop.eup %4996 }
0x1ab8   :  { %2319 = vrot.lane.b32.xlu0 %v4997_v18, %s5123_s4 }
0x1ac0   :  { %v4999_v22 = vpop.eup %4998 }
0x1ac1   :  { %2426 = vrot.lane.b32.xlu1 %v4999_v22, %s5123_s4 }
0x1b2a   :  { %v2320_v25 = vpop.permute.xlu0 %2319 }
0x1b2b   :  { %v2322_v28 = vmul.f32 %v4993_v59, %v2320_v25 }
0x1b2d   :  { %v2431_v26 = vrot.slane %v2322_v28, 2 }
0x1b2f   :  { %2432 = vrot.lane.b32.xlu0 %v2431_v26, %s5124_s28 }
0x1b33   :  { %v2427_v4 = vpop.permute.xlu1 %2426 }
0x1b34   :  { %v2429_v31 = vmul.f32 %v4995_v0, %v2427_v4 }
0x1b36   :  { %v2538_v17 = vrot.slane %v2429_v31, 4 }
0x1b38   :  { %2539 = vrot.lane.b32.xlu1 %v2538_v17, %s5124_s28 }
0x1ba1   :  { %v2433_v30 = vpop.permute.xlu0 %2432 }
0x1ba2   :  { %4412 = vmatmul.mubr.msk.f32.vlgmr.msra.gmra.mrb[24].mxu1 %vm159_vm3, %v2433_v30 }
0x1ba3   :  { %4739 = vmatpush3.bf16.msra.mxu1 %v5602_v62  ;;  %4433 = vmatprep.mubr.msk.f32.mxu1 %vm5122_vm2, %v5121_v8 }
0x1ba4   :  { %4740 = vmatprep.subr.bf16.mxu1 %v5120_v3 }
0x1ba7   :  { %4742 = vmatpush3.bf16.msra.mxu1 %v5619_v7 }
0x1ba8   :  { %4749 = vmatprep.subr.bf16.mxu1 %v5120_v3 }
0x1baa   :  { %v2540_v34 = vpop.permute.xlu1 %2539 }
0x1bab   :  { %4423 = vmatmul.mubr.msk.f32.vlgmr.msra.gmra.mrb[24].mxu0 %vm159_vm3, %v2540_v34 }
0x1bac   :  { %4745 = vmatpush3.bf16.msra.mxu0 %v5649_v21  ;;  %4444 = vmatprep.mubr.msk.f32.mxu0 %vm5122_vm2, %v5121_v8 }
0x1bad   :  { %4746 = vmatprep.subr.bf16.mxu0 %v5120_v3 }
0x1bb0   :  { %4748 = vmatpush3.bf16.msra.mxu0 %v5660_v27 }
0x1bb1   :  { %4755 = vmatprep.subr.bf16.mxu0 %v5120_v3 }
0x1c75   :  { %v2502_v36 = vpop.f32.mrb[24].mxu1 }
0x1c76   :  { %v2507_v37 = vrot.slane %v2502_v36, 4  ;;  %v4413_v38 = vpop.f32.mrb[25].mxu1 }
0x1c78   :  { %v2509_v39 = vadd.f32 %v2507_v37, %v5709_v61 }
0x1c7a   :  { %5000 = vtanh.f32 %v2509_v39  ;;  %v3971_v46 = vmul.f32 -1.442695, %v2509_v39 }
0x1c7e   :  { %v2609_v40 = vpop.f32.mrb[24].mxu0 }
0x1c7f   :  { %v2614_v41 = vrot.slane %v2609_v40, 6  ;;  %v4424_v43 = vpop.f32.mrb[25].mxu0 }
0x1c81   :  { %v2616_v44 = vadd.f32 %v2614_v41, %v5716_v14 }
0x1c83   :  { %5002 = vtanh.f32 %v2616_v44  ;;  %v3973_v47 = vmul.f32 -1.442695, %v2616_v44 }
0x1c84   :  { %v5001_v1 = vpop.eup %5000  ;;  %5004 = vpow2.f32 %v3971_v46 }
0x1c85   :  { %2522 = vrot.lane.b32.xlu0 %v5001_v1, %s5123_s4  ;;  %5006 = vpow2.f32 %v3973_v47 }
0x1c8d   :  { %v5003_v12 = vpop.eup %5002 }
0x1c8e   :  { %2629 = vrot.lane.b32.xlu1 %v5003_v12, %s5123_s4  ;;  %v5005_v48 = vpop.eup %5004 }
0x1c8f   :  { %v2513_v49 = vadd.f32 1.0, %v5005_v48  ;;  %v5007_v50 = vpop.eup %5006 }
0x1c90   :  { %v2620_v54 = vadd.f32 1.0, %v5007_v50 }
0x1c91   :  { %5008 = vrcp.f32 %v2513_v49 }
0x1c92   :  { %5010 = vrcp.f32 %v2620_v54 }
0x1c9b   :  { %v5009_v15 = vpop.eup %5008 }
0x1c9c   :  { %v5011_v45 = vpop.eup %5010  ;;  %v2520_v53 = vmul.f32 %v5009_v15, %v2518_v52 }
0x1c9d   :  { %v2627_v57 = vmul.f32 %v5011_v45, %v2625_v24 }
0x1cf7   :  { %v2523_v6 = vpop.permute.xlu0 %2522 }
0x1cf8   :  { %v2525_v35 = vmul.f32 %v5009_v15, %v2523_v6 }
0x1cfa   :  { %2527 = vrot.lane.b32.xlu0 %v2525_v35, %s5124_s28 }
0x1d00   :  { %v2630_v32 = vpop.permute.xlu1 %2629 }
0x1d01   :  { %v2632_v10 = vmul.f32 %v5011_v45, %v2630_v32 }
0x1d03   :  { %2634 = vrot.lane.b32.xlu1 %v2632_v10, %s5124_s28 }
0x1d6c   :  { %v2528_v55 = vpop.permute.xlu0 %2527 }
0x1d6d   :  { %v5786_v56 = vadd.f32 %v2528_v55, %v2520_v53 }
0x1d6f   :  { %5012 = vtanh.f32 %v5786_v56  ;;  %v2732_v41 = vrot.slane %v5786_v56, 6 }
0x1d75   :  { %v2635_v58 = vpop.permute.xlu1 %2634 }
0x1d76   :  { %v5790_v29 = vadd.f32 %v2635_v58, %v2627_v57 }
0x1d78   :  { %5014 = vtanh.f32 %v5790_v29  ;;  %v2836_v12 = vrot.slane %v5790_v29, 2 }
0x1d79   :  { %v5013_v59 = vpop.eup %5012 }
0x1d7a   :  { %2533 = vrot.lane.b32.xlu0 %v5013_v59, %s5123_s4 }
0x1d82   :  { %v5015_v60 = vpop.eup %5014 }
0x1d83   :  { %2640 = vrot.lane.b32.xlu1 %v5015_v60, %s5123_s4 }
0x1dec   :  { %v2534_v33 = vpop.permute.xlu0 %2533 }
0x1ded   :  { %v2536_v0 = vmul.f32 %v5009_v15, %v2534_v33 }
0x1def   :  { %v2645_v2 = vrot.slane %v2536_v0, 4 }
0x1df1   :  { %2646 = vrot.lane.b32.xlu0 %v2645_v2, %s5124_s28 }
0x1df5   :  { %v2641_v9 = vpop.permute.xlu1 %2640 }
0x1df6   :  { %v2643_v42 = vmul.f32 %v5011_v45, %v2641_v9 }
0x1df8   :  { %v2752_v11 = vrot.slane %v2643_v42, 2 }
0x1dfa   :  { %2753 = vrot.lane.b32.xlu1 %v2752_v11, %s5124_s28 }
0x1e63   :  { %v2647_v23 = vpop.permute.xlu0 %2646 }
0x1e64   :  { %4434 = vmatmul.mubr.msk.f32.vlgmr.msra.gmra.mrb[26].mxu1 %vm159_vm3, %v2647_v23 }
0x1e65   :  { %4751 = vmatpush3.bf16.msra.mxu1 %v5602_v62  ;;  %4455 = vmatprep.mubr.msk.f32.mxu1 %vm5122_vm2, %v5121_v8 }
0x1e66   :  { %4752 = vmatprep.subr.bf16.mxu1 %v5120_v3 }
0x1e69   :  { %4754 = vmatpush3.bf16.msra.mxu1 %v5619_v7 }
0x1e6a   :  { %4761 = vmatprep.subr.bf16.mxu1 %v5120_v3 }
0x1e6c   :  { %v2754_v19 = vpop.permute.xlu1 %2753 }
0x1e6d   :  { %4445 = vmatmul.mubr.msk.f32.vlgmr.msra.gmra.mrb[26].mxu0 %vm159_vm3, %v2754_v19 }
0x1e6e   :  { %4757 = vmatpush3.bf16.msra.mxu0 %v5649_v21  ;;  %4466 = vmatprep.mubr.msk.f32.mxu0 %vm5122_vm2, %v5121_v8 }
0x1e6f   :  { %4758 = vmatprep.subr.bf16.mxu0 %v5120_v3 }
0x1e72   :  { %4760 = vmatpush3.bf16.msra.mxu0 %v5660_v27 }
0x1e73   :  { %4767 = vmatprep.subr.bf16.mxu0 %v5120_v3 }
0x1f37   :  { %v2716_v20 = vpop.f32.mrb[26].mxu1 }
0x1f38   :  { %v2721_v63 = vrot.slane %v2716_v20, 2  ;;  %v4435_v16 = vpop.f32.mrb[27].mxu1 }
0x1f3a   :  { %v2723_v13 = vadd.f32 %v2721_v63, %v5709_v61 }
0x1f3c   :  { %5016 = vtanh.f32 %v2723_v13  ;;  %v3975_v4 = vmul.f32 -1.442695, %v2723_v13 }
0x1f40   :  { %v2823_v18 = vpop.f32.mrb[26].mxu0 }
0x1f41   :  { %v2827_v22 = vadd.f32 %v2823_v18, %v5716_v14  ;;  %v4446_v25 = vpop.f32.mrb[27].mxu0 }
0x1f43   :  { %5018 = vtanh.f32 %v2827_v22  ;;  %v3977_v31 = vmul.f32 -1.442695, %v2827_v22 }
0x1f44   :  { %5020 = vpow2.f32 %v3975_v4 }
0x1f45   :  { %5022 = vpow2.f32 %v3977_v31 }
0x1f46   :  { %v5017_v28 = vpop.eup %5016 }
0x1f47   :  { %2736 = vrot.lane.b32.xlu0 %v5017_v28, %s5123_s4 }
0x1f4d   :  { %v5019_v26 = vpop.eup %5018 }
0x1f4e   :  { %2840 = vrot.lane.b32.xlu1 %v5019_v26, %s5123_s4  ;;  %v5021_v17 = vpop.eup %5020 }
0x1f4f   :  { %v2727_v30 = vadd.f32 1.0, %v5021_v17  ;;  %v5023_v34 = vpop.eup %5022 }
0x1f50   :  { %v2831_v61 = vadd.f32 1.0, %v5023_v34 }
0x1f51   :  { %5024 = vrcp.f32 %v2727_v30 }
0x1f52   :  { %5026 = vrcp.f32 %v2831_v61 }
0x1f5b   :  { %v5025_v36 = vpop.eup %5024 }
0x1f5c   :  { %v5027_v38 = vpop.eup %5026  ;;  %v2734_v43 = vmul.f32 %v5025_v36, %v2732_v41 }
0x1f5d   :  { %v2838_v46 = vmul.f32 %v5027_v38, %v2836_v12 }
0x1fb9   :  { %v2737_v14 = vpop.permute.xlu0 %2736 }
0x1fba   :  { %v2739_v37 = vmul.f32 %v5025_v36, %v2737_v14 }
0x1fbc   :  { %2741 = vrot.lane.b32.xlu0 %v2739_v37, %s5124_s28 }
0x1fc0   :  { %v2841_v39 = vpop.permute.xlu1 %2840 }
0x1fc1   :  { %v2843_v40 = vmul.f32 %v5027_v38, %v2841_v39 }
0x1fc3   :  { %2845 = vrot.lane.b32.xlu1 %v2843_v40, %s5124_s28 }
0x202e   :  { %v2742_v44 = vpop.permute.xlu0 %2741 }
0x202f   :  { %v5818_v1 = vadd.f32 %v2742_v44, %v2734_v43 }
0x2031   :  { %5028 = vtanh.f32 %v5818_v1  ;;  %v2940_v13 = vrot.slane %v5818_v1, 6 }
0x2035   :  { %v2846_v47 = vpop.permute.xlu1 %2845 }
0x2036   :  { %v5822_v48 = vadd.f32 %v2846_v47, %v2838_v46 }
0x2038   :  { %5030 = vtanh.f32 %v5822_v48  ;;  %v3046_v28 = vrot.slane %v5822_v48, 2 }
0x203b   :  { %v5029_v49 = vpop.eup %5028 }
0x203c   :  { %2747 = vrot.lane.b32.xlu0 %v5029_v49, %s5123_s4 }
0x2042   :  { %v5031_v50 = vpop.eup %5030 }
0x2043   :  { %2851 = vrot.lane.b32.xlu1 %v5031_v50, %s5123_s4 }
0x20ae   :  { %v2748_v54 = vpop.permute.xlu0 %2747 }
0x20af   :  { %v2750_v15 = vmul.f32 %v5025_v36, %v2748_v54 }
0x20b1   :  { %v2856_v6 = vrot.slane %v2750_v15, 6 }
0x20b3   :  { %2857 = vrot.lane.b32.xlu1 %v2856_v6, %s5124_s28 }
0x20b5   :  { %v2852_v35 = vpop.permute.xlu1 %2851 }
0x20b6   :  { %v2854_v45 = vmul.f32 %v5027_v38, %v2852_v35 }
0x20b8   :  { %2960 = vrot.lane.b32.xlu0 %v2854_v45, %s5124_s28 }
0x2125   :  { %v2858_v32 = vpop.permute.xlu1 %2857 }
0x2126   :  { %4456 = vmatmul.mubr.msk.f32.vlgmr.msra.gmra.mrb[28].mxu1 %vm159_vm3, %v2858_v32 }
0x2127   :  { %4763 = vmatpush3.bf16.msra.mxu1 %v5602_v62  ;;  %4477 = vmatprep.mubr.msk.f32.mxu1 %vm5122_vm2, %v5121_v8 }
0x2128   :  { %4764 = vmatprep.subr.bf16.mxu1 %v5120_v3 }
0x212a   :  { %v2961_v10 = vpop.permute.xlu0 %2960 }
0x212b   :  { %4467 = vmatmul.mubr.msk.f32.vlgmr.msra.gmra.mrb[28].mxu0 %vm159_vm3, %v2961_v10  ;;  %4766 = vmatpush3.bf16.msra.mxu1 %v5619_v7 }
0x212c   :  { %4769 = vmatpush3.bf16.msra.mxu0 %v5649_v21  ;;  %4488 = vmatprep.mubr.msk.f32.mxu0 %vm5122_vm2, %v5121_v8 }
0x212d   :  { %4770 = vmatprep.subr.bf16.mxu0 %v5120_v3  ;;  %4773 = vmatprep.subr.bf16.mxu1 %v5120_v3 }
0x2130   :  { %4772 = vmatpush3.bf16.msra.mxu0 %v5660_v27 }
0x2131   :  { %4779 = vmatprep.subr.bf16.mxu0 %v5120_v3 }
0x21f9   :  { %v2927_v52 = vpop.f32.mrb[28].mxu1 }
0x21fa   :  { %v2931_v53 = vadd.f32 %v2927_v52, %v5714_v51  ;;  %v4457_v55 = vpop.f32.mrb[29].mxu1 }
0x21fc   :  { %5032 = vtanh.f32 %v2931_v53  ;;  %v3979_v60 = vmul.f32 -1.442695, %v2931_v53 }
0x21fe   :  { %v3030_v56 = vpop.f32.mrb[28].mxu0 }
0x21ff   :  { %v3035_v24 = vrot.slane %v3030_v56, 2  ;;  %v4468_v57 = vpop.f32.mrb[29].mxu0 }
0x2201   :  { %v3037_v58 = vadd.f32 %v3035_v24, %v5711_v5 }
0x2203   :  { %5034 = vtanh.f32 %v3037_v58  ;;  %v3981_v33 = vmul.f32 -1.442695, %v3037_v58 }
0x2204   :  { %5036 = vpow2.f32 %v3979_v60 }
0x2205   :  { %5038 = vpow2.f32 %v3981_v33 }
0x2206   :  { %v5033_v29 = vpop.eup %5032 }
0x2207   :  { %2944 = vrot.lane.b32.xlu0 %v5033_v29, %s5123_s4 }
0x220d   :  { %v5035_v59 = vpop.eup %5034 }
0x220e   :  { %3050 = vrot.lane.b32.xlu1 %v5035_v59, %s5123_s4  ;;  %v5037_v0 = vpop.eup %5036 }
0x220f   :  { %v2935_v2 = vadd.f32 1.0, %v5037_v0  ;;  %v5039_v9 = vpop.eup %5038 }
0x2210   :  { %v3041_v42 = vadd.f32 1.0, %v5039_v9 }
0x2211   :  { %5040 = vrcp.f32 %v2935_v2 }
0x2212   :  { %5042 = vrcp.f32 %v3041_v42 }
0x221b   :  { %v5041_v11 = vpop.eup %5040 }
0x221c   :  { %v5043_v20 = vpop.eup %5042  ;;  %v2942_v18 = vmul.f32 %v5041_v11, %v2940_v13 }
0x221d   :  { %v3048_v26 = vmul.f32 %v5043_v20, %v3046_v28 }
0x2279   :  { %v2945_v23 = vpop.permute.xlu0 %2944 }
0x227a   :  { %v2947_v19 = vmul.f32 %v5041_v11, %v2945_v23 }
0x227c   :  { %2949 = vrot.lane.b32.xlu0 %v2947_v19, %s5124_s28 }
0x2280   :  { %v3051_v63 = vpop.permute.xlu1 %3050 }
0x2281   :  { %v3053_v16 = vmul.f32 %v5043_v20, %v3051_v63 }
0x2283   :  { %3055 = vrot.lane.b32.xlu1 %v3053_v16, %s5124_s28 }
0x22ee   :  { %v2950_v22 = vpop.permute.xlu0 %2949 }
0x22ef   :  { %v5850_v25 = vadd.f32 %v2950_v22, %v2942_v18 }
0x22f1   :  { %5044 = vtanh.f32 %v5850_v25  ;;  %v3152_v24 = vrot.slane %v5850_v25, 6 }
0x22f5   :  { %v3056_v4 = vpop.permute.xlu1 %3055 }
0x22f6   :  { %v5854_v31 = vadd.f32 %v3056_v4, %v3048_v26 }
0x22f8   :  { %5046 = vtanh.f32 %v5854_v31  ;;  %v3259_v59 = vrot.slane %v5854_v31, 2 }
0x22fb   :  { %v5045_v17 = vpop.eup %5044 }
0x22fc   :  { %2955 = vrot.lane.b32.xlu0 %v5045_v17, %s5123_s4 }
0x2302   :  { %v5047_v30 = vpop.eup %5046 }
0x2303   :  { %3061 = vrot.lane.b32.xlu1 %v5047_v30, %s5123_s4 }
0x236e   :  { %v2956_v34 = vpop.permute.xlu0 %2955 }
0x236f   :  { %v2958_v61 = vmul.f32 %v5041_v11, %v2956_v34 }
0x2371   :  { %3066 = vrot.lane.b32.xlu0 %v2958_v61, %s5124_s28 }
0x2375   :  { %v3062_v36 = vpop.permute.xlu1 %3061 }
0x2376   :  { %v3064_v14 = vmul.f32 %v5043_v20, %v3062_v36 }
0x2378   :  { %v3172_v37 = vrot.slane %v3064_v14, 6 }
0x237a   :  { %3173 = vrot.lane.b32.xlu1 %v3172_v37, %s5124_s28 }
0x23e3   :  { %v3067_v38 = vpop.permute.xlu0 %3066 }
0x23e4   :  { %4478 = vmatmul.mubr.msk.f32.vlgmr.msra.gmra.mrb[30].mxu1 %vm159_vm3, %v3067_v38 }
0x23e5   :  { %4775 = vmatpush3.bf16.msra.mxu1 %v5602_v62  ;;  %4499 = vmatprep.mubr.msk.f32.mxu1 %vm5122_vm2, %v5121_v8 }
0x23e6   :  { %4776 = vmatprep.subr.bf16.mxu1 %v5120_v3 }
0x23e9   :  { %4778 = vmatpush3.bf16.msra.mxu1 %v5619_v7 }
0x23ea   :  { %4785 = vmatprep.subr.bf16.mxu1 %v5120_v3 }
0x23ec   :  { %v3174_v39 = vpop.permute.xlu1 %3173 }
0x23ed   :  { %4489 = vmatmul.mubr.msk.f32.vlgmr.msra.gmra.mrb[30].mxu0 %vm159_vm3, %v3174_v39 }
0x23ee   :  { %4781 = vmatpush3.bf16.msra.mxu0 %v5649_v21  ;;  %4510 = vmatprep.mubr.msk.f32.mxu0 %vm5122_vm2, %v5121_v8 }
0x23ef   :  { %4782 = vmatprep.subr.bf16.mxu0 %v5120_v3 }
0x23f2   :  { %4784 = vmatpush3.bf16.msra.mxu0 %v5660_v27 }
0x23f3   :  { %4791 = vmatprep.subr.bf16.mxu0 %v5120_v3 }
0x24b7   :  { %v3136_v40 = vpop.f32.mrb[30].mxu1 }
0x24b8   :  { %v3141_v41 = vrot.slane %v3136_v40, 6  ;;  %v4479_v43 = vpop.f32.mrb[31].mxu1 }
0x24ba   :  { %v3143_v44 = vadd.f32 %v3141_v41, %v5714_v51 }
0x24bc   :  { %5048 = vtanh.f32 %v3143_v44  ;;  %v3983_v50 = vmul.f32 -1.442695, %v3143_v44 }
0x24c0   :  { %v3243_v1 = vpop.f32.mrb[30].mxu0 }
0x24c1   :  { %v3248_v12 = vrot.slane %v3243_v1, 4  ;;  %v4490_v46 = vpop.f32.mrb[31].mxu0 }
0x24c3   :  { %v3250_v47 = vadd.f32 %v3248_v12, %v5711_v5 }
0x24c5   :  { %5050 = vtanh.f32 %v3250_v47  ;;  %v3985_v54 = vmul.f32 -1.442695, %v3250_v47 }
0x24c6   :  { %v5049_v48 = vpop.eup %5048  ;;  %5052 = vpow2.f32 %v3983_v50 }
0x24c7   :  { %3156 = vrot.lane.b32.xlu0 %v5049_v48, %s5123_s4  ;;  %5054 = vpow2.f32 %v3985_v54 }
0x24cf   :  { %v5051_v49 = vpop.eup %5050 }
0x24d0   :  { %3263 = vrot.lane.b32.xlu1 %v5051_v49, %s5123_s4  ;;  %v5053_v15 = vpop.eup %5052 }
0x24d1   :  { %v3147_v6 = vadd.f32 1.0, %v5053_v15  ;;  %v5055_v35 = vpop.eup %5054 }
0x24d2   :  { %v3254_v45 = vadd.f32 1.0, %v5055_v35 }
0x24d3   :  { %5056 = vrcp.f32 %v3147_v6 }
0x24d4   :  { %5058 = vrcp.f32 %v3254_v45 }
0x24dd   :  { %v5057_v32 = vpop.eup %5056 }
0x24de   :  { %v5059_v53 = vpop.eup %5058  ;;  %v3154_v57 = vmul.f32 %v5057_v32, %v3152_v24 }
0x24df   :  { %v3261_v60 = vmul.f32 %v5059_v53, %v3259_v59 }
0x2539   :  { %v3157_v10 = vpop.permute.xlu0 %3156 }
0x253a   :  { %v3159_v52 = vmul.f32 %v5057_v32, %v3157_v10 }
0x253c   :  { %3161 = vrot.lane.b32.xlu0 %v3159_v52, %s5124_s28 }
0x2542   :  { %v3264_v55 = vpop.permute.xlu1 %3263 }
0x2543   :  { %v3266_v56 = vmul.f32 %v5059_v53, %v3264_v55 }
0x2545   :  { %3268 = vrot.lane.b32.xlu1 %v3266_v56, %s5124_s28 }
0x25ae   :  { %v3162_v58 = vpop.permute.xlu0 %3161 }
0x25af   :  { %v5882_v29 = vadd.f32 %v3162_v58, %v3154_v57 }
0x25b1   :  { %5060 = vtanh.f32 %v5882_v29  ;;  %v3366_v43 = vrot.slane %v5882_v29, 6 }
0x25b7   :  { %v3269_v33 = vpop.permute.xlu1 %3268 }
0x25b8   :  { %v5886_v0 = vadd.f32 %v3269_v33, %v3261_v60 }
0x25ba   :  { %5062 = vtanh.f32 %v5886_v0  ;;  %v3473_v46 = vrot.slane %v5886_v0, 2 }
0x25bb   :  { %v5061_v2 = vpop.eup %5060 }
0x25bc   :  { %3167 = vrot.lane.b32.xlu0 %v5061_v2, %s5123_s4 }
0x25c4   :  { %v5063_v9 = vpop.eup %5062 }
0x25c5   :  { %3274 = vrot.lane.b32.xlu1 %v5063_v9, %s5123_s4 }
0x262e   :  { %v3168_v42 = vpop.permute.xlu0 %3167 }
0x262f   :  { %v3170_v11 = vmul.f32 %v5057_v32, %v3168_v42 }
0x2631   :  { %v3279_v23 = vrot.slane %v3170_v11, 2 }
0x2633   :  { %3280 = vrot.lane.b32.xlu0 %v3279_v23, %s5124_s28 }
0x2637   :  { %v3275_v19 = vpop.permute.xlu1 %3274 }
0x2638   :  { %v3277_v20 = vmul.f32 %v5059_v53, %v3275_v19 }
0x263a   :  { %v3386_v63 = vrot.slane %v3277_v20, 4 }
0x263c   :  { %3387 = vrot.lane.b32.xlu1 %v3386_v63, %s5124_s28 }
0x26a5   :  { %v3281_v16 = vpop.permute.xlu0 %3280 }
0x26a6   :  { %4500 = vmatmul.mubr.msk.f32.vlgmr.msra.gmra.mrb[32].mxu1 %vm159_vm3, %v3281_v16 }
0x26a7   :  { %4787 = vmatpush3.bf16.msra.mxu1 %v5602_v62  ;;  %4521 = vmatprep.mubr.msk.f32.mxu1 %vm5122_vm2, %v5121_v8 }
0x26a8   :  { %4788 = vmatprep.subr.bf16.mxu1 %v5120_v3 }
0x26ab   :  { %4790 = vmatpush3.bf16.msra.mxu1 %v5619_v7 }
0x26ac   :  { %4797 = vmatprep.subr.bf16.mxu1 %v5120_v3 }
0x26ae   :  { %v3388_v13 = vpop.permute.xlu1 %3387 }
0x26af   :  { %4511 = vmatmul.mubr.msk.f32.vlgmr.msra.gmra.mrb[32].mxu0 %vm159_vm3, %v3388_v13 }
0x26b0   :  { %4793 = vmatpush3.bf16.msra.mxu0 %v5649_v21  ;;  %4532 = vmatprep.mubr.msk.f32.mxu0 %vm5122_vm2, %v5121_v8 }
0x26b1   :  { %4794 = vmatprep.subr.bf16.mxu0 %v5120_v3 }
0x26b4   :  { %4796 = vmatpush3.bf16.msra.mxu0 %v5660_v27 }
0x26b5   :  { %4809 = vmatprep.subr.bf16.mxu0 %v5120_v3 }
0x2779   :  { %v3350_v62 = vpop.f32.mrb[32].mxu1 }
0x277a   :  { %v3355_v18 = vrot.slane %v3350_v62, 4  ;;  %v4501_v22 = vpop.f32.mrb[33].mxu1 }
0x277c   :  { %v3357_v7 = vadd.f32 %v3355_v18, %v5714_v51 }
0x277e   :  { %5064 = vtanh.f32 %v3357_v7  ;;  %v3987_v27 = vmul.f32 -1.442695, %v3357_v7 }
0x2782   :  { %v3457_v25 = vpop.f32.mrb[32].mxu0 }
0x2783   :  { %v3462_v28 = vrot.slane %v3457_v25, 6  ;;  %v4512_v26 = vpop.f32.mrb[33].mxu0 }
0x2785   :  { %v3464_v21 = vadd.f32 %v3462_v28, %v5711_v5 }
0x2787   :  { %5066 = vtanh.f32 %v3464_v21  ;;  %v3989_v17 = vmul.f32 -1.442695, %v3464_v21 }
0x2788   :  { %v5065_v4 = vpop.eup %5064  ;;  %5068 = vpow2.f32 %v3987_v27 }
0x2789   :  { %3370 = vrot.lane.b32.xlu0 %v5065_v4, %s5123_s4  ;;  %5070 = vpow2.f32 %v3989_v17  ;;  %v3730_v4 = vld [vmem:[%s6049_s9] sm:$0xff]  ;;  %v3732_v17 = vld [vmem:[%s6049_s9 + $0x10] sm:$0xff] }
0x2791   :  { %v5067_v31 = vpop.eup %5066 }
0x2792   :  { %3477 = vrot.lane.b32.xlu1 %v5067_v31, %s5123_s4  ;;  %v5069_v30 = vpop.eup %5068  ;;  %v3731_v31 = vld [vmem:[%s6049_s9 + $0x8] sm:$0xff] }
0x2793   :  { %v3361_v34 = vadd.f32 1.0, %v5069_v30  ;;  %v5071_v61 = vpop.eup %5070  ;;  %v4798_v27 = vpack.c.bf16 %v3731_v31, %v3730_v4  ;;  %v3733_v30 = vld [vmem:[%s6049_s9 + $0x18] sm:$0xff] }
0x2794   :  { %v3468_v36 = vadd.f32 1.0, %v5071_v61  ;;  %v3734_v61 = vld [vmem:[%s6049_s9 + $0x20] sm:$0xff] }
0x2795   :  { %5072 = vrcp.f32 %v3361_v34  ;;  %v4801_v34 = vpack.c.bf16 %v3733_v30, %v3732_v17 }
0x2796   :  { %5074 = vrcp.f32 %v3468_v36  ;;  %v3735_v36 = vld [vmem:[%s6049_s9 + $0x28] sm:$0xff] }
0x279f   :  { %v5073_v14 = vpop.eup %5072 }
0x27a0   :  { %v5075_v39 = vpop.eup %5074  ;;  %v3368_v44 = vmul.f32 %v5073_v14, %v3366_v43 }
0x27a1   :  { %v3475_v47 = vmul.f32 %v5075_v39, %v3473_v46 }
0x27fb   :  { %v3371_v37 = vpop.permute.xlu0 %3370 }
0x27fc   :  { %v3373_v38 = vmul.f32 %v5073_v14, %v3371_v37 }
0x27fe   :  { %3375 = vrot.lane.b32.xlu0 %v3373_v38, %s5124_s28  ;;  %v3736_v38 = vld [vmem:[%s6049_s9 + $0x30] sm:$0xff] }
0x2804   :  { %v3478_v40 = vpop.permute.xlu1 %3477 }
0x2805   :  { %v3480_v41 = vmul.f32 %v5075_v39, %v3478_v40 }
0x2807   :  { %3482 = vrot.lane.b32.xlu1 %v3480_v41, %s5124_s28 }
0x2870   :  { %v3376_v1 = vpop.permute.xlu0 %3375 }
0x2871   :  { %v3378_v12 = vadd.f32 %v3376_v1, %v3368_v44  ;;  %v3819_v44 = vld [vmem:[%s6051_s11] sm:$0xff]  ;;  %v3820_v1 = vld [vmem:[%s6051_s11 + $0x8] sm:$0xff] }
0x2872   :  { %v4810_v46 = vpack.c.bf16 %v3820_v1, %v3819_v44 }
0x2873   :  { %5076 = vtanh.f32 %v3378_v12  ;;  %v3580_v16 = vrot.slane %v3378_v12, 6  ;;  %v3821_v12 = vld [vmem:[%s6051_s11 + $0x10] sm:$0xff] }
0x2879   :  { %v3483_v48 = vpop.permute.xlu1 %3482 }
0x287a   :  { %v3485_v49 = vadd.f32 %v3483_v48, %v3475_v47  ;;  %v3822_v47 = vld [vmem:[%s6051_s11 + $0x18] sm:$0xff] }
0x287c   :  { %5078 = vtanh.f32 %v3485_v49  ;;  %v3684_v22 = vrot.slane %v3485_v49, 2 }
0x287d   :  { %v5077_v50 = vpop.eup %5076 }
0x287e   :  { %3381 = vrot.lane.b32.xlu0 %v5077_v50, %s5123_s4  ;;  %v4813_v50 = vpack.c.bf16 %v3822_v47, %v3821_v12 }
0x2886   :  { %v5079_v54 = vpop.eup %5078 }
0x2887   :  { %3488 = vrot.lane.b32.xlu1 %v5079_v54, %s5123_s4  ;;  %v3823_v54 = vld [vmem:[%s6051_s11 + $0x20] sm:$0xff] }
0x28f0   :  { %v3382_v15 = vpop.permute.xlu0 %3381 }
0x28f1   :  { %v3384_v6 = vmul.f32 %v5073_v14, %v3382_v15  ;;  %v4804_v14 = vpack.c.bf16 %v3735_v36, %v3734_v61  ;;  %v3824_v15 = vld [vmem:[%s6051_s11 + $0x28] sm:$0xff] }
0x28f3   :  { %v3493_v35 = vrot.slane %v3384_v6, 4 }
0x28f5   :  { %3494 = vrot.lane.b32.xlu0 %v3493_v35, %s5124_s28  ;;  %v4816_v35 = vpack.c.bf16 %v3824_v15, %v3823_v54 }
0x28f9   :  { %v3489_v45 = vpop.permute.xlu1 %3488 }
0x28fa   :  { %v3491_v32 = vmul.f32 %v5075_v39, %v3489_v45  ;;  %v3737_v39 = vld [vmem:[%s6049_s9 + $0x38] sm:$0xff]  ;;  %v3825_v45 = vld [vmem:[%s6051_s11 + $0x30] sm:$0xff] }
0x28fb   :  { %v4807_v41 = vpack.c.bf16 %v3737_v39, %v3736_v38 }
0x28fc   :  { %v3600_v10 = vrot.slane %v3491_v32, 2  ;;  %v3826_v32 = vld [vmem:[%s6051_s11 + $0x38] sm:$0xff] }
0x28fe   :  { %3601 = vrot.lane.b32.xlu1 %v3600_v10, %s5124_s28  ;;  %v4819_v10 = vpack.c.bf16 %v3826_v32, %v3825_v45 }
0x2967   :  { %v3495_v52 = vpop.permute.xlu0 %3494 }
0x2968   :  { %4522 = vmatmul.mubr.msk.f32.vlgmr.msra.gmra.mrb[34].mxu1 %vm159_vm3, %v3495_v52  ;;  %v3827_v52 = vld [vmem:[%s6051_s11 + $0x40] sm:$0xff] }
0x2969   :  { %4551 = vmatprep.mubr.msk.f32.mxu1 %vm5122_vm2, %v5121_v8  ;;  %4799 = vmatpush3.bf16.msra.mxu1 %v4798_v27 }
0x296a   :  { %4800 = vmatprep.subr.bf16.mxu1 %v5120_v3 }
0x296d   :  { %4802 = vmatpush3.bf16.msra.mxu1 %v4801_v34 }
0x296e   :  { %4803 = vmatprep.subr.bf16.mxu1 %v5120_v3 }
0x2970   :  { %v3602_v53 = vpop.permute.xlu1 %3601 }
0x2971   :  { %4533 = vmatmul.mubr.msk.f32.vlgmr.msra.gmra.mrb[34].mxu0 %vm159_vm3, %v3602_v53  ;;  %4805 = vmatpush3.bf16.msra.mxu1 %v4804_v14  ;;  %v3828_v53 = vld [vmem:[%s6051_s11 + $0x48] sm:$0xff] }
0x2972   :  { %4586 = vmatprep.mubr.msk.f32.mxu0 %vm5122_vm2, %v5121_v8  ;;  %4806 = vmatprep.subr.bf16.mxu1 %v5120_v3 }
0x2973   :  { %4811 = vmatpush3.bf16.msra.mxu0 %v4810_v46 }
0x2974   :  { %4812 = vmatprep.subr.bf16.mxu0 %v5120_v3 }
0x2975   :  { %4808 = vmatpush3.bf16.msra.mxu1 %v4807_v41 }
0x2977   :  { %4814 = vmatpush3.bf16.msra.mxu0 %v4813_v50 }
0x2978   :  { %4815 = vmatprep.subr.bf16.mxu0 %v5120_v3 }
0x297b   :  { %4817 = vmatpush3.bf16.msra.mxu0 %v4816_v35 }
0x297c   :  { %4818 = vmatprep.subr.bf16.mxu0 %v5120_v3 }
0x297f   :  { %4820 = vmatpush3.bf16.msra.mxu0 %v4819_v10 }
0x2980   :  { %4821 = vmatprep.subr.bf16.mxu0 %v5120_v3 }
0x2a3b   :  { %v3564_v55 = vpop.f32.mrb[34].mxu1 }
0x2a3c   :  { %v3569_v56 = vrot.slane %v3564_v55, 2  ;;  %v4523_v24 = vpop.f32.mrb[35].mxu1  ;;  %v4822_v55 = vpack.c.bf16 %v3828_v53, %v3827_v52 }
0x2a3d   :  { %v3830_v24 = vld [vmem:[%s6051_s11 + $0x58] sm:$0xff] }
0x2a3e   :  { %v3571_v57 = vadd.f32 %v3569_v56, %v5714_v51  ;;  %v3829_v56 = vld [vmem:[%s6051_s11 + $0x50] sm:$0xff]  ;;  %4823 = vmatpush3.bf16.msra.mxu0 %v4822_v55 }
0x2a3f   :  { %4824 = vmatprep.subr.bf16.mxu0 %v5120_v3 }
0x2a40   :  { %5080 = vtanh.f32 %v3571_v57  ;;  %v3991_v0 = vmul.f32 -1.442695, %v3571_v57  ;;  %v4825_v57 = vpack.c.bf16 %v3830_v24, %v3829_v56 }
0x2a42   :  { %4826 = vmatpush3.bf16.msra.mxu0 %v4825_v57 }
0x2a43   :  { %4827 = vmatprep.subr.bf16.mxu0 %v5120_v3 }
0x2a44   :  { %v3671_v58 = vpop.f32.mrb[34].mxu0 }
0x2a45   :  { %v3675_v29 = vadd.f32 %v3671_v58, %v5711_v5  ;;  %v4534_v59 = vpop.f32.mrb[35].mxu0  ;;  %v3831_v58 = vld [vmem:[%s6051_s11 + $0x60] sm:$0xff] }
0x2a47   :  { %5082 = vtanh.f32 %v3675_v29  ;;  %v3993_v8 = vmul.f32 -1.442695, %v3675_v29  ;;  %v3832_v29 = vld [vmem:[%s6051_s11 + $0x68] sm:$0xff] }
0x2a48   :  { %5084 = vpow2.f32 %v3991_v0  ;;  %v4828_v59 = vpack.c.bf16 %v3832_v29, %v3831_v58 }
0x2a49   :  { %5086 = vpow2.f32 %v3993_v8 }
0x2a4a   :  { %v5081_v60 = vpop.eup %5080  ;;  %4829 = vmatpush3.bf16.msra.mxu0 %v4828_v59 }
0x2a4b   :  { %3584 = vrot.lane.b32.xlu0 %v5081_v60, %s5123_s4  ;;  %4830 = vmatprep.subr.bf16.mxu0 %v5120_v3  ;;  %v3834_v3 = vld [vmem:[%s6051_s11 + $0x78] sm:$0xff] }
0x2a51   :  { %v5083_v33 = vpop.eup %5082 }
0x2a52   :  { %3688 = vrot.lane.b32.xlu1 %v5083_v33, %s5123_s4  ;;  %v5085_v2 = vpop.eup %5084 }
0x2a53   :  { %v3575_v9 = vadd.f32 1.0, %v5085_v2  ;;  %v5087_v42 = vpop.eup %5086 }
0x2a54   :  { %v3679_v51 = vadd.f32 1.0, %v5087_v42 }
0x2a55   :  { %5088 = vrcp.f32 %v3575_v9 }
0x2a56   :  { %5090 = vrcp.f32 %v3679_v51 }
0x2a5f   :  { %v5089_v11 = vpop.eup %5088 }
0x2a60   :  { %v5091_v19 = vpop.eup %5090  ;;  %v3582_v13 = vmul.f32 %v5089_v11, %v3580_v16 }
0x2a61   :  { %v3686_v7 = vmul.f32 %v5091_v19, %v3684_v22 }
0x2abd   :  { %v3585_v5 = vpop.permute.xlu0 %3584 }
0x2abe   :  { %v3587_v23 = vmul.f32 %v5089_v11, %v3585_v5 }
0x2ac0   :  { %3589 = vrot.lane.b32.xlu0 %v3587_v23, %s5124_s28  ;;  %v3833_v23 = vld [vmem:[%s6051_s11 + $0x70] sm:$0xff]  ;;  %s5096_s11 = scalar_lea.vmem %s3921_s1, 32 }
0x2ac1   :  { %p5097_p0 = scmp.ne.s32.totalorder %s3921_s1, %s5096_s11  ;;  %p5102_p2 = scmp.lt.s32.totalorder %s5096_s11, %s5096_s11 }
0x2ac3   :  { %p5103_p3 = por %p5102_p2, %p5101_p1 }
0x2ac4   :  { %v3689_v20 = vpop.permute.xlu1 %3688 }
0x2ac5   :  { %v3691_v63 = vmul.f32 %v5091_v19, %v3689_v20  ;;  %v3994_v20 = vld [vmem:[%s6050_s10] ss:$0 sm:$0xff]  ;;  %p5104_p4 = pnand %p5103_p3, %p5097_p0 }
0x2ac7   :  { %3693 = vrot.lane.b32.xlu1 %v3691_v63, %s5124_s28 }
0x2b32   :  { %v3590_v62 = vpop.permute.xlu0 %3589 }
0x2b33   :  { %v3592_v18 = vadd.f32 %v3590_v62, %v3582_v13 }
0x2b35   :  { %5092 = vtanh.f32 %v3592_v18  ;;  %v3996_v18 = vld [vmem:[%s6052_s12] ss:$0 sm:$0xff] }
0x2b39   :  { %v3694_v25 = vpop.permute.xlu1 %3693 }
0x2b3a   :  { %v3696_v28 = vadd.f32 %v3694_v25, %v3686_v7 }
0x2b3c   :  { %5094 = vtanh.f32 %v3696_v28 }
0x2b3f   :  { %v5093_v26 = vpop.eup %5092 }
0x2b40   :  { %3595 = vrot.lane.b32.xlu0 %v5093_v26, %s5123_s4 }
0x2b46   :  { %v5095_v21 = vpop.eup %5094 }
0x2b47   :  { %3699 = vrot.lane.b32.xlu1 %v5095_v21, %s5123_s4 }
0x2bb2   :  { %v3596_v37 = vpop.permute.xlu0 %3595 }
0x2bb3   :  { %v3598_v40 = vmul.f32 %v5089_v11, %v3596_v37 }
0x2bb5   :  { %v3707_v43 = vrot.slane %v3598_v40, 1  ;;  %3704 = vrot.lane.b32.xlu0 %v3598_v40, %s5124_s28 }
0x2bb7   :  { %3708 = vrot.lane.b32.xlu1 %v3707_v43, %s5123_s4 }
0x2bb9   :  { %v3700_v48 = vpop.permute.xlu1 %3699 }
0x2bba   :  { %v3702_v49 = vmul.f32 %v5091_v19, %v3700_v48  ;;  %v4831_v19 = vpack.c.bf16 %v3834_v3, %v3833_v23 }
0x2bbc   :  { %v3716_v6 = vrot.slane %v3702_v49, 1  ;;  %3713 = vrot.lane.b32.xlu0 %v3702_v49, %s5124_s28  ;;  %4832 = vmatpush3.bf16.msra.mxu0 %v4831_v19 }
0x2bbe   :  { %3717 = vrot.lane.b32.xlu1 %v3716_v6, %s5123_s4 }
0x2c27   :  { %v3705_v60 = vpop.permute.xlu0 %3704 }
0x2c29   :  { %v3709_v33 = vpop.permute.xlu1 %3708 }
0x2c2a   :  { %v3711_v0 = vsel %vm159_vm3, %v3705_v60, %v3709_v33 }
0x2c2b   :  { %v3722_v42 = vrot.slane %v3711_v0, 6 }
0x2c2e   :  { %v3714_v8 = vpop.permute.xlu0 %3713 }
0x2c30   :  { %v3718_v2 = vpop.permute.xlu1 %3717 }
0x2c31   :  { %v3720_v9 = vsel %vm159_vm3, %v3714_v8, %v3718_v2 }
0x2c32   :  { %v3725_v51 = vrot.slane %v3720_v9, 7 }
0x2c34   :  { %v3728_v11 = vsel %vm3727_vm7, %v3722_v42, %v3725_v51 }
0x2c35   :  { %v3729_v5 = vmax.f32 %v3728_v11, 0.0 }
0x2c37   :  { %4552 = vmatmul.mubr.msk.f32.vlgmr.msra.gmra.mrb[36].mxu1 %vm1932_vm6, %v3729_v5 }
0x2d0a   :  { %v3814_v63 = vpop.f32.mrb[36].mxu1 }
0x2d0b   :  { %v3815_v16 = vadd.f32 %v3994_v20, %v3814_v63  ;;  %v4553_v13 = vpop.f32.mrb[37].mxu1 }
0x2d0d   :  { %v3818_v62 = vmax.f32 %v3815_v16, 0.0 }
0x2d0f   :  { %4587 = vmatmul.mubr.f32.vlgmr.msra.gmra.mrb[36].mxu0 %v3818_v62 }
0x2de2   :  { %v3908_v22 = vpop.f32.mrb[36].mxu0 }
0x2de3   :  { %v3909_v7 = vadd.f32 %v3996_v18, %v3908_v22  ;;  %v4588_v25 = vpop.f32.mrb[37].mxu0 }
0x2de5   :  { %3913 = vst.msk [vmem:[#allocation2] sm:$0x3] %vm3912_vm8, %v3909_v7 }
0x2de6   :  { %5107 = shalt.err (!%p5104_p4)
}
0x2de7   :  { %s5108_s20 = scalar_lea.hbm %s6053_s13, 32 }
0x2de8   :  { %p5109_p5 = scmp.ne.s32.totalorder %s6053_s13, %s5108_s20  ;;  %p5112_p6 = scmp.lt.u32.totalorder %s5108_s20, %s6053_s13 }
0x2dea   :  { %p5114_p7 = pnand %p5112_p6, %p5109_p5 }
0x2dec   :  { %5117 = shalt.err (!%p5114_p7)
}
0x2ded   :  { %3923 = dma.vmem_to_hbm [thread:$0]  %s3921_s1, 32, %s6053_s13, [#allocation3]  }
0x2dee   :  { %5118 = dma.done.wait [#allocation3], 32  }
0x2def   :  { %5119 = vsyncadd [#allocation3], 4294967264 }
0x2df0   :  { %3927 = vsyncpa [#allocation3], 1 }

</bundles_post_ra>
